<compile_context>
chip_gen: v7x
topology: tpu7x:2x2x1
jax: 0.10.0
libtpu: 0.0.40
codegen_flags: <defaults>
</compile_context>

<pallas_src>
import functools
import math

import jax
import jax.numpy as jnp
import numpy as np
from jax import lax
from jax.experimental import pallas as pl
from jax.experimental.pallas import tpu as pltpu

POS_DIM = 3
FEATS_DIM = 32
M_DIM = 16
EDGE_ATTR_DIM = 4
EA_PAD = 8                                   # edge_attr K padded to multiple of 8
N_LAYERS = 2

DIN = EDGE_ATTR_DIM + 1 + 2 * FEATS_DIM      # 69  edge-MLP input width (fourier=0)
H1 = 2 * DIN                                 # 138 edge-MLP hidden width
H1_PAD = 144                                 # padded to multiple of 8
CH = 4 * M_DIM                               # 64  coors-MLP hidden width
AGG_W = POS_DIM + M_DIM                      # 19  fused aggregation slab width
X_W = POS_DIM + FEATS_DIM                    # 35  node tensor width

LN_EPS = 1e-5                                # torch_geometric LayerNorm eps
COORS_EPS = 1e-8                             # CoorsNorm eps
COORS_SCALE = 0.01                           # norm_coors_scale_init


def _round_up(x, m):
    return (x + m - 1) // m * m


def _silu(x):
    return x * jax.nn.sigmoid(x)


@functools.lru_cache(maxsize=None)
def _vmem_limit_bytes():
    # 128 MiB physical VMEM on v5e/v6e, 64 MiB on v7x; keep compiler headroom.
    try:
        cap = int(pltpu.get_tpu_info().vmem_capacity_bytes)
    except Exception:
        cap = 64 * 1024 * 1024
    return int(min(cap - 16 * 1024 * 1024, 100 * 1024 * 1024))


# ---------------------------------------------------------------------------
# Kernel 1: edge MLP + coors MLP + CoorsNorm + banded bf16 scatter-add
# ---------------------------------------------------------------------------
def edge_kernel(row_start_ref,                      # scalar prefetch (SMEM)
                fdst_ref, fsrc_ref, ea_ref, rel_ref, rank_ref,
                W1d_ref, W1s_ref, W1e_ref, w1dist_ref, b1_ref,
                W2_ref, b2_ref, Wc1_ref, bc1_ref, wc2_ref, bc2_ref, scale_ref,
                agg_ref, *, te, tn_band, e_real):
    k = pl.program_id(0)

    @pl.when(k == 0)
    def _init():
        agg_ref[...] = jnp.zeros_like(agg_ref)

    # ---- edge-MLP layer 1 as split partial matmuls (no (E,72) concat in HBM);
    #      the 1-wide rel_dist column stays in f32 on the VPU ----
    rel = rel_ref[...]                                                 # (te,3) f32
    rel_dist = jnp.sum(rel * rel, axis=-1, keepdims=True)              # (te,1) f32
    h = (jnp.dot(fdst_ref[...], W1d_ref[...], preferred_element_type=jnp.float32)
         + jnp.dot(fsrc_ref[...], W1s_ref[...], preferred_element_type=jnp.float32)
         + jnp.dot(ea_ref[...], W1e_ref[...], preferred_element_type=jnp.float32)
         + rel_dist * w1dist_ref[...]
         + b1_ref[...])
    h = _silu(h)                                                       # (te,144) f32
    m_ij = _silu(jnp.dot(h.astype(jnp.bfloat16), W2_ref[...],
                         preferred_element_type=jnp.float32) + b2_ref[...])  # (te,16)

    # ---- coors MLP: hidden layer on the MXU, 1-wide head on the VPU/XLU ----
    c = _silu(jnp.dot(m_ij.astype(jnp.bfloat16), Wc1_ref[...],
                      preferred_element_type=jnp.float32) + bc1_ref[...])
    coor_w = jnp.tanh(jnp.sum(c * wc2_ref[...], axis=-1, keepdims=True)
                      + bc2_ref[0, 0])                                 # (te,1) f32

    # ---- CoorsNorm in f32 (rsqrt on the EUP; min == torch .clamp(min=eps)) ----
    inv_n = jnp.minimum(lax.rsqrt(rel_dist), 1.0 / COORS_EPS)
    weighted = coor_w * (rel * inv_n * scale_ref[0, 0])                # (te,3) f32

    # ---- banded scatter-add: rank-compressed dst => band span <= tn_band ----
    # Padded-edge validity is folded into the one-hot mask (no value mul).
    row0 = pl.multiple_of(row_start_ref[k], 8)
    local = rank_ref[...] - row0                                       # (1,te) int32
    valid = (k * te + lax.broadcasted_iota(jnp.int32, (1, te), 1)) < e_real
    rows = lax.broadcasted_iota(jnp.int32, (tn_band, te), 0)
    onehot = ((rows == local) & valid).astype(jnp.float32).astype(jnp.bfloat16)
    # single (te,19) RHS slab in registers: weighted coords ++ messages
    vals = jnp.concatenate([weighted, m_ij], axis=-1).astype(jnp.bfloat16)
    band = jnp.dot(onehot, vals, preferred_element_type=jnp.float32)   # (tn_band,19)
    agg_ref[pl.ds(row0, tn_band), :] += band


# ---------------------------------------------------------------------------
# Kernel 2: graph LayerNorm + node MLP + residual + coordinate update (fused)
# ---------------------------------------------------------------------------
def node_kernel(x_ref, agg_ref, stats_ref, lnw_ref, lnb_ref,
                Wn1a_ref, Wn1b_ref, bn1_ref, Wn2_ref, bn2_ref, out_ref):
    x = x_ref[...]                                                     # (tn,35) f32
    coors = x[:, :POS_DIM]
    feats = x[:, POS_DIM:]
    agg = agg_ref[...]                                                 # (tn,19) f32
    coors_out = coors + agg[:, :POS_DIM]
    m_i = agg[:, POS_DIM:]

    mean = stats_ref[:, 0:1]
    inv_den = stats_ref[:, 1:2]
    normed = (feats - mean) * inv_den * lnw_ref[...] + lnb_ref[...]
    hdd = (jnp.dot(normed.astype(jnp.bfloat16), Wn1a_ref[...],
                   preferred_element_type=jnp.float32)
           + jnp.dot(m_i.astype(jnp.bfloat16), Wn1b_ref[...],
                     preferred_element_type=jnp.float32)
           + bn1_ref[...])
    hdd = _silu(hdd)
    hidden = feats + jnp.dot(hdd.astype(jnp.bfloat16), Wn2_ref[...],
                             preferred_element_type=jnp.float32) + bn2_ref[...]

    out_ref[:, :POS_DIM] = coors_out                                   # one 35-wide
    out_ref[:, POS_DIM:] = hidden                                      # output slab


# ---------------------------------------------------------------------------
# Pallas wrappers
# ---------------------------------------------------------------------------
def run_edge_kernel(prep, f_dst, f_src, rel, p, dims):
    te, tn_band = dims["te"], dims["tn_band"]
    ins = [f_dst, f_src, prep["ea_pad"], rel, prep["rank_rows"],
           p["W1d"], p["W1s"], p["W1e"], p["w1dist"], p["b1"],
           p["W2"], p["b2"], p["Wc1"], p["bc1"], p["wc2"], p["bc2"],
           p["coors_scale"]]
    in_specs = ([pl.BlockSpec((te, FEATS_DIM), lambda k, rs: (k, 0)),
                 pl.BlockSpec((te, FEATS_DIM), lambda k, rs: (k, 0)),
                 pl.BlockSpec((te, EA_PAD), lambda k, rs: (k, 0)),
                 pl.BlockSpec((te, POS_DIM), lambda k, rs: (k, 0)),
                 pl.BlockSpec((1, te), lambda k, rs: (0, k))]
                + [pl.BlockSpec(a.shape, lambda k, rs: (0, 0)) for a in ins[5:]])
    kern = functools.partial(edge_kernel, te=te, tn_band=tn_band, e_real=dims["E"])
    return pl.pallas_call(
        kern,
        grid_spec=pltpu.PrefetchScalarGridSpec(
            num_scalar_prefetch=1,
            grid=(dims["n_tiles"],),
            in_specs=in_specs,
            out_specs=pl.BlockSpec((dims["rank_pad"], AGG_W), lambda k, rs: (0, 0))),
        out_shape=jax.ShapeDtypeStruct((dims["rank_pad"], AGG_W), jnp.float32),
        compiler_params=pltpu.CompilerParams(
            dimension_semantics=("arbitrary",),        # reduction over edge tiles
            vmem_limit_bytes=_vmem_limit_bytes()),
    )(prep["row_start"], *ins)


def run_node_kernel(x_p, agg_nodes, stats_p, p, dims):
    tn, n_pad = dims["tn"], dims["n_pad"]
    ins = [x_p, agg_nodes, stats_p, p["ln_w"], p["ln_b"],
           p["Wn1a"], p["Wn1b"], p["bn1"], p["Wn2"], p["bn2"]]
    in_specs = ([pl.BlockSpec((tn, X_W), lambda i: (i, 0)),
                 pl.BlockSpec((tn, AGG_W), lambda i: (i, 0)),
                 pl.BlockSpec((tn, 2), lambda i: (i, 0))]
                + [pl.BlockSpec(a.shape, lambda i: (0, 0)) for a in ins[3:]])
    return pl.pallas_call(
        node_kernel,
        grid=(n_pad // tn,),
        in_specs=in_specs,
        out_specs=pl.BlockSpec((tn, X_W), lambda i: (i, 0)),
        out_shape=jax.ShapeDtypeStruct((n_pad, X_W), jnp.float32),
        compiler_params=pltpu.CompilerParams(
            dimension_semantics=("parallel",),         # split tiles over TCs
            vmem_limit_bytes=_vmem_limit_bytes()),
    )(*ins)


# ---------------------------------------------------------------------------
# Tiling dims + hoisted (layer-invariant) graph preprocessing
# ---------------------------------------------------------------------------
def graph_dims(N, E):
    te = 256 if E >= 256 else _round_up(E, 16)   # capped: bounds one-hot band cost
    e_pad = _round_up(E, te)
    n8 = _round_up(N, 8)
    tn_band = min(te, n8) + 8                    # sorted ranks span <= te per tile
    tn = min(2048, n8)                           # large node tiles (review item)
    return dict(N=N, E=E, te=te, e_pad=e_pad, n_tiles=e_pad // te, n8=n8,
                tn_band=tn_band, rank_pad=n8 + tn_band,
                tn=tn, n_pad=_round_up(n8, tn))


def precompute_graph(edge_index, edge_attr, batch, num_graphs, dims):
    E, pe = dims["E"], dims["e_pad"] - dims["E"]
    src, dst = edge_index[0], edge_index[1]                 # j = source, i = target
    order = jnp.argsort(dst)
    src_s, dst_s, ea_s = src[order], dst[order], edge_attr[order]

    new_seg = jnp.concatenate(
        [jnp.ones((1,), jnp.int32), (dst_s[1:] != dst_s[:-1]).astype(jnp.int32)])
    rank = (jnp.cumsum(new_seg) - 1).astype(jnp.int32)       # (E,) rank-compressed dst

    src_pad = jnp.pad(src_s, (0, pe))
    dst_pad = jnp.pad(dst_s, (0, pe))
    ea_pad = jnp.pad(ea_s, ((0, pe), (0, EA_PAD - EDGE_ATTR_DIM))).astype(jnp.bfloat16)
    rank_p = jnp.pad(rank, (0, pe), mode="edge")
    rank_rows = rank_p.reshape(1, dims["e_pad"])
    row_start = ((rank_p[::dims["te"]] // 8) * 8).astype(jnp.int32)    # (n_tiles,)

    # rank -> node inverse table (1:1 permutation); sentinel row is always zero.
    rank_of_node = jnp.full((dims["n_pad"],), dims["rank_pad"] - 1,
                            jnp.int32).at[dst_s].set(rank)

    counts = jax.ops.segment_sum(jnp.ones((dims["N"],), jnp.float32), batch,
                                 num_segments=num_graphs)
    ln_norm = jnp.maximum(counts, 1.0) * FEATS_DIM           # per-graph element count

    return dict(src_pad=src_pad, dst_pad=dst_pad, ea_pad=ea_pad,
                rank_rows=rank_rows, row_start=row_start,
                rank_of_node=rank_of_node, batch=batch, ln_norm=ln_norm)


# ---------------------------------------------------------------------------
# Parameter init (xavier_normal weights, zero biases; pre-padded / pre-bf16)
# ---------------------------------------------------------------------------
def _xavier(key, fan_in, fan_out):
    std = math.sqrt(2.0 / (fan_in + fan_out))
    return jax.random.normal(key, (fan_in, fan_out), jnp.float32) * std


def init_layer_params(key):
    bf16 = jnp.bfloat16
    ks = jax.random.split(key, 6)
    W1 = _xavier(ks[0], DIN, H1)
    W2 = _xavier(ks[1], H1, M_DIM)
    Wc1 = _xavier(ks[2], M_DIM, CH)
    Wc2 = _xavier(ks[3], CH, 1)
    Wn1 = _xavier(ks[4], FEATS_DIM + M_DIM, 2 * FEATS_DIM)
    Wn2 = _xavier(ks[5], 2 * FEATS_DIM, FEATS_DIM)

    W1p = jnp.zeros((DIN, H1_PAD), jnp.float32).at[:, :H1].set(W1)
    W1e = jnp.zeros((EA_PAD, H1_PAD), jnp.float32).at[:EDGE_ATTR_DIM].set(
        W1p[2 * FEATS_DIM:2 * FEATS_DIM + EDGE_ATTR_DIM])
    W2p = jnp.zeros((H1_PAD, M_DIM), jnp.float32).at[:H1].set(W2)
    return dict(
        # edge_mlp: Linear(69,138) -> SiLU -> Linear(138,16) -> SiLU  (split)
        W1d=W1p[:FEATS_DIM].astype(bf16),
        W1s=W1p[FEATS_DIM:2 * FEATS_DIM].astype(bf16),
        W1e=W1e.astype(bf16),
        w1dist=W1p[DIN - 1:DIN],                       # (1,144) f32 VPU column
        b1=jnp.zeros((1, H1_PAD), jnp.float32),
        W2=W2p.astype(bf16), b2=jnp.zeros((1, M_DIM), jnp.float32),
        # coors_mlp: Linear(16,64) -> SiLU -> Linear(64,1) -> Tanh
        Wc1=Wc1.astype(bf16), bc1=jnp.zeros((1, CH), jnp.float32),
        wc2=Wc2.T,                                     # (1,64) f32 VPU head
        bc2=jnp.zeros((1, 1), jnp.float32),
        coors_scale=jnp.full((1, 1), COORS_SCALE, jnp.float32),
        # node_norm (graph-mode LayerNorm) affine params
        ln_w=jnp.ones((1, FEATS_DIM), jnp.float32),
        ln_b=jnp.zeros((1, FEATS_DIM), jnp.float32),
        # node_mlp: Linear(48,64) -> SiLU -> Linear(64,32)   (concat split)
        Wn1a=Wn1[:FEATS_DIM].astype(bf16),
        Wn1b=Wn1[FEATS_DIM:].astype(bf16),
        bn1=jnp.zeros((1, 2 * FEATS_DIM), jnp.float32),
        Wn2=Wn2.astype(bf16),
        bn2=jnp.zeros((1, FEATS_DIM), jnp.float32),
    )


# ---------------------------------------------------------------------------
# Layer / network forward
# ---------------------------------------------------------------------------
def egnn_sparse_layer(x_p, prep, dims, params, num_graphs):
    N = dims["N"]
    coors = x_p[:, :POS_DIM]
    feats = x_p[:, POS_DIM:]

    # per-layer edge gathers (feats / coors change every layer) -- XLA glue
    feats_bf = feats.astype(jnp.bfloat16)
    f_dst = feats_bf[prep["dst_pad"]]
    f_src = feats_bf[prep["src_pad"]]
    rel = coors[prep["src_pad"]] - coors[prep["dst_pad"]]

    agg = run_edge_kernel(prep, f_dst, f_src, rel, params, dims)
    agg_nodes = agg[prep["rank_of_node"]]                   # gather un-compress

    # per-graph LayerNorm statistics (graph mode: over count*F elements)
    batch = prep["batch"]
    feats_n = feats[:N]
    mean_g = jnp.sum(jax.ops.segment_sum(feats_n, batch, num_segments=num_graphs),
                     axis=-1) / prep["ln_norm"]
    cent = feats_n - mean_g[batch][:, None]
    var_g = jnp.sum(jax.ops.segment_sum(cent * cent, batch, num_segments=num_graphs),
                    axis=-1) / prep["ln_norm"]
    inv_den_g = 1.0 / jnp.sqrt(var_g + LN_EPS)
    stats = jnp.stack([mean_g[batch], inv_den_g[batch]], axis=-1)      # (N, 2)
    stats_p = jnp.pad(stats, ((0, dims["n_pad"] - N), (0, 0)))

    return run_node_kernel(x_p, agg_nodes, stats_p, params, dims)


def egnn_sparse_network(x, edge_index, edge_attr, batch, num_graphs, all_params):
    # embedd_token is a no-op (embedding_dims=[] / edge_embedding_dims=[]).
    N, E = x.shape[0], edge_index.shape[1]
    dims = graph_dims(N, E)
    # layer-invariant preprocessing hoisted out of the layer loop
    prep = precompute_graph(edge_index, edge_attr, batch, num_graphs, dims)
    x_p = jnp.pad(x, ((0, dims["n_pad"] - N), (0, 0)))
    for params in all_params:
        x_p = egnn_sparse_layer(x_p, prep, dims, params, num_graphs)
    return x_p[:N]


# ---------------------------------------------------------------------------
# Matched-precision pure-JAX reference (same math, bf16 MXU operands, f32 acc)
# ---------------------------------------------------------------------------
def _mm_bf16(a, w):
    return jnp.dot(a.astype(jnp.bfloat16), w.astype(jnp.bfloat16),
                   preferred_element_type=jnp.float32)


def _reference_layer(x, edge_index, edge_attr, batch, num_graphs, p):
    N = x.shape[0]
    coors, feats = x[:, :POS_DIM], x[:, POS_DIM:]
    src, dst = edge_index[0], edge_index[1]
    rel = coors[src] - coors[dst]
    rel_dist = jnp.sum(rel * rel, axis=-1, keepdims=True)
    ea_pad = jnp.pad(edge_attr, ((0, 0), (0, EA_PAD - EDGE_ATTR_DIM)))
    h = (_mm_bf16(feats[dst], p["W1d"]) + _mm_bf16(feats[src], p["W1s"])
         + _mm_bf16(ea_pad, p["W1e"]) + rel_dist * p["w1dist"] + p["b1"])
    h = _silu(h)
    m_ij = _silu(_mm_bf16(h, p["W2"]) + p["b2"])
    c = _silu(_mm_bf16(m_ij, p["Wc1"]) + p["bc1"])
    coor_w = jnp.tanh(jnp.sum(c * p["wc2"], axis=-1, keepdims=True) + p["bc2"])
    inv_n = jnp.minimum(lax.rsqrt(rel_dist), 1.0 / COORS_EPS)
    weighted = coor_w * (rel * inv_n * p["coors_scale"])
    # the kernel rounds the scatter operands to bf16 before f32 accumulation
    weighted = weighted.astype(jnp.bfloat16).astype(jnp.float32)
    m_ij_b = m_ij.astype(jnp.bfloat16).astype(jnp.float32)
    coors_out = coors + jnp.zeros((N, POS_DIM), jnp.float32).at[dst].add(weighted)
    m_i = jnp.zeros((N, M_DIM), jnp.float32).at[dst].add(m_ij_b)

    counts = jax.ops.segment_sum(jnp.ones((N,), jnp.float32), batch,
                                 num_segments=num_graphs)
    norm = jnp.maximum(counts, 1.0) * FEATS_DIM
    mean_g = jnp.sum(jax.ops.segment_sum(feats, batch, num_segments=num_graphs), -1) / norm
    cent = feats - mean_g[batch][:, None]
    var_g = jnp.sum(jax.ops.segment_sum(cent * cent, batch, num_segments=num_graphs), -1) / norm
    inv_den = (1.0 / jnp.sqrt(var_g + LN_EPS))[batch][:, None]
    normed = cent * inv_den * p["ln_w"] + p["ln_b"]
    h2 = _silu(_mm_bf16(normed, p["Wn1a"]) + _mm_bf16(m_i, p["Wn1b"]) + p["bn1"])
    hidden = feats + _mm_bf16(h2, p["Wn2"]) + p["bn2"]
    return jnp.concatenate([coors_out, hidden], axis=-1)


def _check_band_invariant(edge_index, N, E):
    """Host-side guard: every edge tile's local rank offset fits in tn_band."""
    dims = graph_dims(N, E)
    dst = np.sort(np.asarray(edge_index[1]))
    rank = np.cumsum(np.concatenate([[1], (dst[1:] != dst[:-1]).astype(np.int64)])) - 1
    rank_p = np.pad(rank, (0, dims["e_pad"] - E), mode="edge")
    for k in range(dims["n_tiles"]):
        tile = rank_p[k * dims["te"]:(k + 1) * dims["te"]]
        row0 = (tile[0] // 8) * 8
        assert tile.max() - row0 < dims["tn_band"], "banded-scatter invariant violated"


if __name__ == "__main__":
    key = jax.random.PRNGKey(0)
    kx, ka, ks0, kd0, ks1, kd1, *kl = jax.random.split(key, 6 + N_LAYERS)

    NODES_PER_GRAPH = 40
    EDGES_PER_GRAPH = 300
    NUM_GRAPHS = 2
    N = NODES_PER_GRAPH * NUM_GRAPHS
    E = EDGES_PER_GRAPH * NUM_GRAPHS

    x = jax.random.normal(kx, (N, X_W), jnp.float32)
    edge_attr = jax.random.normal(ka, (E, EDGE_ATTR_DIM), jnp.float32)
    batch = jnp.repeat(jnp.arange(NUM_GRAPHS, dtype=jnp.int32), NODES_PER_GRAPH)

    src0 = jax.random.randint(ks0, (EDGES_PER_GRAPH,), 0, NODES_PER_GRAPH)
    dst0 = jax.random.randint(kd0, (EDGES_PER_GRAPH,), 0, NODES_PER_GRAPH)
    src1 = jax.random.randint(ks1, (EDGES_PER_GRAPH,), 0, NODES_PER_GRAPH) + NODES_PER_GRAPH
    dst1 = jax.random.randint(kd1, (EDGES_PER_GRAPH,), 0, NODES_PER_GRAPH) + NODES_PER_GRAPH
    edge_index = jnp.stack([jnp.concatenate([src0, src1]),
                            jnp.concatenate([dst0, dst1])], axis=0).astype(jnp.int32)

    all_params = [init_layer_params(k) for k in kl]

    # host-side guard for the banded-scatter invariant (review correctness item)
    _check_band_invariant(edge_index, N, E)

    fwd = jax.jit(egnn_sparse_network, static_argnums=(4,))
    out = jax.block_until_ready(fwd(x, edge_index, edge_attr, batch, NUM_GRAPHS, all_params))

    # numerical sanity check against a matched-precision pure-JAX reference
    ref = x
    for p in all_params:
        ref = _reference_layer(ref, edge_index, edge_attr, batch, NUM_GRAPHS, p)
    ref = jax.block_until_ready(ref)

    assert out.shape == (N, X_W)
    assert bool(jnp.all(jnp.isfinite(out)))
    max_err = float(jnp.max(jnp.abs(out - ref)))
    # tolerance reflects bf16 MXU operands checked against a separate XLA bf16
    # reference (accumulation-order / rounding-boundary differences only).
    assert bool(jnp.allclose(out, ref, atol=1e-2, rtol=1e-2)), f"max abs err {max_err}"

    print("KERNEL_OK")
</pallas_src>

<mosaic_0001>
module attributes {stable_mosaic.version = 11 : i64} {
  func.func private @main(%arg0: i32) attributes {dimension_semantics = [#tpu.dimension_semantics<core_parallel>], iteration_bounds = array<i64: 2>, tpu.core_type = #tpu.core_type<sc_scalar_subcore>, window_params = []} {
    return
  }
}

module attributes {stable_mosaic.version = 11 : i64} {
  func.func private @main(%arg0: i32) attributes {dimension_semantics = [#tpu.dimension_semantics<core_parallel>], iteration_bounds = array<i64: 2>, tpu.core_type = #tpu.core_type<sc_scalar_subcore>, window_params = []} {
    return
  }
}

module attributes {stable_mosaic.version = 11 : i64} {
  func.func @edge_kernel(%arg0: i32, %arg1: memref<3xi32, #tpu.memory_space<smem>>, %arg2: memref<256x32xbf16, #tpu.memory_space<vmem>>, %arg3: memref<256x32xbf16, #tpu.memory_space<vmem>>, %arg4: memref<256x8xbf16, #tpu.memory_space<vmem>>, %arg5: memref<256x3xf32, #tpu.memory_space<vmem>>, %arg6: memref<1x256xi32, #tpu.memory_space<vmem>>, %arg7: memref<32x144xbf16, #tpu.memory_space<vmem>>, %arg8: memref<32x144xbf16, #tpu.memory_space<vmem>>, %arg9: memref<8x144xbf16, #tpu.memory_space<vmem>>, %arg10: memref<1x144xf32, #tpu.memory_space<vmem>>, %arg11: memref<1x144xf32, #tpu.memory_space<vmem>>, %arg12: memref<144x16xbf16, #tpu.memory_space<vmem>>, %arg13: memref<1x16xf32, #tpu.memory_space<vmem>>, %arg14: memref<16x64xbf16, #tpu.memory_space<vmem>>, %arg15: memref<1x64xf32, #tpu.memory_space<vmem>>, %arg16: memref<1x64xf32, #tpu.memory_space<vmem>>, %arg17: memref<1x1xf32, #tpu.memory_space<vmem>>, %arg18: memref<1x1xf32, #tpu.memory_space<vmem>>, %arg19: memref<168x19xf32, #tpu.memory_space<vmem>>) attributes {dimension_semantics = [#tpu.dimension_semantics<arbitrary>], iteration_bounds = array<i64: 3>, scalar_prefetch = 1 : i64, scratch_operands = 0 : i64, tpu.core_type = #tpu.core_type<tc>, window_params = [{transform_indices = @transform_0, window_bounds = array<i64: 256, 32>}, {transform_indices = @transform_1, window_bounds = array<i64: 256, 32>}, {transform_indices = @transform_2, window_bounds = array<i64: 256, 8>}, {transform_indices = @transform_3, window_bounds = array<i64: 256, 3>}, {transform_indices = @transform_4, window_bounds = array<i64: 1, 256>}, {pipeline_mode = #tpu.pipeline_mode<synchronous>, transform_indices = @transform_5, window_bounds = array<i64: 32, 144>}, {pipeline_mode = #tpu.pipeline_mode<synchronous>, transform_indices = @transform_6, window_bounds = array<i64: 32, 144>}, {pipeline_mode = #tpu.pipeline_mode<synchronous>, transform_indices = @transform_7, window_bounds = array<i64: 8, 144>}, {pipeline_mode = #tpu.pipeline_mode<synchronous>, transform_indices = @transform_8, window_bounds = array<i64: 1, 144>}, {pipeline_mode = #tpu.pipeline_mode<synchronous>, transform_indices = @transform_9, window_bounds = array<i64: 1, 144>}, {pipeline_mode = #tpu.pipeline_mode<synchronous>, transform_indices = @transform_10, window_bounds = array<i64: 144, 16>}, {pipeline_mode = #tpu.pipeline_mode<synchronous>, transform_indices = @transform_11, window_bounds = array<i64: 1, 16>}, {pipeline_mode = #tpu.pipeline_mode<synchronous>, transform_indices = @transform_12, window_bounds = array<i64: 16, 64>}, {pipeline_mode = #tpu.pipeline_mode<synchronous>, transform_indices = @transform_13, window_bounds = array<i64: 1, 64>}, {pipeline_mode = #tpu.pipeline_mode<synchronous>, transform_indices = @transform_14, window_bounds = array<i64: 1, 64>}, {pipeline_mode = #tpu.pipeline_mode<synchronous>, transform_indices = @transform_15, window_bounds = array<i64: 1, 1>}, {pipeline_mode = #tpu.pipeline_mode<synchronous>, transform_indices = @transform_16, window_bounds = array<i64: 1, 1>}, {pipeline_mode = #tpu.pipeline_mode<synchronous>, transform_indices = @transform_17, window_bounds = array<i64: 168, 19>}]} {
    %c0_i32 = arith.constant 0 : i32
    %0 = arith.cmpi eq, %arg0, %c0_i32 : i32
    %1 = arith.extui %0 : i1 to i32
    %c0_i32_0 = arith.constant 0 : i32
    %2 = arith.cmpi ne, %1, %c0_i32_0 : i32
    scf.if %2 {
      %cst_47 = arith.constant 0.000000e+00 : f32
      %105 = vector.broadcast %cst_47 : f32 to vector<168x19xf32>
      %c0_48 = arith.constant 0 : index
      %c0_49 = arith.constant 0 : index
      %106 = vector.load %arg19[%c0_48, %c0_49] : memref<168x19xf32, #tpu.memory_space<vmem>>, vector<168x19xf32>
      tpu.vector_store %arg19[%c0_48, %c0_49], %105 {strides = array<i32>} : memref<168x19xf32, #tpu.memory_space<vmem>>, vector<168x19xf32>,
    } else {
    }
    %c0 = arith.constant 0 : index
    %c0_1 = arith.constant 0 : index
    %3 = vector.load %arg5[%c0, %c0_1] : memref<256x3xf32, #tpu.memory_space<vmem>>, vector<256x3xf32>
    %4 = arith.mulf %3, %3 : vector<256x3xf32>
    %cst = arith.constant dense<0.000000e+00> : vector<256xf32>
    %5 = vector.multi_reduction <add>, %4, %cst [1] : vector<256x3xf32> to vector<256xf32>
    %6 = vector.shape_cast %5 : vector<256xf32> to vector<256x1xf32>
    %c0_2 = arith.constant 0 : index
    %c0_3 = arith.constant 0 : index
    %7 = vector.load %arg2[%c0_2, %c0_3] : memref<256x32xbf16, #tpu.memory_space<vmem>>, vector<256x32xbf16>
    %c0_4 = arith.constant 0 : index
    %c0_5 = arith.constant 0 : index
    %8 = vector.load %arg7[%c0_4, %c0_5] : memref<32x144xbf16, #tpu.memory_space<vmem>>, vector<32x144xbf16>
    %cst_6 = arith.constant dense<0.000000e+00> : vector<256x144xf32>
    %9 = tpu.matmul %7, %8, %cst_6 {dimension_numbers = #tpu.dot_dimension_numbers<[1], [0], [0], [1], [0, 0, 1, 1], [], []>} : vector<256x32xbf16>, vector<32x144xbf16>, vector<256x144xf32> -> vector<256x144xf32>
    %c0_7 = arith.constant 0 : index
    %c0_8 = arith.constant 0 : index
    %10 = vector.load %arg3[%c0_7, %c0_8] : memref<256x32xbf16, #tpu.memory_space<vmem>>, vector<256x32xbf16>
    %c0_9 = arith.constant 0 : index
    %c0_10 = arith.constant 0 : index
    %11 = vector.load %arg8[%c0_9, %c0_10] : memref<32x144xbf16, #tpu.memory_space<vmem>>, vector<32x144xbf16>
    %cst_11 = arith.constant dense<0.000000e+00> : vector<256x144xf32>
    %12 = tpu.matmul %10, %11, %cst_11 {dimension_numbers = #tpu.dot_dimension_numbers<[1], [0], [0], [1], [0, 0, 1, 1], [], []>} : vector<256x32xbf16>, vector<32x144xbf16>, vector<256x144xf32> -> vector<256x144xf32>
    %13 = arith.addf %9, %12 : vector<256x144xf32>
    %c0_12 = arith.constant 0 : index
    %c0_13 = arith.constant 0 : index
    %14 = vector.load %arg4[%c0_12, %c0_13] : memref<256x8xbf16, #tpu.memory_space<vmem>>, vector<256x8xbf16>
    %c0_14 = arith.constant 0 : index
    %c0_15 = arith.constant 0 : index
    %15 = vector.load %arg9[%c0_14, %c0_15] : memref<8x144xbf16, #tpu.memory_space<vmem>>, vector<8x144xbf16>
    %cst_16 = arith.constant dense<0.000000e+00> : vector<256x144xf32>
    %16 = tpu.matmul %14, %15, %cst_16 {dimension_numbers = #tpu.dot_dimension_numbers<[1], [0], [0], [1], [0, 0, 1, 1], [], []>} : vector<256x8xbf16>, vector<8x144xbf16>, vector<256x144xf32> -> vector<256x144xf32>
    %17 = arith.addf %13, %16 : vector<256x144xf32>
    %c0_17 = arith.constant 0 : index
    %c0_18 = arith.constant 0 : index
    %18 = vector.load %arg10[%c0_17, %c0_18] : memref<1x144xf32, #tpu.memory_space<vmem>>, vector<1x144xf32>
    %19 = vector.broadcast %6 : vector<256x1xf32> to vector<256x144xf32>
    %20 = vector.broadcast %18 : vector<1x144xf32> to vector<256x144xf32>
    %21 = arith.mulf %19, %20 : vector<256x144xf32>
    %22 = arith.addf %17, %21 : vector<256x144xf32>
    %c0_19 = arith.constant 0 : index
    %c0_20 = arith.constant 0 : index
    %23 = vector.load %arg11[%c0_19, %c0_20] : memref<1x144xf32, #tpu.memory_space<vmem>>, vector<1x144xf32>
    %24 = vector.broadcast %23 : vector<1x144xf32> to vector<256x144xf32>
    %25 = arith.addf %22, %24 : vector<256x144xf32>
    %26 = arith.negf %25 : vector<256x144xf32>
    %27 = math.exp %26 : vector<256x144xf32>
    %cst_21 = arith.constant 1.000000e+00 : f32
    %28 = vector.broadcast %cst_21 : f32 to vector<256x144xf32>
    %29 = arith.addf %28, %27 : vector<256x144xf32>
    %30 = arith.divf %28, %29 : vector<256x144xf32>
    %31 = arith.mulf %25, %30 : vector<256x144xf32>
    %32 = arith.truncf %31 : vector<256x144xf32> to vector<256x144xbf16>
    %c0_22 = arith.constant 0 : index
    %c0_23 = arith.constant 0 : index
    %33 = vector.load %arg12[%c0_22, %c0_23] : memref<144x16xbf16, #tpu.memory_space<vmem>>, vector<144x16xbf16>
    %cst_24 = arith.constant dense<0.000000e+00> : vector<256x16xf32>
    %34 = tpu.matmul %32, %33, %cst_24 {dimension_numbers = #tpu.dot_dimension_numbers<[1], [0], [0], [1], [0, 0, 1, 1], [], []>} : vector<256x144xbf16>, vector<144x16xbf16>, vector<256x16xf32> -> vector<256x16xf32>
    %c0_25 = arith.constant 0 : index
    %c0_26 = arith.constant 0 : index
    %35 = vector.load %arg13[%c0_25, %c0_26] : memref<1x16xf32, #tpu.memory_space<vmem>>, vector<1x16xf32>
    %36 = vector.broadcast %35 : vector<1x16xf32> to vector<256x16xf32>
    %37 = arith.addf %34, %36 : vector<256x16xf32>
    %38 = arith.negf %37 : vector<256x16xf32>
    %39 = math.exp %38 : vector<256x16xf32>
    %cst_27 = arith.constant 1.000000e+00 : f32
    %40 = vector.broadcast %cst_27 : f32 to vector<256x16xf32>
    %41 = arith.addf %40, %39 : vector<256x16xf32>
    %42 = arith.divf %40, %41 : vector<256x16xf32>
    %43 = arith.mulf %37, %42 : vector<256x16xf32>
    %44 = arith.truncf %43 : vector<256x16xf32> to vector<256x16xbf16>
    %c0_28 = arith.constant 0 : index
    %c0_29 = arith.constant 0 : index
    %45 = vector.load %arg14[%c0_28, %c0_29] : memref<16x64xbf16, #tpu.memory_space<vmem>>, vector<16x64xbf16>
    %cst_30 = arith.constant dense<0.000000e+00> : vector<256x64xf32>
    %46 = tpu.matmul %44, %45, %cst_30 {dimension_numbers = #tpu.dot_dimension_numbers<[1], [0], [0], [1], [0, 0, 1, 1], [], []>} : vector<256x16xbf16>, vector<16x64xbf16>, vector<256x64xf32> -> vector<256x64xf32>
    %c0_31 = arith.constant 0 : index
    %c0_32 = arith.constant 0 : index
    %47 = vector.load %arg15[%c0_31, %c0_32] : memref<1x64xf32, #tpu.memory_space<vmem>>, vector<1x64xf32>
    %48 = vector.broadcast %47 : vector<1x64xf32> to vector<256x64xf32>
    %49 = arith.addf %46, %48 : vector<256x64xf32>
    %50 = arith.negf %49 : vector<256x64xf32>
    %51 = math.exp %50 : vector<256x64xf32>
    %cst_33 = arith.constant 1.000000e+00 : f32
    %52 = vector.broadcast %cst_33 : f32 to vector<256x64xf32>
    %53 = arith.addf %52, %51 : vector<256x64xf32>
    %54 = arith.divf %52, %53 : vector<256x64xf32>
    %55 = arith.mulf %49, %54 : vector<256x64xf32>
    %c0_34 = arith.constant 0 : index
    %c0_35 = arith.constant 0 : index
    %56 = vector.load %arg16[%c0_34, %c0_35] : memref<1x64xf32, #tpu.memory_space<vmem>>, vector<1x64xf32>
    %57 = vector.broadcast %56 : vector<1x64xf32> to vector<256x64xf32>
    %58 = arith.mulf %55, %57 : vector<256x64xf32>
    %cst_36 = arith.constant dense<0.000000e+00> : vector<256xf32>
    %59 = vector.multi_reduction <add>, %58, %cst_36 [1] : vector<256x64xf32> to vector<256xf32>
    %60 = vector.shape_cast %59 : vector<256xf32> to vector<256x1xf32>
    %c0_37 = arith.constant 0 : index
    %c0_38 = arith.constant 0 : index
    %61 = vector.load %arg17[%c0_37, %c0_38] : memref<1x1xf32, #tpu.memory_space<vmem>>, vector<1x1xf32>
    %62 = vector.extract %61[0, 0] : f32 from vector<1x1xf32>
    %63 = vector.broadcast %62 : f32 to vector<256x1xf32>
    %64 = arith.addf %60, %63 : vector<256x1xf32>
    %65 = math.tanh %64 : vector<256x1xf32>
    %66 = math.rsqrt %6 : vector<256x1xf32>
    %cst_39 = arith.constant 1.000000e+08 : f32
    %67 = vector.broadcast %cst_39 : f32 to vector<256x1xf32>
    %68 = arith.minimumf %66, %67 : vector<256x1xf32>
    %69 = vector.broadcast %68 : vector<256x1xf32> to vector<256x3xf32>
    %70 = arith.mulf %3, %69 : vector<256x3xf32>
    %c0_40 = arith.constant 0 : index
    %c0_41 = arith.constant 0 : index
    %71 = vector.load %arg18[%c0_40, %c0_41] : memref<1x1xf32, #tpu.memory_space<vmem>>, vector<1x1xf32>
    %72 = vector.extract %71[0, 0] : f32 from vector<1x1xf32>
    %73 = vector.broadcast %72 : f32 to vector<256x3xf32>
    %74 = arith.mulf %70, %73 : vector<256x3xf32>
    %75 = vector.broadcast %65 : vector<256x1xf32> to vector<256x3xf32>
    %76 = arith.mulf %75, %74 : vector<256x3xf32>
    %77 = arith.index_cast %arg0 : i32 to index
    %78 = memref.load %arg1[%77] : memref<3xi32, #tpu.memory_space<smem>>
    %79 = tpu.assume_multiple %78, 8 : i32
    %c0_42 = arith.constant 0 : index
    %c0_43 = arith.constant 0 : index
    %80 = vector.load %arg6[%c0_42, %c0_43] : memref<1x256xi32, #tpu.memory_space<vmem>>, vector<1x256xi32>
    %81 = vector.broadcast %79 : i32 to vector<1x256xi32>
    %82 = arith.subi %80, %81 : vector<1x256xi32>
    %c256_i32 = arith.constant 256 : i32
    %83 = arith.muli %arg0, %c256_i32 : i32
    %84 = tpu.iota {dimensions = array<i32: 1>} : vector<1x256xi32>
    %85 = vector.broadcast %83 : i32 to vector<1x256xi32>
    %86 = arith.addi %85, %84 : vector<1x256xi32>
    %c600_i32 = arith.constant 600 : i32
    %87 = vector.broadcast %c600_i32 : i32 to vector<1x256xi32>
    %88 = arith.cmpi slt, %86, %87 : vector<1x256xi32>
    %89 = tpu.iota {dimensions = array<i32: 0>} : vector<88x256xi32>
    %90 = vector.broadcast %82 : vector<1x256xi32> to vector<88x256xi32>
    %91 = arith.cmpi eq, %89, %90 : vector<88x256xi32>
    %92 = vector.broadcast %88 : vector<1x256xi1> to vector<88x256xi1>
    %93 = arith.andi %91, %92 : vector<88x256xi1>
    %94 = arith.extui %93 : vector<88x256xi1> to vector<88x256xi32>
    %95 = arith.sitofp %94 : vector<88x256xi32> to vector<88x256xf32>
    %96 = arith.truncf %95 : vector<88x256xf32> to vector<88x256xbf16>
    %97 = tpu.concatenate %76, %43 in 1 : vector<256x3xf32>, vector<256x16xf32> -> vector<256x19xf32>
    %98 = arith.truncf %97 : vector<256x19xf32> to vector<256x19xbf16>
    %cst_44 = arith.constant dense<0.000000e+00> : vector<88x19xf32>
    %99 = tpu.matmul %96, %98, %cst_44 {dimension_numbers = #tpu.dot_dimension_numbers<[1], [0], [0], [1], [0, 0, 1, 1], [], []>} : vector<88x256xbf16>, vector<256x19xbf16>, vector<88x19xf32> -> vector<88x19xf32>
    %100 = arith.index_cast %79 : i32 to index
    %c0_45 = arith.constant 0 : index
    %101 = vector.load %arg19[%100, %c0_45] : memref<168x19xf32, #tpu.memory_space<vmem>>, vector<88x19xf32>
    %102 = arith.addf %101, %99 : vector<88x19xf32>
    %103 = arith.index_cast %79 : i32 to index
    %c0_46 = arith.constant 0 : index
    %104 = vector.load %arg19[%103, %c0_46] : memref<168x19xf32, #tpu.memory_space<vmem>>, vector<88x19xf32>
    tpu.vector_store %arg19[%103, %c0_46], %102 {strides = array<i32>} : memref<168x19xf32, #tpu.memory_space<vmem>>, vector<88x19xf32>,
    return
  }
  func.func @transform_0(%arg0: i32, %arg1: memref<3xi32, #tpu.memory_space<smem>>) -> (i32, i32) {
    %c0_i32 = arith.constant 0 : i32
    %c0_i32_0 = arith.constant 0 : i32
    return %arg0, %c0_i32 : i32, i32
  }
  func.func @transform_1(%arg0: i32, %arg1: memref<3xi32, #tpu.memory_space<smem>>) -> (i32, i32) {
    %c0_i32 = arith.constant 0 : i32
    %c0_i32_0 = arith.constant 0 : i32
    return %arg0, %c0_i32 : i32, i32
  }
  func.func @transform_2(%arg0: i32, %arg1: memref<3xi32, #tpu.memory_space<smem>>) -> (i32, i32) {
    %c0_i32 = arith.constant 0 : i32
    %c0_i32_0 = arith.constant 0 : i32
    return %arg0, %c0_i32 : i32, i32
  }
  func.func @transform_3(%arg0: i32, %arg1: memref<3xi32, #tpu.memory_space<smem>>) -> (i32, i32) {
    %c0_i32 = arith.constant 0 : i32
    %c0_i32_0 = arith.constant 0 : i32
    return %arg0, %c0_i32 : i32, i32
  }
  func.func @transform_4(%arg0: i32, %arg1: memref<3xi32, #tpu.memory_space<smem>>) -> (i32, i32) {
    %c0_i32 = arith.constant 0 : i32
    %c0_i32_0 = arith.constant 0 : i32
    return %c0_i32, %arg0 : i32, i32
  }
  func.func @transform_5(%arg0: i32, %arg1: memref<3xi32, #tpu.memory_space<smem>>) -> (i32, i32) {
    %c0_i32 = arith.constant 0 : i32
    %c0_i32_0 = arith.constant 0 : i32
    %c0_i32_1 = arith.constant 0 : i32
    return %c0_i32, %c0_i32_0 : i32, i32
  }
  func.func @transform_6(%arg0: i32, %arg1: memref<3xi32, #tpu.memory_space<smem>>) -> (i32, i32) {
    %c0_i32 = arith.constant 0 : i32
    %c0_i32_0 = arith.constant 0 : i32
    %c0_i32_1 = arith.constant 0 : i32
    return %c0_i32, %c0_i32_0 : i32, i32
  }
  func.func @transform_7(%arg0: i32, %arg1: memref<3xi32, #tpu.memory_space<smem>>) -> (i32, i32) {
    %c0_i32 = arith.constant 0 : i32
    %c0_i32_0 = arith.constant 0 : i32
    %c0_i32_1 = arith.constant 0 : i32
    return %c0_i32, %c0_i32_0 : i32, i32
  }
  func.func @transform_8(%arg0: i32, %arg1: memref<3xi32, #tpu.memory_space<smem>>) -> (i32, i32) {
    %c0_i32 = arith.constant 0 : i32
    %c0_i32_0 = arith.constant 0 : i32
    %c0_i32_1 = arith.constant 0 : i32
    return %c0_i32, %c0_i32_0 : i32, i32
  }
  func.func @transform_9(%arg0: i32, %arg1: memref<3xi32, #tpu.memory_space<smem>>) -> (i32, i32) {
    %c0_i32 = arith.constant 0 : i32
    %c0_i32_0 = arith.constant 0 : i32
    %c0_i32_1 = arith.constant 0 : i32
    return %c0_i32, %c0_i32_0 : i32, i32
  }
  func.func @transform_10(%arg0: i32, %arg1: memref<3xi32, #tpu.memory_space<smem>>) -> (i32, i32) {
    %c0_i32 = arith.constant 0 : i32
    %c0_i32_0 = arith.constant 0 : i32
    %c0_i32_1 = arith.constant 0 : i32
    return %c0_i32, %c0_i32_0 : i32, i32
  }
  func.func @transform_11(%arg0: i32, %arg1: memref<3xi32, #tpu.memory_space<smem>>) -> (i32, i32) {
    %c0_i32 = arith.constant 0 : i32
    %c0_i32_0 = arith.constant 0 : i32
    %c0_i32_1 = arith.constant 0 : i32
    return %c0_i32, %c0_i32_0 : i32, i32
  }
  func.func @transform_12(%arg0: i32, %arg1: memref<3xi32, #tpu.memory_space<smem>>) -> (i32, i32) {
    %c0_i32 = arith.constant 0 : i32
    %c0_i32_0 = arith.constant 0 : i32
    %c0_i32_1 = arith.constant 0 : i32
    return %c0_i32, %c0_i32_0 : i32, i32
  }
  func.func @transform_13(%arg0: i32, %arg1: memref<3xi32, #tpu.memory_space<smem>>) -> (i32, i32) {
    %c0_i32 = arith.constant 0 : i32
    %c0_i32_0 = arith.constant 0 : i32
    %c0_i32_1 = arith.constant 0 : i32
    return %c0_i32, %c0_i32_0 : i32, i32
  }
  func.func @transform_14(%arg0: i32, %arg1: memref<3xi32, #tpu.memory_space<smem>>) -> (i32, i32) {
    %c0_i32 = arith.constant 0 : i32
    %c0_i32_0 = arith.constant 0 : i32
    %c0_i32_1 = arith.constant 0 : i32
    return %c0_i32, %c0_i32_0 : i32, i32
  }
  func.func @transform_15(%arg0: i32, %arg1: memref<3xi32, #tpu.memory_space<smem>>) -> (i32, i32) {
    %c0_i32 = arith.constant 0 : i32
    %c0_i32_0 = arith.constant 0 : i32
    %c0_i32_1 = arith.constant 0 : i32
    return %c0_i32, %c0_i32_0 : i32, i32
  }
  func.func @transform_16(%arg0: i32, %arg1: memref<3xi32, #tpu.memory_space<smem>>) -> (i32, i32) {
    %c0_i32 = arith.constant 0 : i32
    %c0_i32_0 = arith.constant 0 : i32
    %c0_i32_1 = arith.constant 0 : i32
    return %c0_i32, %c0_i32_0 : i32, i32
  }
  func.func @transform_17(%arg0: i32, %arg1: memref<3xi32, #tpu.memory_space<smem>>) -> (i32, i32) {
    %c0_i32 = arith.constant 0 : i32
    %c0_i32_0 = arith.constant 0 : i32
    %c0_i32_1 = arith.constant 0 : i32
    return %c0_i32, %c0_i32_0 : i32, i32
  }
}

module attributes {stable_mosaic.version = 11 : i64} {
  func.func @node_kernel(%arg0: i32, %arg1: memref<80x35xf32, #tpu.memory_space<vmem>>, %arg2: memref<80x19xf32, #tpu.memory_space<vmem>>, %arg3: memref<80x2xf32, #tpu.memory_space<vmem>>, %arg4: memref<1x32xf32, #tpu.memory_space<vmem>>, %arg5: memref<1x32xf32, #tpu.memory_space<vmem>>, %arg6: memref<32x64xbf16, #tpu.memory_space<vmem>>, %arg7: memref<16x64xbf16, #tpu.memory_space<vmem>>, %arg8: memref<1x64xf32, #tpu.memory_space<vmem>>, %arg9: memref<64x32xbf16, #tpu.memory_space<vmem>>, %arg10: memref<1x32xf32, #tpu.memory_space<vmem>>, %arg11: memref<80x35xf32, #tpu.memory_space<vmem>>) attributes {dimension_semantics = [#tpu.dimension_semantics<parallel>], iteration_bounds = array<i64: 1>, scalar_prefetch = 0 : i64, scratch_operands = 0 : i64, tpu.core_type = #tpu.core_type<tc>, window_params = [{transform_indices = @transform_0, window_bounds = array<i64: 80, 35>}, {transform_indices = @transform_1, window_bounds = array<i64: 80, 19>}, {transform_indices = @transform_2, window_bounds = array<i64: 80, 2>}, {pipeline_mode = #tpu.pipeline_mode<synchronous>, transform_indices = @transform_3, window_bounds = array<i64: 1, 32>}, {pipeline_mode = #tpu.pipeline_mode<synchronous>, transform_indices = @transform_4, window_bounds = array<i64: 1, 32>}, {pipeline_mode = #tpu.pipeline_mode<synchronous>, transform_indices = @transform_5, window_bounds = array<i64: 32, 64>}, {pipeline_mode = #tpu.pipeline_mode<synchronous>, transform_indices = @transform_6, window_bounds = array<i64: 16, 64>}, {pipeline_mode = #tpu.pipeline_mode<synchronous>, transform_indices = @transform_7, window_bounds = array<i64: 1, 64>}, {pipeline_mode = #tpu.pipeline_mode<synchronous>, transform_indices = @transform_8, window_bounds = array<i64: 64, 32>}, {pipeline_mode = #tpu.pipeline_mode<synchronous>, transform_indices = @transform_9, window_bounds = array<i64: 1, 32>}, {transform_indices = @transform_10, window_bounds = array<i64: 80, 35>}]} {
    %c0 = arith.constant 0 : index
    %c0_0 = arith.constant 0 : index
    %0 = vector.load %arg1[%c0, %c0_0] : memref<80x35xf32, #tpu.memory_space<vmem>>, vector<80x35xf32>
    %1 = vector.extract_strided_slice %0 {offsets = [0, 0], sizes = [80, 3], strides = [1, 1]} : vector<80x35xf32> to vector<80x3xf32>
    %2 = vector.extract_strided_slice %0 {offsets = [0, 3], sizes = [80, 32], strides = [1, 1]} : vector<80x35xf32> to vector<80x32xf32>
    %c0_1 = arith.constant 0 : index
    %c0_2 = arith.constant 0 : index
    %3 = vector.load %arg2[%c0_1, %c0_2] : memref<80x19xf32, #tpu.memory_space<vmem>>, vector<80x19xf32>
    %4 = vector.extract_strided_slice %3 {offsets = [0, 0], sizes = [80, 3], strides = [1, 1]} : vector<80x19xf32> to vector<80x3xf32>
    %5 = arith.addf %1, %4 : vector<80x3xf32>
    %6 = vector.extract_strided_slice %3 {offsets = [0, 3], sizes = [80, 16], strides = [1, 1]} : vector<80x19xf32> to vector<80x16xf32>
    %c0_3 = arith.constant 0 : index
    %c0_4 = arith.constant 0 : index
    %7 = vector.load %arg3[%c0_3, %c0_4] : memref<80x2xf32, #tpu.memory_space<vmem>>, vector<80x1xf32>
    %c0_5 = arith.constant 0 : index
    %c1 = arith.constant 1 : index
    %8 = vector.load %arg3[%c0_5, %c1] : memref<80x2xf32, #tpu.memory_space<vmem>>, vector<80x1xf32>
    %9 = vector.broadcast %7 : vector<80x1xf32> to vector<80x32xf32>
    %10 = arith.subf %2, %9 : vector<80x32xf32>
    %11 = vector.broadcast %8 : vector<80x1xf32> to vector<80x32xf32>
    %12 = arith.mulf %10, %11 : vector<80x32xf32>
    %c0_6 = arith.constant 0 : index
    %c0_7 = arith.constant 0 : index
    %13 = vector.load %arg4[%c0_6, %c0_7] : memref<1x32xf32, #tpu.memory_space<vmem>>, vector<1x32xf32>
    %14 = vector.broadcast %13 : vector<1x32xf32> to vector<80x32xf32>
    %15 = arith.mulf %12, %14 : vector<80x32xf32>
    %c0_8 = arith.constant 0 : index
    %c0_9 = arith.constant 0 : index
    %16 = vector.load %arg5[%c0_8, %c0_9] : memref<1x32xf32, #tpu.memory_space<vmem>>, vector<1x32xf32>
    %17 = vector.broadcast %16 : vector<1x32xf32> to vector<80x32xf32>
    %18 = arith.addf %15, %17 : vector<80x32xf32>
    %19 = arith.truncf %18 : vector<80x32xf32> to vector<80x32xbf16>
    %c0_10 = arith.constant 0 : index
    %c0_11 = arith.constant 0 : index
    %20 = vector.load %arg6[%c0_10, %c0_11] : memref<32x64xbf16, #tpu.memory_space<vmem>>, vector<32x64xbf16>
    %cst = arith.constant dense<0.000000e+00> : vector<80x64xf32>
    %21 = tpu.matmul %19, %20, %cst {dimension_numbers = #tpu.dot_dimension_numbers<[1], [0], [0], [1], [0, 0, 1, 1], [], []>} : vector<80x32xbf16>, vector<32x64xbf16>, vector<80x64xf32> -> vector<80x64xf32>
    %22 = arith.truncf %6 : vector<80x16xf32> to vector<80x16xbf16>
    %c0_12 = arith.constant 0 : index
    %c0_13 = arith.constant 0 : index
    %23 = vector.load %arg7[%c0_12, %c0_13] : memref<16x64xbf16, #tpu.memory_space<vmem>>, vector<16x64xbf16>
    %cst_14 = arith.constant dense<0.000000e+00> : vector<80x64xf32>
    %24 = tpu.matmul %22, %23, %cst_14 {dimension_numbers = #tpu.dot_dimension_numbers<[1], [0], [0], [1], [0, 0, 1, 1], [], []>} : vector<80x16xbf16>, vector<16x64xbf16>, vector<80x64xf32> -> vector<80x64xf32>
    %25 = arith.addf %21, %24 : vector<80x64xf32>
    %c0_15 = arith.constant 0 : index
    %c0_16 = arith.constant 0 : index
    %26 = vector.load %arg8[%c0_15, %c0_16] : memref<1x64xf32, #tpu.memory_space<vmem>>, vector<1x64xf32>
    %27 = vector.broadcast %26 : vector<1x64xf32> to vector<80x64xf32>
    %28 = arith.addf %25, %27 : vector<80x64xf32>
    %29 = arith.negf %28 : vector<80x64xf32>
    %30 = math.exp %29 : vector<80x64xf32>
    %cst_17 = arith.constant 1.000000e+00 : f32
    %31 = vector.broadcast %cst_17 : f32 to vector<80x64xf32>
    %32 = arith.addf %31, %30 : vector<80x64xf32>
    %33 = arith.divf %31, %32 : vector<80x64xf32>
    %34 = arith.mulf %28, %33 : vector<80x64xf32>
    %35 = arith.truncf %34 : vector<80x64xf32> to vector<80x64xbf16>
    %c0_18 = arith.constant 0 : index
    %c0_19 = arith.constant 0 : index
    %36 = vector.load %arg9[%c0_18, %c0_19] : memref<64x32xbf16, #tpu.memory_space<vmem>>, vector<64x32xbf16>
    %cst_20 = arith.constant dense<0.000000e+00> : vector<80x32xf32>
    %37 = tpu.matmul %35, %36, %cst_20 {dimension_numbers = #tpu.dot_dimension_numbers<[1], [0], [0], [1], [0, 0, 1, 1], [], []>} : vector<80x64xbf16>, vector<64x32xbf16>, vector<80x32xf32> -> vector<80x32xf32>
    %38 = arith.addf %2, %37 : vector<80x32xf32>
    %c0_21 = arith.constant 0 : index
    %c0_22 = arith.constant 0 : index
    %39 = vector.load %arg10[%c0_21, %c0_22] : memref<1x32xf32, #tpu.memory_space<vmem>>, vector<1x32xf32>
    %40 = vector.broadcast %39 : vector<1x32xf32> to vector<80x32xf32>
    %41 = arith.addf %38, %40 : vector<80x32xf32>
    %c0_23 = arith.constant 0 : index
    %c0_24 = arith.constant 0 : index
    %42 = vector.load %arg11[%c0_23, %c0_24] : memref<80x35xf32, #tpu.memory_space<vmem>>, vector<80x3xf32>
    tpu.vector_store %arg11[%c0_23, %c0_24], %5 {strides = array<i32>} : memref<80x35xf32, #tpu.memory_space<vmem>>, vector<80x3xf32>,
    %c0_25 = arith.constant 0 : index
    %c3 = arith.constant 3 : index
    %43 = vector.load %arg11[%c0_25, %c3] : memref<80x35xf32, #tpu.memory_space<vmem>>, vector<80x32xf32>
    tpu.vector_store %arg11[%c0_25, %c3], %41 {strides = array<i32>} : memref<80x35xf32, #tpu.memory_space<vmem>>, vector<80x32xf32>,
    return
  }
  func.func @transform_0(%arg0: i32) -> (i32, i32) {
    %c0_i32 = arith.constant 0 : i32
    %c0_i32_0 = arith.constant 0 : i32
    return %arg0, %c0_i32 : i32, i32
  }
  func.func @transform_1(%arg0: i32) -> (i32, i32) {
    %c0_i32 = arith.constant 0 : i32
    %c0_i32_0 = arith.constant 0 : i32
    return %arg0, %c0_i32 : i32, i32
  }
  func.func @transform_2(%arg0: i32) -> (i32, i32) {
    %c0_i32 = arith.constant 0 : i32
    %c0_i32_0 = arith.constant 0 : i32
    return %arg0, %c0_i32 : i32, i32
  }
  func.func @transform_3(%arg0: i32) -> (i32, i32) {
    %c0_i32 = arith.constant 0 : i32
    %c0_i32_0 = arith.constant 0 : i32
    %c0_i32_1 = arith.constant 0 : i32
    return %c0_i32, %c0_i32_0 : i32, i32
  }
  func.func @transform_4(%arg0: i32) -> (i32, i32) {
    %c0_i32 = arith.constant 0 : i32
    %c0_i32_0 = arith.constant 0 : i32
    %c0_i32_1 = arith.constant 0 : i32
    return %c0_i32, %c0_i32_0 : i32, i32
  }
  func.func @transform_5(%arg0: i32) -> (i32, i32) {
    %c0_i32 = arith.constant 0 : i32
    %c0_i32_0 = arith.constant 0 : i32
    %c0_i32_1 = arith.constant 0 : i32
    return %c0_i32, %c0_i32_0 : i32, i32
  }
  func.func @transform_6(%arg0: i32) -> (i32, i32) {
    %c0_i32 = arith.constant 0 : i32
    %c0_i32_0 = arith.constant 0 : i32
    %c0_i32_1 = arith.constant 0 : i32
    return %c0_i32, %c0_i32_0 : i32, i32
  }
  func.func @transform_7(%arg0: i32) -> (i32, i32) {
    %c0_i32 = arith.constant 0 : i32
    %c0_i32_0 = arith.constant 0 : i32
    %c0_i32_1 = arith.constant 0 : i32
    return %c0_i32, %c0_i32_0 : i32, i32
  }
  func.func @transform_8(%arg0: i32) -> (i32, i32) {
    %c0_i32 = arith.constant 0 : i32
    %c0_i32_0 = arith.constant 0 : i32
    %c0_i32_1 = arith.constant 0 : i32
    return %c0_i32, %c0_i32_0 : i32, i32
  }
  func.func @transform_9(%arg0: i32) -> (i32, i32) {
    %c0_i32 = arith.constant 0 : i32
    %c0_i32_0 = arith.constant 0 : i32
    %c0_i32_1 = arith.constant 0 : i32
    return %c0_i32, %c0_i32_0 : i32, i32
  }
  func.func @transform_10(%arg0: i32) -> (i32, i32) {
    %c0_i32 = arith.constant 0 : i32
    %c0_i32_0 = arith.constant 0 : i32
    return %arg0, %c0_i32 : i32, i32
  }
}

</mosaic_0001>

<bundles_post_ra>
// kernel: sub.16
= control target key start
LH: loop header
LB: loop body
LE: loop exit
PB: predicated region body
PF: predicated region fallthrough
CT: control target
= control target key end

     0   :  { %s2124_s0 = inlined_call_operand.vmem [shape: f32[768,3], index: 0, kind: input, shape index: {}]   ;;  %s2125_s1 = inlined_call_operand.vmem [shape: f32[768,3], index: 1, kind: input, shape index: {}]   ;;  %s2126_s2 = inlined_call_operand.vmem [shape: f32[768,3], index: 2, kind: output, shape index: {}]  }
   0x1   :  { %v3_v0 = vld [vmem:[%s2124_s0] sm:$0xff]  ;;  %v960_v2 = vld [vmem:[%s2124_s0 + $0x8] sm:$0xff]  ;;  %v963_v5 = vld [vmem:[%s2124_s0 + $0x10] sm:$0xff] }
   0x2   :  { %v4_v1 = vld [vmem:[%s2125_s1] sm:$0xff]  ;;  %v961_v4 = vld [vmem:[%s2125_s1 + $0x8] sm:$0xff]  ;;  %v964_v6 = vld [vmem:[%s2125_s1 + $0x10] sm:$0xff] }
   0x3   :  { %v7_v3 = vsub.f32 %v3_v0, %v4_v1  ;;  %v16_v7 = vsub.f32 %v960_v2, %v961_v4  ;;  %v26_v8 = vsub.f32 %v963_v5, %v964_v6  ;;  %v966_v9 = vld [vmem:[%s2124_s0 + $0x18] sm:$0xff]  ;;  %v969_v11 = vld [vmem:[%s2124_s0 + $0x20] sm:$0xff]  ;;  %v972_v14 = vld [vmem:[%s2124_s0 + $0x28] sm:$0xff] }
   0x4   :  { %v967_v10 = vld [vmem:[%s2125_s1 + $0x18] sm:$0xff]  ;;  %v970_v13 = vld [vmem:[%s2125_s1 + $0x20] sm:$0xff]  ;;  %v973_v15 = vld [vmem:[%s2125_s1 + $0x28] sm:$0xff] }
   0x5   :  { %9 = vst [vmem:[%s2126_s2] sm:$0xff] %v7_v3  ;;  %v36_v12 = vsub.f32 %v966_v9, %v967_v10  ;;  %962 = vst [vmem:[%s2126_s2 + $0x8] sm:$0xff] %v16_v7  ;;  %v46_v16 = vsub.f32 %v969_v11, %v970_v13  ;;  %v56_v17 = vsub.f32 %v972_v14, %v973_v15  ;;  %v975_v18 = vld [vmem:[%s2124_s0 + $0x30] sm:$0xff]  ;;  %v978_v20 = vld [vmem:[%s2124_s0 + $0x38] sm:$0xff] }
   0x6   :  { %965 = vst [vmem:[%s2126_s2 + $0x10] sm:$0xff] %v26_v8  ;;  %v976_v19 = vld [vmem:[%s2125_s1 + $0x30] sm:$0xff]  ;;  %v979_v22 = vld [vmem:[%s2125_s1 + $0x38] sm:$0xff]  ;;  %v981_v23 = vld [vmem:[%s2124_s0 + $0x40] sm:$0xff] }
   0x7   :  { %968 = vst [vmem:[%s2126_s2 + $0x18] sm:$0xff] %v36_v12  ;;  %v66_v21 = vsub.f32 %v975_v18, %v976_v19  ;;  %v982_v24 = vld [vmem:[%s2125_s1 + $0x40] sm:$0xff]  ;;  %971 = vst [vmem:[%s2126_s2 + $0x20] sm:$0xff] %v46_v16  ;;  %v76_v25 = vsub.f32 %v978_v20, %v979_v22  ;;  %v984_v27 = vld [vmem:[%s2124_s0 + $0x48] sm:$0xff] }
   0x8   :  { %974 = vst [vmem:[%s2126_s2 + $0x28] sm:$0xff] %v56_v17  ;;  %v86_v26 = vsub.f32 %v981_v23, %v982_v24  ;;  %v985_v28 = vld [vmem:[%s2125_s1 + $0x48] sm:$0xff]  ;;  %v987_v29 = vld [vmem:[%s2124_s0 + $0x50] sm:$0xff]  ;;  %v990_v32 = vld [vmem:[%s2124_s0 + $0x58] sm:$0xff] }
   0x9   :  { %977 = vst [vmem:[%s2126_s2 + $0x30] sm:$0xff] %v66_v21  ;;  %v96_v30 = vsub.f32 %v984_v27, %v985_v28  ;;  %v988_v31 = vld [vmem:[%s2125_s1 + $0x50] sm:$0xff]  ;;  %v991_v33 = vld [vmem:[%s2125_s1 + $0x58] sm:$0xff]  ;;  %980 = vst [vmem:[%s2126_s2 + $0x38] sm:$0xff] %v76_v25 }
   0xa   :  { %983 = vst [vmem:[%s2126_s2 + $0x40] sm:$0xff] %v86_v26  ;;  %v106_v34 = vsub.f32 %v987_v29, %v988_v31  ;;  %v116_v35 = vsub.f32 %v990_v32, %v991_v33  ;;  %v993_v36 = vld [vmem:[%s2124_s0 + $0x60] sm:$0xff]  ;;  %v996_v38 = vld [vmem:[%s2124_s0 + $0x68] sm:$0xff]  ;;  %v999_v41 = vld [vmem:[%s2124_s0 + $0x70] sm:$0xff] }
   0xb   :  { %v994_v37 = vld [vmem:[%s2125_s1 + $0x60] sm:$0xff]  ;;  %986 = vst [vmem:[%s2126_s2 + $0x48] sm:$0xff] %v96_v30  ;;  %v997_v40 = vld [vmem:[%s2125_s1 + $0x68] sm:$0xff]  ;;  %v1000_v42 = vld [vmem:[%s2125_s1 + $0x70] sm:$0xff] }
   0xc   :  { %v126_v39 = vsub.f32 %v993_v36, %v994_v37  ;;  %989 = vst [vmem:[%s2126_s2 + $0x50] sm:$0xff] %v106_v34  ;;  %992 = vst [vmem:[%s2126_s2 + $0x58] sm:$0xff] %v116_v35  ;;  %v136_v43 = vsub.f32 %v996_v38, %v997_v40  ;;  %v146_v44 = vsub.f32 %v999_v41, %v1000_v42  ;;  %v1002_v45 = vld [vmem:[%s2124_s0 + $0x78] sm:$0xff]  ;;  %v1005_v47 = vld [vmem:[%s2124_s0 + $0x80] sm:$0xff] }
   0xd   :  { %v1003_v46 = vld [vmem:[%s2125_s1 + $0x78] sm:$0xff]  ;;  %v1006_v49 = vld [vmem:[%s2125_s1 + $0x80] sm:$0xff]  ;;  %v1008_v50 = vld [vmem:[%s2124_s0 + $0x88] sm:$0xff] }
   0xe   :  { %995 = vst [vmem:[%s2126_s2 + $0x60] sm:$0xff] %v126_v39  ;;  %v156_v48 = vsub.f32 %v1002_v45, %v1003_v46  ;;  %v1009_v51 = vld [vmem:[%s2125_s1 + $0x88] sm:$0xff]  ;;  %998 = vst [vmem:[%s2126_s2 + $0x68] sm:$0xff] %v136_v43  ;;  %v166_v52 = vsub.f32 %v1005_v47, %v1006_v49  ;;  %v1011_v54 = vld [vmem:[%s2124_s0 + $0x90] sm:$0xff] }
   0xf   :  { %1001 = vst [vmem:[%s2126_s2 + $0x70] sm:$0xff] %v146_v44  ;;  %v176_v53 = vsub.f32 %v1008_v50, %v1009_v51  ;;  %v1012_v55 = vld [vmem:[%s2125_s1 + $0x90] sm:$0xff]  ;;  %v1014_v56 = vld [vmem:[%s2124_s0 + $0x98] sm:$0xff]  ;;  %v1017_v59 = vld [vmem:[%s2124_s0 + $0xa0] sm:$0xff] }
  0x10   :  { %1004 = vst [vmem:[%s2126_s2 + $0x78] sm:$0xff] %v156_v48  ;;  %v186_v57 = vsub.f32 %v1011_v54, %v1012_v55  ;;  %v1015_v58 = vld [vmem:[%s2125_s1 + $0x98] sm:$0xff]  ;;  %v1018_v60 = vld [vmem:[%s2125_s1 + $0xa0] sm:$0xff]  ;;  %1007 = vst [vmem:[%s2126_s2 + $0x80] sm:$0xff] %v166_v52 }
  0x11   :  { %1010 = vst [vmem:[%s2126_s2 + $0x88] sm:$0xff] %v176_v53  ;;  %v196_v61 = vsub.f32 %v1014_v56, %v1015_v58  ;;  %v206_v62 = vsub.f32 %v1017_v59, %v1018_v60  ;;  %v1020_v63 = vld [vmem:[%s2124_s0 + $0xa8] sm:$0xff]  ;;  %v1023_v1 = vld [vmem:[%s2124_s0 + $0xb0] sm:$0xff]  ;;  %v1026_v4 = vld [vmem:[%s2124_s0 + $0xb8] sm:$0xff] }
  0x12   :  { %v1021_v0 = vld [vmem:[%s2125_s1 + $0xa8] sm:$0xff]  ;;  %1013 = vst [vmem:[%s2126_s2 + $0x90] sm:$0xff] %v186_v57  ;;  %v1024_v3 = vld [vmem:[%s2125_s1 + $0xb0] sm:$0xff]  ;;  %v1027_v5 = vld [vmem:[%s2125_s1 + $0xb8] sm:$0xff] }
  0x13   :  { %v216_v2 = vsub.f32 %v1020_v63, %v1021_v0  ;;  %1016 = vst [vmem:[%s2126_s2 + $0x98] sm:$0xff] %v196_v61  ;;  %1019 = vst [vmem:[%s2126_s2 + $0xa0] sm:$0xff] %v206_v62  ;;  %v226_v6 = vsub.f32 %v1023_v1, %v1024_v3  ;;  %v236_v7 = vsub.f32 %v1026_v4, %v1027_v5  ;;  %v1029_v8 = vld [vmem:[%s2124_s0 + $0xc0] sm:$0xff]  ;;  %v1032_v10 = vld [vmem:[%s2124_s0 + $0xc8] sm:$0xff] }
  0x14   :  { %v1030_v9 = vld [vmem:[%s2125_s1 + $0xc0] sm:$0xff]  ;;  %v1033_v12 = vld [vmem:[%s2125_s1 + $0xc8] sm:$0xff]  ;;  %v1035_v13 = vld [vmem:[%s2124_s0 + $0xd0] sm:$0xff] }
  0x15   :  { %1022 = vst [vmem:[%s2126_s2 + $0xa8] sm:$0xff] %v216_v2  ;;  %v246_v11 = vsub.f32 %v1029_v8, %v1030_v9  ;;  %v1036_v14 = vld [vmem:[%s2125_s1 + $0xd0] sm:$0xff]  ;;  %1025 = vst [vmem:[%s2126_s2 + $0xb0] sm:$0xff] %v226_v6  ;;  %v256_v15 = vsub.f32 %v1032_v10, %v1033_v12  ;;  %v1038_v17 = vld [vmem:[%s2124_s0 + $0xd8] sm:$0xff] }
  0x16   :  { %1028 = vst [vmem:[%s2126_s2 + $0xb8] sm:$0xff] %v236_v7  ;;  %v266_v16 = vsub.f32 %v1035_v13, %v1036_v14  ;;  %v1039_v18 = vld [vmem:[%s2125_s1 + $0xd8] sm:$0xff]  ;;  %v1041_v19 = vld [vmem:[%s2124_s0 + $0xe0] sm:$0xff]  ;;  %v1044_v22 = vld [vmem:[%s2124_s0 + $0xe8] sm:$0xff] }
  0x17   :  { %1031 = vst [vmem:[%s2126_s2 + $0xc0] sm:$0xff] %v246_v11  ;;  %v276_v20 = vsub.f32 %v1038_v17, %v1039_v18  ;;  %v1042_v21 = vld [vmem:[%s2125_s1 + $0xe0] sm:$0xff]  ;;  %v1045_v23 = vld [vmem:[%s2125_s1 + $0xe8] sm:$0xff]  ;;  %1034 = vst [vmem:[%s2126_s2 + $0xc8] sm:$0xff] %v256_v15 }
  0x18   :  { %1037 = vst [vmem:[%s2126_s2 + $0xd0] sm:$0xff] %v266_v16  ;;  %v286_v24 = vsub.f32 %v1041_v19, %v1042_v21  ;;  %v296_v25 = vsub.f32 %v1044_v22, %v1045_v23  ;;  %v1047_v26 = vld [vmem:[%s2124_s0 + $0xf0] sm:$0xff]  ;;  %v1050_v28 = vld [vmem:[%s2124_s0 + $0xf8] sm:$0xff]  ;;  %v1053_v31 = vld [vmem:[%s2124_s0 + $0x100] sm:$0xff] }
  0x19   :  { %v1048_v27 = vld [vmem:[%s2125_s1 + $0xf0] sm:$0xff]  ;;  %1040 = vst [vmem:[%s2126_s2 + $0xd8] sm:$0xff] %v276_v20  ;;  %v1051_v30 = vld [vmem:[%s2125_s1 + $0xf8] sm:$0xff]  ;;  %v1054_v32 = vld [vmem:[%s2125_s1 + $0x100] sm:$0xff] }
  0x1a   :  { %v306_v29 = vsub.f32 %v1047_v26, %v1048_v27  ;;  %1043 = vst [vmem:[%s2126_s2 + $0xe0] sm:$0xff] %v286_v24  ;;  %1046 = vst [vmem:[%s2126_s2 + $0xe8] sm:$0xff] %v296_v25  ;;  %v316_v33 = vsub.f32 %v1050_v28, %v1051_v30  ;;  %v326_v34 = vsub.f32 %v1053_v31, %v1054_v32  ;;  %v1056_v35 = vld [vmem:[%s2124_s0 + $0x108] sm:$0xff]  ;;  %v1059_v37 = vld [vmem:[%s2124_s0 + $0x110] sm:$0xff] }
  0x1b   :  { %v1057_v36 = vld [vmem:[%s2125_s1 + $0x108] sm:$0xff]  ;;  %v1060_v39 = vld [vmem:[%s2125_s1 + $0x110] sm:$0xff]  ;;  %v1062_v40 = vld [vmem:[%s2124_s0 + $0x118] sm:$0xff] }
  0x1c   :  { %1049 = vst [vmem:[%s2126_s2 + $0xf0] sm:$0xff] %v306_v29  ;;  %v336_v38 = vsub.f32 %v1056_v35, %v1057_v36  ;;  %v1063_v41 = vld [vmem:[%s2125_s1 + $0x118] sm:$0xff]  ;;  %1052 = vst [vmem:[%s2126_s2 + $0xf8] sm:$0xff] %v316_v33  ;;  %v346_v42 = vsub.f32 %v1059_v37, %v1060_v39  ;;  %v1065_v44 = vld [vmem:[%s2124_s0 + $0x120] sm:$0xff] }
  0x1d   :  { %1055 = vst [vmem:[%s2126_s2 + $0x100] sm:$0xff] %v326_v34  ;;  %v356_v43 = vsub.f32 %v1062_v40, %v1063_v41  ;;  %v1066_v45 = vld [vmem:[%s2125_s1 + $0x120] sm:$0xff]  ;;  %v1068_v46 = vld [vmem:[%s2124_s0 + $0x128] sm:$0xff]  ;;  %v1071_v49 = vld [vmem:[%s2124_s0 + $0x130] sm:$0xff] }
  0x1e   :  { %1058 = vst [vmem:[%s2126_s2 + $0x108] sm:$0xff] %v336_v38  ;;  %v366_v47 = vsub.f32 %v1065_v44, %v1066_v45  ;;  %v1069_v48 = vld [vmem:[%s2125_s1 + $0x128] sm:$0xff]  ;;  %v1072_v50 = vld [vmem:[%s2125_s1 + $0x130] sm:$0xff]  ;;  %1061 = vst [vmem:[%s2126_s2 + $0x110] sm:$0xff] %v346_v42 }
  0x1f   :  { %1064 = vst [vmem:[%s2126_s2 + $0x118] sm:$0xff] %v356_v43  ;;  %v376_v51 = vsub.f32 %v1068_v46, %v1069_v48  ;;  %v386_v52 = vsub.f32 %v1071_v49, %v1072_v50  ;;  %v1074_v53 = vld [vmem:[%s2124_s0 + $0x138] sm:$0xff]  ;;  %v1077_v55 = vld [vmem:[%s2124_s0 + $0x140] sm:$0xff]  ;;  %v1080_v58 = vld [vmem:[%s2124_s0 + $0x148] sm:$0xff] }
  0x20   :  { %v1075_v54 = vld [vmem:[%s2125_s1 + $0x138] sm:$0xff]  ;;  %1067 = vst [vmem:[%s2126_s2 + $0x120] sm:$0xff] %v366_v47  ;;  %v1078_v57 = vld [vmem:[%s2125_s1 + $0x140] sm:$0xff]  ;;  %v1081_v59 = vld [vmem:[%s2125_s1 + $0x148] sm:$0xff] }
  0x21   :  { %v396_v56 = vsub.f32 %v1074_v53, %v1075_v54  ;;  %1070 = vst [vmem:[%s2126_s2 + $0x128] sm:$0xff] %v376_v51  ;;  %1073 = vst [vmem:[%s2126_s2 + $0x130] sm:$0xff] %v386_v52  ;;  %v406_v60 = vsub.f32 %v1077_v55, %v1078_v57  ;;  %v416_v61 = vsub.f32 %v1080_v58, %v1081_v59  ;;  %v1083_v62 = vld [vmem:[%s2124_s0 + $0x150] sm:$0xff]  ;;  %v1086_v0 = vld [vmem:[%s2124_s0 + $0x158] sm:$0xff] }
  0x22   :  { %v1084_v63 = vld [vmem:[%s2125_s1 + $0x150] sm:$0xff]  ;;  %v1087_v2 = vld [vmem:[%s2125_s1 + $0x158] sm:$0xff]  ;;  %v1089_v3 = vld [vmem:[%s2124_s0 + $0x160] sm:$0xff] }
  0x23   :  { %1076 = vst [vmem:[%s2126_s2 + $0x138] sm:$0xff] %v396_v56  ;;  %v426_v1 = vsub.f32 %v1083_v62, %v1084_v63  ;;  %v1090_v4 = vld [vmem:[%s2125_s1 + $0x160] sm:$0xff]  ;;  %1079 = vst [vmem:[%s2126_s2 + $0x140] sm:$0xff] %v406_v60  ;;  %v436_v5 = vsub.f32 %v1086_v0, %v1087_v2  ;;  %v1092_v7 = vld [vmem:[%s2124_s0 + $0x168] sm:$0xff] }
  0x24   :  { %1082 = vst [vmem:[%s2126_s2 + $0x148] sm:$0xff] %v416_v61  ;;  %v446_v6 = vsub.f32 %v1089_v3, %v1090_v4  ;;  %v1093_v8 = vld [vmem:[%s2125_s1 + $0x168] sm:$0xff]  ;;  %v1095_v9 = vld [vmem:[%s2124_s0 + $0x170] sm:$0xff]  ;;  %v1098_v12 = vld [vmem:[%s2124_s0 + $0x178] sm:$0xff] }
  0x25   :  { %1085 = vst [vmem:[%s2126_s2 + $0x150] sm:$0xff] %v426_v1  ;;  %v456_v10 = vsub.f32 %v1092_v7, %v1093_v8  ;;  %v1096_v11 = vld [vmem:[%s2125_s1 + $0x170] sm:$0xff]  ;;  %v1099_v13 = vld [vmem:[%s2125_s1 + $0x178] sm:$0xff]  ;;  %1088 = vst [vmem:[%s2126_s2 + $0x158] sm:$0xff] %v436_v5 }
  0x26   :  { %1091 = vst [vmem:[%s2126_s2 + $0x160] sm:$0xff] %v446_v6  ;;  %v466_v14 = vsub.f32 %v1095_v9, %v1096_v11  ;;  %v476_v15 = vsub.f32 %v1098_v12, %v1099_v13  ;;  %v1101_v16 = vld [vmem:[%s2124_s0 + $0x180] sm:$0xff]  ;;  %v1104_v18 = vld [vmem:[%s2124_s0 + $0x188] sm:$0xff]  ;;  %v1107_v21 = vld [vmem:[%s2124_s0 + $0x190] sm:$0xff] }
  0x27   :  { %v1102_v17 = vld [vmem:[%s2125_s1 + $0x180] sm:$0xff]  ;;  %1094 = vst [vmem:[%s2126_s2 + $0x168] sm:$0xff] %v456_v10  ;;  %v1105_v20 = vld [vmem:[%s2125_s1 + $0x188] sm:$0xff]  ;;  %v1108_v22 = vld [vmem:[%s2125_s1 + $0x190] sm:$0xff] }
  0x28   :  { %v486_v19 = vsub.f32 %v1101_v16, %v1102_v17  ;;  %1097 = vst [vmem:[%s2126_s2 + $0x170] sm:$0xff] %v466_v14  ;;  %1100 = vst [vmem:[%s2126_s2 + $0x178] sm:$0xff] %v476_v15  ;;  %v496_v23 = vsub.f32 %v1104_v18, %v1105_v20  ;;  %v506_v24 = vsub.f32 %v1107_v21, %v1108_v22  ;;  %v1110_v25 = vld [vmem:[%s2124_s0 + $0x198] sm:$0xff]  ;;  %v1113_v27 = vld [vmem:[%s2124_s0 + $0x1a0] sm:$0xff] }
  0x29   :  { %v1111_v26 = vld [vmem:[%s2125_s1 + $0x198] sm:$0xff]  ;;  %v1114_v29 = vld [vmem:[%s2125_s1 + $0x1a0] sm:$0xff]  ;;  %v1116_v30 = vld [vmem:[%s2124_s0 + $0x1a8] sm:$0xff] }
  0x2a   :  { %1103 = vst [vmem:[%s2126_s2 + $0x180] sm:$0xff] %v486_v19  ;;  %v516_v28 = vsub.f32 %v1110_v25, %v1111_v26  ;;  %v1117_v31 = vld [vmem:[%s2125_s1 + $0x1a8] sm:$0xff]  ;;  %1106 = vst [vmem:[%s2126_s2 + $0x188] sm:$0xff] %v496_v23  ;;  %v526_v32 = vsub.f32 %v1113_v27, %v1114_v29  ;;  %v1119_v34 = vld [vmem:[%s2124_s0 + $0x1b0] sm:$0xff] }
  0x2b   :  { %1109 = vst [vmem:[%s2126_s2 + $0x190] sm:$0xff] %v506_v24  ;;  %v536_v33 = vsub.f32 %v1116_v30, %v1117_v31  ;;  %v1120_v35 = vld [vmem:[%s2125_s1 + $0x1b0] sm:$0xff]  ;;  %v1122_v36 = vld [vmem:[%s2124_s0 + $0x1b8] sm:$0xff]  ;;  %v1125_v39 = vld [vmem:[%s2124_s0 + $0x1c0] sm:$0xff] }
  0x2c   :  { %1112 = vst [vmem:[%s2126_s2 + $0x198] sm:$0xff] %v516_v28  ;;  %v546_v37 = vsub.f32 %v1119_v34, %v1120_v35  ;;  %v1123_v38 = vld [vmem:[%s2125_s1 + $0x1b8] sm:$0xff]  ;;  %v1126_v40 = vld [vmem:[%s2125_s1 + $0x1c0] sm:$0xff]  ;;  %1115 = vst [vmem:[%s2126_s2 + $0x1a0] sm:$0xff] %v526_v32 }
  0x2d   :  { %1118 = vst [vmem:[%s2126_s2 + $0x1a8] sm:$0xff] %v536_v33  ;;  %v556_v41 = vsub.f32 %v1122_v36, %v1123_v38  ;;  %v566_v42 = vsub.f32 %v1125_v39, %v1126_v40  ;;  %v1128_v43 = vld [vmem:[%s2124_s0 + $0x1c8] sm:$0xff]  ;;  %v1131_v45 = vld [vmem:[%s2124_s0 + $0x1d0] sm:$0xff]  ;;  %v1134_v48 = vld [vmem:[%s2124_s0 + $0x1d8] sm:$0xff] }
  0x2e   :  { %v1129_v44 = vld [vmem:[%s2125_s1 + $0x1c8] sm:$0xff]  ;;  %1121 = vst [vmem:[%s2126_s2 + $0x1b0] sm:$0xff] %v546_v37  ;;  %v1132_v47 = vld [vmem:[%s2125_s1 + $0x1d0] sm:$0xff]  ;;  %v1135_v49 = vld [vmem:[%s2125_s1 + $0x1d8] sm:$0xff] }
  0x2f   :  { %v576_v46 = vsub.f32 %v1128_v43, %v1129_v44  ;;  %1124 = vst [vmem:[%s2126_s2 + $0x1b8] sm:$0xff] %v556_v41  ;;  %1127 = vst [vmem:[%s2126_s2 + $0x1c0] sm:$0xff] %v566_v42  ;;  %v586_v50 = vsub.f32 %v1131_v45, %v1132_v47  ;;  %v596_v51 = vsub.f32 %v1134_v48, %v1135_v49  ;;  %v1137_v52 = vld [vmem:[%s2124_s0 + $0x1e0] sm:$0xff]  ;;  %v1140_v54 = vld [vmem:[%s2124_s0 + $0x1e8] sm:$0xff] }
  0x30   :  { %v1138_v53 = vld [vmem:[%s2125_s1 + $0x1e0] sm:$0xff]  ;;  %v1141_v56 = vld [vmem:[%s2125_s1 + $0x1e8] sm:$0xff]  ;;  %v1143_v57 = vld [vmem:[%s2124_s0 + $0x1f0] sm:$0xff] }
  0x31   :  { %1130 = vst [vmem:[%s2126_s2 + $0x1c8] sm:$0xff] %v576_v46  ;;  %v606_v55 = vsub.f32 %v1137_v52, %v1138_v53  ;;  %v1144_v58 = vld [vmem:[%s2125_s1 + $0x1f0] sm:$0xff]  ;;  %1133 = vst [vmem:[%s2126_s2 + $0x1d0] sm:$0xff] %v586_v50  ;;  %v616_v59 = vsub.f32 %v1140_v54, %v1141_v56  ;;  %v1146_v61 = vld [vmem:[%s2124_s0 + $0x1f8] sm:$0xff] }
  0x32   :  { %1136 = vst [vmem:[%s2126_s2 + $0x1d8] sm:$0xff] %v596_v51  ;;  %v626_v60 = vsub.f32 %v1143_v57, %v1144_v58  ;;  %v1147_v62 = vld [vmem:[%s2125_s1 + $0x1f8] sm:$0xff]  ;;  %v1149_v63 = vld [vmem:[%s2124_s0 + $0x200] sm:$0xff]  ;;  %v1152_v2 = vld [vmem:[%s2124_s0 + $0x208] sm:$0xff] }
  0x33   :  { %1139 = vst [vmem:[%s2126_s2 + $0x1e0] sm:$0xff] %v606_v55  ;;  %v636_v0 = vsub.f32 %v1146_v61, %v1147_v62  ;;  %v1150_v1 = vld [vmem:[%s2125_s1 + $0x200] sm:$0xff]  ;;  %v1153_v3 = vld [vmem:[%s2125_s1 + $0x208] sm:$0xff]  ;;  %1142 = vst [vmem:[%s2126_s2 + $0x1e8] sm:$0xff] %v616_v59 }
  0x34   :  { %1145 = vst [vmem:[%s2126_s2 + $0x1f0] sm:$0xff] %v626_v60  ;;  %v646_v4 = vsub.f32 %v1149_v63, %v1150_v1  ;;  %v656_v5 = vsub.f32 %v1152_v2, %v1153_v3  ;;  %v1155_v6 = vld [vmem:[%s2124_s0 + $0x210] sm:$0xff]  ;;  %v1158_v8 = vld [vmem:[%s2124_s0 + $0x218] sm:$0xff]  ;;  %v1161_v11 = vld [vmem:[%s2124_s0 + $0x220] sm:$0xff] }
  0x35   :  { %v1156_v7 = vld [vmem:[%s2125_s1 + $0x210] sm:$0xff]  ;;  %1148 = vst [vmem:[%s2126_s2 + $0x1f8] sm:$0xff] %v636_v0  ;;  %v1159_v10 = vld [vmem:[%s2125_s1 + $0x218] sm:$0xff]  ;;  %v1162_v12 = vld [vmem:[%s2125_s1 + $0x220] sm:$0xff] }
  0x36   :  { %v666_v9 = vsub.f32 %v1155_v6, %v1156_v7  ;;  %1151 = vst [vmem:[%s2126_s2 + $0x200] sm:$0xff] %v646_v4  ;;  %1154 = vst [vmem:[%s2126_s2 + $0x208] sm:$0xff] %v656_v5  ;;  %v676_v13 = vsub.f32 %v1158_v8, %v1159_v10  ;;  %v686_v14 = vsub.f32 %v1161_v11, %v1162_v12  ;;  %v1164_v15 = vld [vmem:[%s2124_s0 + $0x228] sm:$0xff]  ;;  %v1167_v17 = vld [vmem:[%s2124_s0 + $0x230] sm:$0xff] }
  0x37   :  { %v1165_v16 = vld [vmem:[%s2125_s1 + $0x228] sm:$0xff]  ;;  %v1168_v19 = vld [vmem:[%s2125_s1 + $0x230] sm:$0xff]  ;;  %v1170_v20 = vld [vmem:[%s2124_s0 + $0x238] sm:$0xff] }
  0x38   :  { %1157 = vst [vmem:[%s2126_s2 + $0x210] sm:$0xff] %v666_v9  ;;  %v696_v18 = vsub.f32 %v1164_v15, %v1165_v16  ;;  %v1171_v21 = vld [vmem:[%s2125_s1 + $0x238] sm:$0xff]  ;;  %1160 = vst [vmem:[%s2126_s2 + $0x218] sm:$0xff] %v676_v13  ;;  %v706_v22 = vsub.f32 %v1167_v17, %v1168_v19  ;;  %v1173_v24 = vld [vmem:[%s2124_s0 + $0x240] sm:$0xff] }
  0x39   :  { %1163 = vst [vmem:[%s2126_s2 + $0x220] sm:$0xff] %v686_v14  ;;  %v716_v23 = vsub.f32 %v1170_v20, %v1171_v21  ;;  %v1174_v25 = vld [vmem:[%s2125_s1 + $0x240] sm:$0xff]  ;;  %v1176_v26 = vld [vmem:[%s2124_s0 + $0x248] sm:$0xff]  ;;  %v1179_v29 = vld [vmem:[%s2124_s0 + $0x250] sm:$0xff] }
  0x3a   :  { %1166 = vst [vmem:[%s2126_s2 + $0x228] sm:$0xff] %v696_v18  ;;  %v726_v27 = vsub.f32 %v1173_v24, %v1174_v25  ;;  %v1177_v28 = vld [vmem:[%s2125_s1 + $0x248] sm:$0xff]  ;;  %v1180_v30 = vld [vmem:[%s2125_s1 + $0x250] sm:$0xff]  ;;  %1169 = vst [vmem:[%s2126_s2 + $0x230] sm:$0xff] %v706_v22 }
  0x3b   :  { %1172 = vst [vmem:[%s2126_s2 + $0x238] sm:$0xff] %v716_v23  ;;  %v736_v31 = vsub.f32 %v1176_v26, %v1177_v28  ;;  %v746_v32 = vsub.f32 %v1179_v29, %v1180_v30  ;;  %v1182_v33 = vld [vmem:[%s2124_s0 + $0x258] sm:$0xff]  ;;  %v1185_v35 = vld [vmem:[%s2124_s0 + $0x260] sm:$0xff]  ;;  %v1188_v38 = vld [vmem:[%s2124_s0 + $0x268] sm:$0xff] }
  0x3c   :  { %v1183_v34 = vld [vmem:[%s2125_s1 + $0x258] sm:$0xff]  ;;  %1175 = vst [vmem:[%s2126_s2 + $0x240] sm:$0xff] %v726_v27  ;;  %v1186_v37 = vld [vmem:[%s2125_s1 + $0x260] sm:$0xff]  ;;  %v1189_v39 = vld [vmem:[%s2125_s1 + $0x268] sm:$0xff] }
  0x3d   :  { %v756_v36 = vsub.f32 %v1182_v33, %v1183_v34  ;;  %1178 = vst [vmem:[%s2126_s2 + $0x248] sm:$0xff] %v736_v31  ;;  %1181 = vst [vmem:[%s2126_s2 + $0x250] sm:$0xff] %v746_v32  ;;  %v766_v40 = vsub.f32 %v1185_v35, %v1186_v37  ;;  %v776_v41 = vsub.f32 %v1188_v38, %v1189_v39  ;;  %v1191_v42 = vld [vmem:[%s2124_s0 + $0x270] sm:$0xff]  ;;  %v1194_v44 = vld [vmem:[%s2124_s0 + $0x278] sm:$0xff] }
  0x3e   :  { %v1192_v43 = vld [vmem:[%s2125_s1 + $0x270] sm:$0xff]  ;;  %v1195_v46 = vld [vmem:[%s2125_s1 + $0x278] sm:$0xff]  ;;  %v1197_v47 = vld [vmem:[%s2124_s0 + $0x280] sm:$0xff] }
  0x3f   :  { %1184 = vst [vmem:[%s2126_s2 + $0x258] sm:$0xff] %v756_v36  ;;  %v786_v45 = vsub.f32 %v1191_v42, %v1192_v43  ;;  %v1198_v48 = vld [vmem:[%s2125_s1 + $0x280] sm:$0xff]  ;;  %1187 = vst [vmem:[%s2126_s2 + $0x260] sm:$0xff] %v766_v40  ;;  %v796_v49 = vsub.f32 %v1194_v44, %v1195_v46  ;;  %v1200_v51 = vld [vmem:[%s2124_s0 + $0x288] sm:$0xff] }
  0x40   :  { %1190 = vst [vmem:[%s2126_s2 + $0x268] sm:$0xff] %v776_v41  ;;  %v806_v50 = vsub.f32 %v1197_v47, %v1198_v48  ;;  %v1201_v52 = vld [vmem:[%s2125_s1 + $0x288] sm:$0xff]  ;;  %v1203_v53 = vld [vmem:[%s2124_s0 + $0x290] sm:$0xff]  ;;  %v1206_v56 = vld [vmem:[%s2124_s0 + $0x298] sm:$0xff] }
  0x41   :  { %1193 = vst [vmem:[%s2126_s2 + $0x270] sm:$0xff] %v786_v45  ;;  %v816_v54 = vsub.f32 %v1200_v51, %v1201_v52  ;;  %v1204_v55 = vld [vmem:[%s2125_s1 + $0x290] sm:$0xff]  ;;  %v1207_v57 = vld [vmem:[%s2125_s1 + $0x298] sm:$0xff]  ;;  %1196 = vst [vmem:[%s2126_s2 + $0x278] sm:$0xff] %v796_v49 }
  0x42   :  { %1199 = vst [vmem:[%s2126_s2 + $0x280] sm:$0xff] %v806_v50  ;;  %v826_v58 = vsub.f32 %v1203_v53, %v1204_v55  ;;  %v836_v59 = vsub.f32 %v1206_v56, %v1207_v57  ;;  %v1209_v60 = vld [vmem:[%s2124_s0 + $0x2a0] sm:$0xff]  ;;  %v1212_v62 = vld [vmem:[%s2124_s0 + $0x2a8] sm:$0xff]  ;;  %v1215_v1 = vld [vmem:[%s2124_s0 + $0x2b0] sm:$0xff] }
  0x43   :  { %v1210_v61 = vld [vmem:[%s2125_s1 + $0x2a0] sm:$0xff]  ;;  %1202 = vst [vmem:[%s2126_s2 + $0x288] sm:$0xff] %v816_v54  ;;  %v1213_v0 = vld [vmem:[%s2125_s1 + $0x2a8] sm:$0xff]  ;;  %v1216_v2 = vld [vmem:[%s2125_s1 + $0x2b0] sm:$0xff] }
  0x44   :  { %v846_v63 = vsub.f32 %v1209_v60, %v1210_v61  ;;  %1205 = vst [vmem:[%s2126_s2 + $0x290] sm:$0xff] %v826_v58  ;;  %1208 = vst [vmem:[%s2126_s2 + $0x298] sm:$0xff] %v836_v59  ;;  %v856_v3 = vsub.f32 %v1212_v62, %v1213_v0  ;;  %v866_v4 = vsub.f32 %v1215_v1, %v1216_v2  ;;  %v1218_v5 = vld [vmem:[%s2124_s0 + $0x2b8] sm:$0xff]  ;;  %v1221_v7 = vld [vmem:[%s2124_s0 + $0x2c0] sm:$0xff] }
  0x45   :  { %v1219_v6 = vld [vmem:[%s2125_s1 + $0x2b8] sm:$0xff]  ;;  %v1222_v9 = vld [vmem:[%s2125_s1 + $0x2c0] sm:$0xff]  ;;  %v1224_v10 = vld [vmem:[%s2124_s0 + $0x2c8] sm:$0xff] }
  0x46   :  { %1211 = vst [vmem:[%s2126_s2 + $0x2a0] sm:$0xff] %v846_v63  ;;  %v876_v8 = vsub.f32 %v1218_v5, %v1219_v6  ;;  %v1225_v11 = vld [vmem:[%s2125_s1 + $0x2c8] sm:$0xff]  ;;  %1214 = vst [vmem:[%s2126_s2 + $0x2a8] sm:$0xff] %v856_v3  ;;  %v886_v12 = vsub.f32 %v1221_v7, %v1222_v9  ;;  %v1227_v14 = vld [vmem:[%s2124_s0 + $0x2d0] sm:$0xff] }
  0x47   :  { %1217 = vst [vmem:[%s2126_s2 + $0x2b0] sm:$0xff] %v866_v4  ;;  %v896_v13 = vsub.f32 %v1224_v10, %v1225_v11  ;;  %v1228_v15 = vld [vmem:[%s2125_s1 + $0x2d0] sm:$0xff]  ;;  %v1230_v16 = vld [vmem:[%s2124_s0 + $0x2d8] sm:$0xff]  ;;  %v1233_v19 = vld [vmem:[%s2124_s0 + $0x2e0] sm:$0xff] }
  0x48   :  { %1220 = vst [vmem:[%s2126_s2 + $0x2b8] sm:$0xff] %v876_v8  ;;  %v906_v17 = vsub.f32 %v1227_v14, %v1228_v15  ;;  %v1231_v18 = vld [vmem:[%s2125_s1 + $0x2d8] sm:$0xff]  ;;  %v1234_v20 = vld [vmem:[%s2125_s1 + $0x2e0] sm:$0xff]  ;;  %1223 = vst [vmem:[%s2126_s2 + $0x2c0] sm:$0xff] %v886_v12 }
  0x49   :  { %1226 = vst [vmem:[%s2126_s2 + $0x2c8] sm:$0xff] %v896_v13  ;;  %v916_v21 = vsub.f32 %v1230_v16, %v1231_v18  ;;  %v926_v22 = vsub.f32 %v1233_v19, %v1234_v20  ;;  %v1236_v23 = vld [vmem:[%s2124_s0 + $0x2e8] sm:$0xff]  ;;  %v1239_v25 = vld [vmem:[%s2124_s0 + $0x2f0] sm:$0xff]  ;;  %v1242_v28 = vld [vmem:[%s2124_s0 + $0x2f8] sm:$0xff] }
  0x4a   :  { %v1237_v24 = vld [vmem:[%s2125_s1 + $0x2e8] sm:$0xff]  ;;  %1229 = vst [vmem:[%s2126_s2 + $0x2d0] sm:$0xff] %v906_v17  ;;  %v1240_v27 = vld [vmem:[%s2125_s1 + $0x2f0] sm:$0xff]  ;;  %v1243_v29 = vld [vmem:[%s2125_s1 + $0x2f8] sm:$0xff] }
  0x4b   :  { %v936_v26 = vsub.f32 %v1236_v23, %v1237_v24  ;;  %1232 = vst [vmem:[%s2126_s2 + $0x2d8] sm:$0xff] %v916_v21  ;;  %1235 = vst [vmem:[%s2126_s2 + $0x2e0] sm:$0xff] %v926_v22  ;;  %v946_v30 = vsub.f32 %v1239_v25, %v1240_v27  ;;  %v956_v31 = vsub.f32 %v1242_v28, %v1243_v29 }
  0x4d   :  { %1238 = vst [vmem:[%s2126_s2 + $0x2e8] sm:$0xff] %v936_v26  ;;  %1241 = vst [vmem:[%s2126_s2 + $0x2f0] sm:$0xff] %v946_v30 }
  0x4e   :  { %1244 = vst [vmem:[%s2126_s2 + $0x2f8] sm:$0xff] %v956_v31 }

// kernel: egnn_sparse_network.4
= control target key start
LH: loop header
LB: loop body
LE: loop exit
PB: predicated region body
PF: predicated region fallthrough
CT: control target
= control target key end

     0   :  { %s8375_s0 = inlined_call_operand.vmem [shape: s32[3], index: 0, kind: input, shape index: {}]   ;;  %s8376_s1 = inlined_call_operand.vmem [shape: bf16[768,32], index: 1, kind: input, shape index: {}]   ;;  %s8377_s2 = inlined_call_operand.vmem [shape: bf16[768,32], index: 2, kind: input, shape index: {}]   ;;  %s8378_s3 = inlined_call_operand.vmem [shape: bf16[768,8], index: 3, kind: input, shape index: {}]   ;;  %s8379_s4 = inlined_call_operand.vmem [shape: f32[768,3], index: 4, kind: input, shape index: {}]   ;;  %s8380_s5 = inlined_call_operand.vmem [shape: s32[1,768], index: 5, kind: input, shape index: {}]   ;;  %s8381_s6 = inlined_call_operand.vmem [shape: bf16[32,144], index: 6, kind: input, shape index: {}]   ;;  %s8382_s7 = inlined_call_operand.vmem [shape: bf16[32,144], index: 7, kind: input, shape index: {}]   ;;  %s8383_s8 = inlined_call_operand.vmem [shape: bf16[8,144], index: 8, kind: input, shape index: {}]   ;;  %s8384_s9 = inlined_call_operand.vmem [shape: f32[1,144], index: 9, kind: input, shape index: {}]   ;;  %s8385_s10 = inlined_call_operand.vmem [shape: f32[1,144], index: 10, kind: input, shape index: {}]   ;;  %s8386_s11 = inlined_call_operand.vmem [shape: bf16[144,16], index: 11, kind: input, shape index: {}]   ;;  %s8387_s12 = inlined_call_operand.vmem [shape: f32[1,16], index: 12, kind: input, shape index: {}]   ;;  %s8388_s13 = inlined_call_operand.vmem [shape: bf16[16,64], index: 13, kind: input, shape index: {}]   ;;  %s8389_s14 = inlined_call_operand.vmem [shape: f32[1,64], index: 14, kind: input, shape index: {}]   ;;  %s8390_s15 = inlined_call_operand.vmem [shape: f32[1,64], index: 15, kind: input, shape index: {}]   ;;  %s8391_s18 = inlined_call_operand.vmem [shape: f32[168,19], index: 18, kind: output, shape index: {}]   ;;  %s8392_s16 = inlined_call_operand.<no memory space> [shape: f32[1,1], index: 16, kind: input, shape index: {}]   ;;  %s8393_s17 = inlined_call_operand.<no memory space> [shape: f32[1,1], index: 17, kind: input, shape index: {}]  }
   0x1   :  { %8443 = sst [smem:[#allocation88_spill]] %s8375_s0  ;;  %v27_v0 = vstv %s8392_s16  ;;  %v29_v1 = vstv %s8393_s17 }
   0x2   :  { %8444 = sst [smem:[#allocation89_spill]] %s8376_s1  ;;  %s8449_s29 = sld [smem:[#allocation88_spill]]  ;;  %28 = vst [vmem:[#allocation4] sm:$0x1] %v27_v0  ;;  %30 = vst [vmem:[#allocation5] sm:$0x1] %v29_v1 }
   0x3   :  { %8445 = sst [smem:[#allocation90_spill]] %s8377_s2 }
   0x4   :  { %8446 = sst [smem:[#allocation91_spill]] %s8387_s12 }
   0x5   :  { %8447 = sst [smem:[#allocation92_spill]] %s8389_s14 }
   0x6   :  { %8448 = sst [smem:[#allocation93_spill]] %s8390_s15 }
   0x8   :  { %s23_s12 = sshll.u32 %s8449_s29, 4  ;;  %s24_s12 = int_to_ptr.vmem [resolvable:$true] %s23_s12 }
   0x9   :  { %s5966_s20 = scalar_lea.vmem %s24_s12, 16  ;;  %p5971_p1 = scmp.lt.s32.totalorder %s24_s12, %s24_s12 }
   0xa   :  { %p5967_p0 = scmp.ne.s32.totalorder %s24_s12, %s5966_s20  ;;  %p5972_p2 = scmp.lt.s32.totalorder %s5966_s20, %s5966_s20 }
   0xc   :  { %p5973_p3 = por %p5972_p2, %p5971_p1 }
   0xe   :  { %p5974_p4 = pnand %p5973_p3, %p5967_p0 }
  0x10   :  { %5977 = shalt.err (!%p5974_p4)  }
  0x11   :  { %s5988_s21 = smov [#allocation3]  }
  0x12   :  { %26 = dma.vmem_to_smem %s24_s12, 16, %s5988_s21, [#allocation2] }
  0x13   :  { %5982 = dma.done.wait [#allocation2], 16 }
  0x14   :  { %5983 = vsyncadd [#allocation2], 4294967280 }
  0x15   :  { %32 = sfence }
  0x16   :  { %s6097_s16 = smov 0  }
  0x17 LB: > { %8450 = sst [smem:[#allocation7_spill]] %s5986_s16  ;;  %s6103_s17 = sadd.s32 4294967295, %s5986_s16   ;;  %s5986_s16 = sphi %s6097_s16, %s38_s16  }
  0x18   : > { %p4550_p5 = scmp.ge.s32.totalorder %s5986_s16, 1  ;;  %p537_p6 = scmp.lt.s32.totalorder %s5986_s16, 4 }
  0x1a   : > { %p538_p7 = pnand %p4550_p5, %p537_p6 }
  0x1c   : > { %541 = sbr.rel (%p538_p7) target bundleno = 1596 (0x63c), region = 88 }
  0x23   : > { %s4551_s12 = sshll.u32 %s6103_s17, 5  ;;  %s4559_s22 = sshll.u32 %s6103_s17, 1 }
  0x24   : > { %p604_p8 = scmp.lt.s32.totalorder %s4551_s12, 95  ;;  %p628_p9 = scmp.lt.s32.totalorder %s4559_s22, 5 }
  0x25   : > { %s8451_s26 = sld [smem:[#allocation89_spill]]  ;;  %s8452_s30 = sld [smem:[#allocation90_spill]] }
  0x26   : > { %s8714_s12 = smov (!%p604_p8, %s4551_s12), 95  ;;  %s8716_s22 = smov (!%p628_p9, %s4559_s22), 5 }
  0x27   : > { %s4552_s2 = sshll.u32 %s8714_s12, 2  ;;  %s4558_s23 = sshll.u32 %s8714_s12, 3 }
  0x28   : > { %s6124_s20 = scalar_lea.vmem %s8378_s3, %s4552_s2  ;;  %s6129_s15 = scalar_lea.vmem %s8379_s4, %s4558_s23 }
  0x29   : > { %s630_s24 = scalar_lea.vmem %s8380_s5, %s8716_s22  ;;  %p4560_p10 = scmp.ne.s32.totalorder %s6103_s17, 0 }
  0x2a   : > { %vm637_vm0 = vcmask (!%p4560_p10), 154624   ;;  %v5989_v2 = vmov (!%p4560_p10), 0.0  }
  0x2b   : > { %s6114_s27 = scalar_lea.vmem %s8451_s26, %s4552_s2  ;;  %s6119_s0 = scalar_lea.vmem %s8452_s30, %s4552_s2  ;;  %638 = vst.msk [vmem:[%s8391_s18] sm:$0xff] (!%p4560_p10), %vm637_vm0, %v5989_v2  ;;  %639 = vst.msk [vmem:[%s8391_s18 + $0x8] sm:$0xff] (!%p4560_p10), %vm637_vm0, %v5989_v2 }
  0x2c   : > { %636 = sbr.rel (%p4560_p10) target bundleno = 54 (0x36), region = 92  ;;  %640 = vst.msk [vmem:[%s8391_s18 + $0x10] sm:$0xff] (!%p4560_p10), %vm637_vm0, %v5989_v2  ;;  %641 = vst.msk [vmem:[%s8391_s18 + $0x18] sm:$0xff] (!%p4560_p10), %vm637_vm0, %v5989_v2 }
  0x2d   : > { %642 = vst.msk [vmem:[%s8391_s18 + $0x20] sm:$0xff] (!%p4560_p10), %vm637_vm0, %v5989_v2  ;;  %643 = vst.msk [vmem:[%s8391_s18 + $0x28] sm:$0xff] (!%p4560_p10), %vm637_vm0, %v5989_v2 }
  0x2e   : > { %644 = vst.msk [vmem:[%s8391_s18 + $0x30] sm:$0xff] (!%p4560_p10), %vm637_vm0, %v5989_v2  ;;  %645 = vst.msk [vmem:[%s8391_s18 + $0x38] sm:$0xff] (!%p4560_p10), %vm637_vm0, %v5989_v2 }
  0x2f   : > { %646 = vst.msk [vmem:[%s8391_s18 + $0x40] sm:$0xff] (!%p4560_p10), %vm637_vm0, %v5989_v2  ;;  %647 = vst.msk [vmem:[%s8391_s18 + $0x48] sm:$0xff] (!%p4560_p10), %vm637_vm0, %v5989_v2 }
  0x30   : > { %648 = vst.msk [vmem:[%s8391_s18 + $0x50] sm:$0xff] (!%p4560_p10), %vm637_vm0, %v5989_v2  ;;  %649 = vst.msk [vmem:[%s8391_s18 + $0x58] sm:$0xff] (!%p4560_p10), %vm637_vm0, %v5989_v2 }
  0x31   : > { %650 = vst.msk [vmem:[%s8391_s18 + $0x60] sm:$0xff] (!%p4560_p10), %vm637_vm0, %v5989_v2  ;;  %651 = vst.msk [vmem:[%s8391_s18 + $0x68] sm:$0xff] (!%p4560_p10), %vm637_vm0, %v5989_v2 }
  0x32   : > { %652 = vst.msk [vmem:[%s8391_s18 + $0x70] sm:$0xff] (!%p4560_p10), %vm637_vm0, %v5989_v2  ;;  %653 = vst.msk [vmem:[%s8391_s18 + $0x78] sm:$0xff] (!%p4560_p10), %vm637_vm0, %v5989_v2 }
  0x33   : > { %654 = vst.msk [vmem:[%s8391_s18 + $0x80] sm:$0xff] %vm637_vm0, %v5989_v2  ;;  %655 = vst.msk [vmem:[%s8391_s18 + $0x88] sm:$0xff] %vm637_vm0, %v5989_v2 }
  0x34   : > { %656 = vst.msk [vmem:[%s8391_s18 + $0x90] sm:$0xff] %vm637_vm0, %v5989_v2  ;;  %657 = vst.msk [vmem:[%s8391_s18 + $0x98] sm:$0xff] %vm637_vm0, %v5989_v2 }
  0x35   : > { %658 = vst.msk [vmem:[%s8391_s18 + $0xa0] sm:$0xff] %vm637_vm0, %v5989_v2 }
  0x36 PF: > { %v5222_v3 = vld [vmem:[%s8382_s7 + $0x4] ss:$8 sps:$4 sm:$0xff]   ;;  %v5224_v4 = vld [vmem:[%s8382_s7] ss:$8 sps:$4 sm:$0xff]   ;;  %v5990_v5 = vmov 0   ;;  %vm992_vm1 = vcmask 261120  }
  0x37   : > { %1073 = vmatprep.mubr.bf16.mxu0 %v5990_v5  ;;  %1143 = vmatprep.mubr.bf16.mxu1 %v5990_v5  ;;  %v5225_v6 = vld [vmem:[%s8382_s7 + $0x14] ss:$8 sps:$4 sm:$0xff]   ;;  %v5227_v7 = vld [vmem:[%s8382_s7 + $0x10] ss:$8 sps:$4 sm:$0xff]   ;;  %v5232_v8 = vld [vmem:[%s8381_s6 + $0x4] ss:$8 sps:$4 sm:$0xff]  }
  0x38   : > { %1041 = vmatprep.subr.bf16.mxu0 %v5222_v3  ;;  %4993 = vmatprep.subr.bf16.mxu1 %v5222_v3  ;;  %v5228_v9 = vld [vmem:[%s6119_s0] sm:$0xff]   ;;  %v5238_v11 = vld [vmem:[%s8381_s6 + $0x14] ss:$8 sps:$4 sm:$0xff]   ;;  %v5236_v12 = vld [vmem:[%s8381_s6 + $0x10] ss:$8 sps:$4 sm:$0xff]   ;;  %vm1742_vm2 = vcmask 1043456  }
  0x39   : > { %1042 = vmatpush1.bf16.msra.mxu0 %v5224_v4  ;;  %4995 = vmatpush1.bf16.msra.mxu1 %v5224_v4  ;;  %v5230_v10 = vld [vmem:[%s8381_s6] ss:$8 sps:$4 sm:$0xff]   ;;  %v5233_v16 = vld [vmem:[%s6119_s0 + $0x10] sm:$0xff]   ;;  %v5234_v17 = vld [vmem:[%s6119_s0 + $0x18] sm:$0xff]   ;;  %vm8430_vm3 = vcmask 23552   ;;  %vm1693_vm4 = vcmask 64512  }
  0x3a   : > { %1043 = vmatprep.subr.bf16.mxu0 %v5225_v6  ;;  %4994 = vmatprep.subr.bf16.mxu1 %v5225_v6  ;;  %v5229_v13 = vld [vmem:[%s6119_s0 + $0x8] sm:$0xff]   ;;  %v1607_v14 = vld [vmem:[%s8383_s8] sm:$0xff]  ;;  %v5240_v20 = vld [vmem:[%s6119_s0 + $0x30] sm:$0xff]   ;;  %vm2781_vm5 = vcmask 130048   ;;  %s8583_s28 = sld [smem:[#allocation91_spill]]  ;;  %s5991_s16 = smov 3  }
  0x3b   : > { %v4650_v15 = vcombine.high %v1607_v14, %v1607_v14  ;;  %v5235_v18 = vld [vmem:[%s6119_s0 + $0x20] sm:$0xff]   ;;  %v5239_v19 = vld [vmem:[%s6119_s0 + $0x28] sm:$0xff]   ;;  %v4649_v21 = vcombine.low %v1607_v14, %v1607_v14  ;;  %v5245_v25 = vld [vmem:[%s6114_s27 + $0x10] sm:$0xff]   ;;  %s8584_s29 = sld [smem:[#allocation92_spill]]  ;;  %s8585_s30 = sld [smem:[#allocation93_spill]]  ;;  %vm3718_vm6 = vcmask 523264  }
  0x3c   : > { %v5241_v22 = vld [vmem:[%s6114_s27] sm:$0xff]   ;;  %v5242_v24 = vld [vmem:[%s6114_s27 + $0x8] sm:$0xff]   ;;  %v5246_v26 = vld [vmem:[%s6114_s27 + $0x18] sm:$0xff]   ;;  %s7894_s1 = sld [smem:[#allocation3 + %s6103_s17]]  ;;  %s4841_s25 = sshll.u32 %s6103_s17, 8 }
  0x3d   : > { %1044 = vmatpush1.bf16.msra.mxu0 %v5227_v7  ;;  %4996 = vmatpush1.bf16.msra.mxu1 %v5227_v7  ;;  %v1744_v23 = vsel %vm1742_vm2, %v4649_v21, 0  ;;  %v5247_v27 = vld [vmem:[%s6114_s27 + $0x20] sm:$0xff]   ;;  %v5248_v28 = vld [vmem:[%s6114_s27 + $0x28] sm:$0xff]   ;;  %v5249_v29 = vld [vmem:[%s6114_s27 + $0x30] sm:$0xff]  }
  0x3e   : > { %1382 = vmatprep.subr.bf16.mxu0 %v5232_v8  ;;  %2830 = vmatprep.subr.bf16.mxu1 %v5990_v5  ;;  %v5266_v30 = vld [vmem:[%s6119_s0 + $0x38] sm:$0xff]   ;;  %v5268_v32 = vld [vmem:[%s6119_s0 + $0x40] sm:$0xff]   ;;  %v5270_v36 = vld [vmem:[%s6119_s0 + $0x48] sm:$0xff]  }
  0x3f   : > { %v5250_v31 = vld [vmem:[%s6114_s27 + $0x38] sm:$0xff]   ;;  %v5251_v33 = vld [vmem:[%s6114_s27 + $0x40] sm:$0xff]   ;;  %v660_v37 = vld [vmem:[%s6129_s15 + $0x8] sm:$0xff] }
  0x40   : > { %4581 = vmatmul.mubr.msk.bf16.vlgmr.msra.gmra.mrb[0].mxu0 %vm992_vm1, %v5228_v9  ;;  %4588 = vmatmul.mubr.msk.bf16.vlgmr.msra.gmra.mrb[0].mxu1 %vm992_vm1, %v5266_v30  ;;  %v659_v34 = vld [vmem:[%s6129_s15] sm:$0xff]  ;;  %v692_v39 = vmul.f32 %v660_v37, %v660_v37  ;;  %v5252_v41 = vld [vmem:[%s6114_s27 + $0x48] sm:$0xff]   ;;  %v661_v42 = vld [vmem:[%s6129_s15 + $0x10] sm:$0xff] }
  0x41   : > { %1083 = vmatprep.mubr.bf16.mxu0 %v5990_v5  ;;  %1383 = vmatpush1.bf16.msra.mxu0 %v5230_v10  ;;  %v691_v35 = vmul.f32 %v659_v34, %v659_v34  ;;  %v693_v43 = vmul.f32 %v661_v42, %v661_v42  ;;  %v5272_v44 = vld [vmem:[%s6119_s0 + $0x50] sm:$0xff]   ;;  %v662_v45 = vld [vmem:[%s6129_s15 + $0x18] sm:$0xff]  ;;  %v663_v50 = vld [vmem:[%s6129_s15 + $0x20] sm:$0xff] }
  0x42   : > { %1384 = vmatprep.subr.bf16.mxu0 %v5238_v11  ;;  %1153 = vmatprep.mubr.bf16.mxu1 %v5990_v5  ;;  %v727_v40 = vsel %vm8430_vm3, %v692_v39, 0.0  ;;  %v694_v47 = vmul.f32 %v662_v45, %v662_v45  ;;  %v5253_v49 = vld [vmem:[%s6114_s27 + $0x50] sm:$0xff]   ;;  %v5274_v51 = vld [vmem:[%s6119_s0 + $0x58] sm:$0xff]   ;;  %v664_v52 = vld [vmem:[%s6129_s15 + $0x28] sm:$0xff]  ;;  %v695_v53 = vmul.f32 %v663_v50, %v663_v50  ;;  %s8337_s22 = scalar_lea.vmem %s8391_s18, %s7894_s1 }
  0x43   : > { %v724_v38 = vsel %vm8430_vm3, %v691_v35, 0.0  ;;  %v730_v46 = vsel %vm8430_vm3, %v693_v43, 0.0  ;;  %v696_v54 = vmul.f32 %v664_v52, %v664_v52  ;;  %v5254_v57 = vld [vmem:[%s6114_s27 + $0x58] sm:$0xff]   ;;  %v665_v58 = vld [vmem:[%s6129_s15 + $0x30] sm:$0xff]  ;;  %v5276_v59 = vld [vmem:[%s6119_s0 + $0x60] sm:$0xff]  }
  0x44   : > { %725 = vadd.xlane.f32.xlu0 %v724_v38  ;;  %731 = vadd.xlane.f32.xlu1 %v730_v46  ;;  %v733_v48 = vsel %vm8430_vm3, %v694_v47, 0.0  ;;  %v736_v55 = vsel %vm8430_vm3, %v695_v53, 0.0  ;;  %v666_v60 = vld [vmem:[%s6129_s15 + $0x38] sm:$0xff]  ;;  %v697_v61 = vmul.f32 %v665_v58, %v665_v58  ;;  %v5255_v1 = vld [vmem:[%s6114_s27 + $0x60] sm:$0xff]   ;;  %v5278_v3 = vld [vmem:[%s6119_s0 + $0x68] sm:$0xff]  }
  0x45   : > { %1385 = vmatpush1.bf16.msra.mxu0 %v5236_v12  ;;  %v739_v56 = vsel %vm8430_vm3, %v696_v54, 0.0  ;;  %v698_v62 = vmul.f32 %v666_v60, %v666_v60  ;;  %v667_v2 = vld [vmem:[%s6129_s15 + $0x40] sm:$0xff]  ;;  %v668_v4 = vld [vmem:[%s6129_s15 + $0x48] sm:$0xff]  ;;  %v669_v11 = vld [vmem:[%s6129_s15 + $0x50] sm:$0xff] }
  0x46   : > { %4651 = vmatprep.subr.msk.bf16.mxu0 %vm1742_vm2, %v4650_v15  ;;  %v742_v63 = vsel %vm8430_vm3, %v697_v61, 0.0  ;;  %v699_v6 = vmul.f32 %v667_v2, %v667_v2  ;;  %v700_v7 = vmul.f32 %v668_v4, %v668_v4  ;;  %v5256_v10 = vld [vmem:[%s6114_s27 + $0x68] sm:$0xff]   ;;  %v670_v12 = vld [vmem:[%s6129_s15 + $0x58] sm:$0xff]  ;;  %v5280_v15 = vld [vmem:[%s6119_s0 + $0x70] sm:$0xff]  }
  0x47   : > { %v745_v0 = vsel %vm8430_vm3, %v698_v62, 0.0  ;;  %v702_v14 = vmul.f32 %v670_v12, %v670_v12  ;;  %v677_v35 = vld [vmem:[%s6129_s15 + $0x90] sm:$0xff]  ;;  %v678_v38 = vld [vmem:[%s6129_s15 + $0x98] sm:$0xff]  ;;  %v5259_v39 = vld [vmem:[%s6124_s20] sm:$0xff]  }
  0x48   : > { %4582 = vmatmul.mubr.msk.bf16.gmra.mrb[4].mxu0 %vm992_vm1, %v5229_v13  ;;  %4589 = vmatmul.mubr.msk.bf16.gmra.mrb[4].mxu1 %vm992_vm1, %v5268_v32  ;;  %v748_v8 = vsel %vm8430_vm3, %v699_v6, 0.0  ;;  %v751_v9 = vsel %vm8430_vm3, %v700_v7, 0.0  ;;  %v701_v13 = vmul.f32 %v669_v11, %v669_v11  ;;  %v709_v42 = vmul.f32 %v677_v35, %v677_v35  ;;  %v3978_v43 = vld [vmem:[#allocation5] sm:$0x1]  ;;  %v681_v53 = vld [vmem:[%s6129_s15 + $0xb0] sm:$0xff]  ;;  %v5285_v54 = vld [vmem:[%s8386_s11 + $0x8] sm:$0xff]  }
  0x49   : > { %1093 = vmatprep.mubr.bf16.mxu0 %v5990_v5  ;;  %1163 = vmatprep.mubr.bf16.mxu1 %v5990_v5  ;;  %v710_v45 = vmul.f32 %v678_v38, %v678_v38  ;;  %v679_v46 = vld [vmem:[%s6129_s15 + $0xa0] sm:$0xff]  ;;  %v713_v58 = vmul.f32 %v681_v53, %v681_v53  ;;  %v5286_v62 = vld [vmem:[%s8386_s11 + $0x10] sm:$0xff]   ;;  %v686_v6 = vld [vmem:[%s6129_s15 + $0xd8] sm:$0xff] }
  0x4a   : > { %728 = vadd.xlane.f32.xlu0 %v727_v40  ;;  %734 = vadd.xlane.f32.xlu1 %v733_v48  ;;  %v3815_v40 = vld [vmem:[#allocation4] sm:$0x1]  ;;  %v680_v48 = vld [vmem:[%s6129_s15 + $0xa8] sm:$0xff]  ;;  %v711_v50 = vmul.f32 %v679_v46, %v679_v46  ;;  %v685_v4 = vld [vmem:[%s6129_s15 + $0xd0] sm:$0xff]  ;;  %v718_v11 = vmul.f32 %v686_v6, %v686_v6 }
  0x4b   : > { %5125 = vpush %v3815_v40  ;;  %v5284_v47 = vld [vmem:[%s8386_s11] sm:$0xff]   ;;  %v712_v52 = vmul.f32 %v680_v48, %v680_v48  ;;  %v5261_v7 = vld [vmem:[%s6124_s20 + $0x10] sm:$0xff]  }
  0x4c   : > { %5127 = vpush %v3978_v43  ;;  %2831 = vmatpush1.bf16.msra.mxu1 %v5284_v47  ;;  %v683_v61 = vld [vmem:[%s6129_s15 + $0xc0] sm:$0xff]  ;;  %v5281_v40 = vld [vmem:[%s6124_s20 + $0x70] sm:$0xff]   ;;  %v5283_v43 = vld [vmem:[%s6124_s20 + $0x78] sm:$0xff]  }
  0x4d   : > { %2832 = vmatprep.subr.bf16.mxu1 %v5990_v5  ;;  %v687_v12 = vld [vmem:[%s6129_s15 + $0xe0] sm:$0xff] }
  0x4e   : > { %737 = vadd.xlane.f32.xlu0 %v736_v55  ;;  %740 = vadd.xlane.f32.xlu1 %v739_v56  ;;  %v682_v55 = vld [vmem:[%s6129_s15 + $0xb8] sm:$0xff]  ;;  %v5260_v56 = vld [vmem:[%s6124_s20 + $0x8] sm:$0xff]   ;;  %v5277_v35 = vld [vmem:[%s6124_s20 + $0x60] sm:$0xff]  }
  0x4f   : > { %v714_v60 = vmul.f32 %v682_v55, %v682_v55  ;;  %v5288_v38 = vld [vmem:[%s8386_s11 + $0x20] sm:$0xff]  }
  0x50   : > { %4583 = vmatmul.mubr.msk.bf16.gmra.mrb[8].mxu0 %vm992_vm1, %v5233_v16  ;;  %4590 = vmatmul.mubr.msk.bf16.gmra.mrb[8].mxu1 %vm992_vm1, %v5270_v36  ;;  %v754_v16 = vsel %vm8430_vm3, %v701_v13, 0.0  ;;  %v688_v13 = vld [vmem:[%s6129_s15 + $0xe8] sm:$0xff] }
  0x51   : > { %1103 = vmatprep.mubr.bf16.mxu0 %v5990_v5  ;;  %1173 = vmatprep.mubr.bf16.mxu1 %v5990_v5  ;;  %v793_v2 = vsel %vm8430_vm3, %v714_v60, 0.0 }
  0x52   : > { %743 = vadd.xlane.f32.xlu0 %v742_v63  ;;  %746 = vadd.xlane.f32.xlu1 %v745_v0  ;;  %v684_v63 = vld [vmem:[%s6129_s15 + $0xc8] sm:$0xff]  ;;  %v790_v0 = vsel %vm8430_vm3, %v713_v58, 0.0 }
  0x53   : > { %2833 = vmatpush1.bf16.msra.mxu1 %v5285_v54 }
  0x54   : > { %2834 = vmatprep.subr.bf16.mxu1 %v5990_v5 }
  0x56   : > { %749 = vadd.xlane.f32.xlu0 %v748_v8  ;;  %752 = vadd.xlane.f32.xlu1 %v751_v9  ;;  %v717_v9 = vmul.f32 %v685_v4, %v685_v4 }
  0x57   : > { %2835 = vmatpush1.bf16.msra.mxu1 %v5286_v62 }
  0x58   : > { %4584 = vmatmul.mubr.msk.bf16.gmra.mrb[12].mxu0 %vm992_vm1, %v5234_v17  ;;  %4591 = vmatmul.mubr.msk.bf16.gmra.mrb[12].mxu1 %vm992_vm1, %v5272_v44  ;;  %v757_v17 = vsel %vm8430_vm3, %v702_v14, 0.0  ;;  %v802_v14 = vsel %vm8430_vm3, %v717_v9, 0.0 }
  0x59   : > { %1113 = vmatprep.mubr.bf16.mxu0 %v5990_v5  ;;  %1183 = vmatprep.mubr.bf16.mxu1 %v5990_v5 }
  0x5a   : > { %755 = vadd.xlane.f32.xlu0 %v754_v16  ;;  %758 = vadd.xlane.f32.xlu1 %v757_v17  ;;  %v805_v16 = vsel %vm8430_vm3, %v718_v11, 0.0  ;;  %v720_v17 = vmul.f32 %v688_v13, %v688_v13 }
  0x5b   : > { %2836 = vmatprep.subr.bf16.mxu1 %v5990_v5 }
  0x60   : > { %4585 = vmatmul.mubr.msk.bf16.gmra.mrb[16].mxu0 %vm992_vm1, %v5235_v18  ;;  %4592 = vmatmul.mubr.msk.bf16.gmra.mrb[16].mxu1 %vm992_vm1, %v5274_v51  ;;  %v5257_v18 = vld [vmem:[%s6114_s27 + $0x70] sm:$0xff]   ;;  %v781_v51 = vsel %vm8430_vm3, %v710_v45, 0.0 }
  0x61   : > { %1123 = vmatprep.mubr.bf16.mxu0 %v5990_v5  ;;  %1193 = vmatprep.mubr.bf16.mxu1 %v5990_v5 }
  0x68   : > { %4586 = vmatmul.mubr.msk.bf16.gmra.mrb[20].mxu0 %vm992_vm1, %v5239_v19  ;;  %4593 = vmatmul.mubr.msk.bf16.gmra.mrb[20].mxu1 %vm992_vm1, %v5276_v59  ;;  %v671_v19 = vld [vmem:[%s6129_s15 + $0x60] sm:$0xff]  ;;  %v787_v59 = vsel %vm8430_vm3, %v712_v52, 0.0 }
  0x69   : > { %1133 = vmatprep.mubr.bf16.mxu0 %v5990_v5  ;;  %1203 = vmatprep.mubr.bf16.mxu1 %v5990_v5  ;;  %v703_v21 = vmul.f32 %v671_v19, %v671_v19  ;;  %v690_v19 = vld [vmem:[%s6129_s15 + $0xf8] sm:$0xff] }
  0x70   : > { %4587 = vmatmul.mubr.msk.bf16.gmra.mrb[24].mxu0 %vm992_vm1, %v5240_v20  ;;  %4594 = vmatmul.mubr.msk.bf16.gmra.mrb[24].mxu1 %vm992_vm1, %v5278_v3  ;;  %v672_v20 = vld [vmem:[%s6129_s15 + $0x68] sm:$0xff]  ;;  %v716_v3 = vmul.f32 %v684_v63, %v684_v63 }
  0x71   : > { %1414 = vmatprep.mubr.bf16.mxu0 %v5990_v5  ;;  %1213 = vmatprep.mubr.bf16.mxu1 %v5990_v5 }
  0x78   : > { %4617 = vmatmul.mubr.msk.bf16.vlgmr.msra.gmra.mrb[0].mxu0 %vm992_vm1, %v5241_v22  ;;  %4595 = vmatmul.mubr.msk.bf16.gmra.mrb[28].mxu1 %vm992_vm1, %v5280_v15  ;;  %v704_v22 = vmul.f32 %v672_v20, %v672_v20  ;;  %v719_v15 = vmul.f32 %v687_v12, %v687_v12  ;;  %v5262_v20 = vld [vmem:[%s6124_s20 + $0x18] sm:$0xff]  }
  0x79   : > { %1424 = vmatprep.mubr.bf16.mxu0 %v5990_v5  ;;  %1750 = vmatpush1.bf16.msra.mxu0 %v1744_v23  ;;  %v5282_v23 = vld [vmem:[%s6119_s0 + $0x78] sm:$0xff]  }
  0x7a   : > { %1223 = vmatprep.mubr.bf16.mxu1 %v5990_v5 }
  0x80   : > { %4618 = vmatmul.mubr.msk.bf16.gmra.mrb[4].mxu0 %vm992_vm1, %v5242_v24  ;;  %v760_v24 = vsel %vm8430_vm3, %v703_v21, 0.0  ;;  %4596 = vmatmul.mubr.msk.bf16.gmra.mrb[32].mxu1 %vm992_vm1, %v5282_v23  ;;  %v808_v21 = vsel %vm8430_vm3, %v719_v15, 0.0  ;;  %v811_v23 = vsel %vm8430_vm3, %v720_v17, 0.0 }
  0x81   : > { %1434 = vmatprep.mubr.bf16.mxu0 %v5990_v5  ;;  %761 = vadd.xlane.f32.xlu0 %v760_v24  ;;  %v722_v24 = vmul.f32 %v690_v19, %v690_v19  ;;  %v2006_v19 = vld [vmem:[%s8384_s9] sm:$0x3] }
  0x88   : > { %4619 = vmatmul.mubr.msk.bf16.gmra.mrb[8].mxu0 %vm992_vm1, %v5245_v25  ;;  %v763_v25 = vsel %vm8430_vm3, %v704_v22, 0.0 }
  0x89   : > { %1444 = vmatprep.mubr.bf16.mxu0 %v5990_v5  ;;  %764 = vadd.xlane.f32.xlu1 %v763_v25 }
  0x90   : > { %4620 = vmatmul.mubr.msk.bf16.gmra.mrb[12].mxu0 %vm992_vm1, %v5246_v26  ;;  %v5258_v26 = vld [vmem:[%s6114_s27 + $0x78] sm:$0xff]  }
  0x91   : > { %1454 = vmatprep.mubr.bf16.mxu0 %v5990_v5 }
  0x98   : > { %4621 = vmatmul.mubr.msk.bf16.gmra.mrb[16].mxu0 %vm992_vm1, %v5247_v27  ;;  %v673_v27 = vld [vmem:[%s6129_s15 + $0x70] sm:$0xff] }
  0x99   : > { %1464 = vmatprep.mubr.bf16.mxu0 %v5990_v5  ;;  %v705_v30 = vmul.f32 %v673_v27, %v673_v27  ;;  %v5263_v27 = vld [vmem:[%s6124_s20 + $0x20] sm:$0xff]  }
  0x9b   : > { %v766_v36 = vsel %vm8430_vm3, %v705_v30, 0.0  ;;  %v5267_v30 = vld [vmem:[%s6124_s20 + $0x38] sm:$0xff]  }
  0x9c   : > { %767 = vadd.xlane.f32.xlu0 %v766_v36  ;;  %v5287_v36 = vld [vmem:[%s8386_s11 + $0x18] sm:$0xff]  }
  0x9d   : > { %2837 = vmatpush1.bf16.msra.mxu1 %v5287_v36 }
  0x9e   : > { %2838 = vmatprep.subr.bf16.mxu1 %v5990_v5 }
  0xa0   : > { %4622 = vmatmul.mubr.msk.bf16.gmra.mrb[20].mxu0 %vm992_vm1, %v5248_v28  ;;  %v674_v28 = vld [vmem:[%s6129_s15 + $0x78] sm:$0xff] }
  0xa1   : > { %1474 = vmatprep.mubr.bf16.mxu0 %v5990_v5  ;;  %2839 = vmatpush1.bf16.msra.mxu1 %v5288_v38 }
  0xa2   : > { %2840 = vmatprep.subr.bf16.mxu1 %v5990_v5 }
  0xa8   : > { %4623 = vmatmul.mubr.msk.bf16.gmra.mrb[24].mxu0 %vm992_vm1, %v5249_v29  ;;  %v675_v29 = vld [vmem:[%s6129_s15 + $0x80] sm:$0xff] }
  0xa9   : > { %1484 = vmatprep.mubr.bf16.mxu0 %v5990_v5  ;;  %v707_v32 = vmul.f32 %v675_v29, %v675_v29  ;;  %v5265_v29 = vld [vmem:[%s6124_s20 + $0x30] sm:$0xff]  }
  0xb0   : > { %4624 = vmatmul.mubr.msk.bf16.gmra.mrb[28].mxu0 %vm992_vm1, %v5250_v31  ;;  %v706_v31 = vmul.f32 %v674_v28, %v674_v28  ;;  %v5264_v28 = vld [vmem:[%s6124_s20 + $0x28] sm:$0xff]  }
  0xb1   : > { %1494 = vmatprep.mubr.bf16.mxu0 %v5990_v5 }
  0xb2   : > { %v769_v37 = vsel %vm8430_vm3, %v706_v31, 0.0  ;;  %v5269_v31 = vld [vmem:[%s6124_s20 + $0x40] sm:$0xff]  }
  0xb3   : > { %770 = vadd.xlane.f32.xlu1 %v769_v37  ;;  %v5279_v37 = vld [vmem:[%s6124_s20 + $0x68] sm:$0xff]  }
  0xb8   : > { %4625 = vmatmul.mubr.msk.bf16.gmra.mrb[32].mxu0 %vm992_vm1, %v5251_v33  ;;  %v676_v33 = vld [vmem:[%s6129_s15 + $0x88] sm:$0xff] }
  0xb9   : > { %1504 = vmatprep.mubr.bf16.mxu0 %v5990_v5  ;;  %v708_v34 = vmul.f32 %v676_v33, %v676_v33  ;;  %v5273_v33 = vld [vmem:[%s6124_s20 + $0x50] sm:$0xff]  }
  0xbb   : > { %v775_v44 = vsel %vm8430_vm3, %v708_v34, 0.0  ;;  %v5275_v34 = vld [vmem:[%s6124_s20 + $0x58] sm:$0xff]  }
  0xbc   : > { %776 = vadd.xlane.f32.xlu1 %v775_v44  ;;  %v5292_v44 = vld [vmem:[%s8386_s11 + $0x40] sm:$0xff]  }
  0xc0   : > { %4626 = vmatmul.mubr.msk.bf16.gmra.mrb[36].mxu0 %vm992_vm1, %v5252_v41  ;;  %v772_v41 = vsel %vm8430_vm3, %v707_v32, 0.0  ;;  %782 = vadd.xlane.f32.xlu1 %v781_v51  ;;  %v5271_v32 = vld [vmem:[%s6124_s20 + $0x48] sm:$0xff]   ;;  %s5126_s20 = spop %5125 }
  0xc1   : > { %1514 = vmatprep.mubr.bf16.mxu0 %v5990_v5  ;;  %773 = vadd.xlane.f32.xlu0 %v772_v41  ;;  %v5290_v41 = vld [vmem:[%s8386_s11 + $0x30] sm:$0xff]   ;;  %s5128_s19 = spop %5127 }
  0xc4   : > { %788 = vadd.xlane.f32.xlu1 %v787_v59 }
  0xc8   : > { %4627 = vmatmul.mubr.msk.bf16.gmra.mrb[40].mxu0 %vm992_vm1, %v5253_v49  ;;  %v778_v49 = vsel %vm8430_vm3, %v709_v42, 0.0  ;;  %794 = vadd.xlane.f32.xlu1 %v793_v2  ;;  %v5291_v42 = vld [vmem:[%s8386_s11 + $0x38] sm:$0xff]  }
  0xc9   : > { %1524 = vmatprep.mubr.bf16.mxu0 %v5990_v5  ;;  %779 = vadd.xlane.f32.xlu0 %v778_v49 }
  0xd0   : > { %4628 = vmatmul.mubr.msk.bf16.gmra.mrb[44].mxu0 %vm992_vm1, %v5254_v57  ;;  %v784_v57 = vsel %vm8430_vm3, %v711_v50, 0.0 }
  0xd1   : > { %1534 = vmatprep.mubr.bf16.mxu0 %v5990_v5  ;;  %785 = vadd.xlane.f32.xlu0 %v784_v57  ;;  %v6543_v6 = vpop.xlane.xlu1 %731 }
  0xd2   : > { %8472 = vst [vmem:[#allocation27_spill] sm:$0xff] %v6543_v6 }
  0xd5   : > { %791 = vadd.xlane.f32.xlu0 %v790_v0 }
  0xd7   : > { %v6547_v9 = vpop.xlane.xlu1 %734 }
  0xd8   : > { %4629 = vmatmul.mubr.msk.bf16.gmra.mrb[48].mxu0 %vm992_vm1, %v5255_v1  ;;  %v715_v1 = vmul.f32 %v683_v61, %v683_v61  ;;  %8474 = vst [vmem:[#allocation29_spill] sm:$0xff] %v6547_v9 }
  0xd9   : > { %1544 = vmatprep.mubr.bf16.mxu0 %v5990_v5 }
  0xda   : > { %v796_v8 = vsel %vm8430_vm3, %v715_v1, 0.0 }
  0xdb   : > { %797 = vadd.xlane.f32.xlu0 %v796_v8  ;;  %v6560_v15 = vpop.xlane.xlu1 %740 }
  0xdc   : > { %8480 = vst [vmem:[#allocation35_spill] sm:$0xff] %v6560_v15 }
  0xdf   : > { %803 = vadd.xlane.f32.xlu0 %v802_v14 }
  0xe0   : > { %4630 = vmatmul.mubr.msk.bf16.gmra.mrb[52].mxu0 %vm992_vm1, %v5256_v10  ;;  %v799_v10 = vsel %vm8430_vm3, %v716_v3, 0.0  ;;  %v6539_v3 = vpop.xlane.xlu0 %725 }
  0xe1   : > { %1554 = vmatprep.mubr.bf16.mxu0 %v5990_v5  ;;  %800 = vadd.xlane.f32.xlu1 %v799_v10  ;;  %8470 = vst [vmem:[#allocation25_spill] sm:$0xff] %v6539_v3 }
  0xe3   : > { %809 = vadd.xlane.f32.xlu0 %v808_v21  ;;  %v6575_v21 = vpop.xlane.xlu1 %746 }
  0xe4   : > { %v6545_v8 = vpop.xlane.xlu0 %728  ;;  %8485 = vst [vmem:[#allocation40_spill] sm:$0xff] %v6575_v21 }
  0xe5   : > { %806 = vadd.xlane.f32.xlu1 %v805_v16  ;;  %8473 = vst [vmem:[#allocation28_spill] sm:$0xff] %v6545_v8 }
  0xe8   : > { %4631 = vmatmul.mubr.msk.bf16.gmra.mrb[56].mxu0 %vm992_vm1, %v5257_v18  ;;  %v689_v18 = vld [vmem:[%s6129_s15 + $0xf0] sm:$0xff]  ;;  %v6556_v13 = vpop.xlane.xlu0 %737 }
  0xe9   : > { %1564 = vmatprep.mubr.bf16.mxu0 %v5990_v5  ;;  %v721_v22 = vmul.f32 %v689_v18, %v689_v18  ;;  %812 = vadd.xlane.f32.xlu1 %v811_v23  ;;  %8478 = vst [vmem:[#allocation33_spill] sm:$0xff] %v6556_v13 }
  0xeb   : > { %v814_v25 = vsel %vm8430_vm3, %v721_v22, 0.0 }
  0xec   : > { %815 = vadd.xlane.f32.xlu0 %v814_v25  ;;  %v6567_v18 = vpop.xlane.xlu0 %743  ;;  %v6585_v25 = vpop.xlane.xlu1 %752 }
  0xed   : > { %8483 = vst [vmem:[#allocation38_spill] sm:$0xff] %v6567_v18  ;;  %8487 = vst [vmem:[#allocation42_spill] sm:$0xff] %v6585_v25 }
  0xf0   : > { %4632 = vmatmul.mubr.msk.bf16.gmra.mrb[60].mxu0 %vm992_vm1, %v5258_v26  ;;  %v817_v26 = vsel %vm8430_vm3, %v722_v24, 0.0  ;;  %v6580_v23 = vpop.xlane.xlu0 %749 }
  0xf1   : > { %1781 = vmatprep.mubr.bf16.mxu0 %v5990_v5  ;;  %818 = vadd.xlane.f32.xlu1 %v817_v26  ;;  %8486 = vst [vmem:[#allocation41_spill] sm:$0xff] %v6580_v23 }
  0xf8   : > { %4652 = vmatmul.mubr.msk.bf16.vlgmr.msra.gmra.mrb[0].mxu0 %vm1693_vm4, %v5259_v39  ;;  %v5289_v39 = vld [vmem:[%s8386_s11 + $0x28] sm:$0xff]  }
  0xf9   : > { %1791 = vmatprep.mubr.bf16.mxu0 %v5990_v5  ;;  %2841 = vmatpush1.bf16.msra.mxu1 %v5289_v39 }
  0xfa   : > { %2842 = vmatprep.subr.bf16.mxu1 %v5990_v5 }
  0xfd   : > { %2843 = vmatpush1.bf16.msra.mxu1 %v5290_v41 }
  0xfe   : > { %2844 = vmatprep.subr.bf16.mxu1 %v5990_v5 }
 0x100   : > { %4653 = vmatmul.mubr.msk.bf16.gmra.mrb[4].mxu0 %vm1693_vm4, %v5260_v56 }
 0x101   : > { %1801 = vmatprep.mubr.bf16.mxu0 %v5990_v5  ;;  %2845 = vmatpush1.bf16.msra.mxu1 %v5291_v42 }
 0x102   : > { %2846 = vmatprep.subr.bf16.mxu1 %v5990_v5 }
 0x105   : > { %2847 = vmatpush1.bf16.msra.mxu1 %v5292_v44 }
 0x108   : > { %4654 = vmatmul.mubr.msk.bf16.gmra.mrb[8].mxu0 %vm1693_vm4, %v5261_v7  ;;  %v8395_v7 = vlaneseq }
 0x109   : > { %1811 = vmatprep.mubr.bf16.mxu0 %v5990_v5 }
 0x10a   : > { %v6554_v12 = vshrl.u32 %v8395_v7, 7 }
 0x10c   : > { %8477 = vst [vmem:[#allocation32_spill] sm:$0xff] %v6554_v12  ;;  %v6565_v17 = vsub.s32 0, %v6554_v12 }
 0x10e   : > { %8482 = vst [vmem:[#allocation37_spill] sm:$0xff] %v6565_v17  ;;  %v6578_v22 = vrot.slane %v2006_v19, %v6565_v17 }
 0x110   : > { %4655 = vmatmul.mubr.msk.bf16.gmra.mrb[12].mxu0 %vm1693_vm4, %v5262_v20  ;;  %v6573_v20 = vsub.s32 1, %v6554_v12  ;;  %v2020_v36 = vmul.f32 %v6578_v22, %v6545_v8  ;;  %v2022_v42 = vmul.f32 %v6578_v22, %v6543_v6 }
 0x111   : > { %1821 = vmatprep.mubr.bf16.mxu0 %v5990_v5 }
 0x112   : > { %8484 = vst [vmem:[#allocation39_spill] sm:$0xff] %v6573_v20  ;;  %v6583_v24 = vrot.slane %v2006_v19, %v6573_v20 }
 0x113   : > { %v6493_v45 = vpop.f32.mrb[0].mxu1 }
 0x114   : > { %v6495_v46 = vpop.f32.mrb[1].mxu1  ;;  %v2021_v39 = vmul.f32 %v6583_v24, %v6545_v8  ;;  %v2023_v7 = vmul.f32 %v6583_v24, %v6543_v6 }
 0x115   : > { %v6497_v47 = vpop.f32.mrb[2].mxu1 }
 0x116   : > { %v6499_v48 = vpop.f32.mrb[3].mxu1 }
 0x118   : > { %4656 = vmatmul.mubr.msk.bf16.gmra.mrb[16].mxu0 %vm1693_vm4, %v5263_v27 }
 0x119   : > { %1831 = vmatprep.mubr.bf16.mxu0 %v5990_v5 }
 0x11b   : > { %v6501_v49 = vpop.f32.mrb[4].mxu1 }
 0x11c   : > { %v6503_v50 = vpop.f32.mrb[5].mxu1 }
 0x120   : > { %4657 = vmatmul.mubr.msk.bf16.gmra.mrb[20].mxu0 %vm1693_vm4, %v5264_v28  ;;  %v2146_v28 = vld [vmem:[%s8385_s10] sm:$0x3] }
 0x121   : > { %1841 = vmatprep.mubr.bf16.mxu0 %v5990_v5  ;;  %v6612_v38 = vrot.slane %v2146_v28, %v6573_v20 }
 0x128   : > { %4658 = vmatmul.mubr.msk.bf16.gmra.mrb[24].mxu0 %vm1693_vm4, %v5265_v29  ;;  %v2018_v29 = vmul.f32 %v6578_v22, %v6539_v3 }
 0x129   : > { %1851 = vmatprep.mubr.bf16.mxu0 %v5990_v5 }
 0x130   : > { %4659 = vmatmul.mubr.msk.bf16.gmra.mrb[28].mxu0 %vm1693_vm4, %v5267_v30  ;;  %v6596_v30 = vpop.xlane.xlu0 %755 }
 0x131   : > { %1861 = vmatprep.mubr.bf16.mxu0 %v5990_v5  ;;  %8490 = vst [vmem:[#allocation45_spill] sm:$0xff] %v6596_v30 }
 0x138   : > { %4660 = vmatmul.mubr.msk.bf16.gmra.mrb[32].mxu0 %vm1693_vm4, %v5269_v31 }
 0x139   : > { %1871 = vmatprep.mubr.bf16.mxu0 %v5990_v5 }
 0x140   : > { %4661 = vmatmul.mubr.msk.bf16.gmra.mrb[36].mxu0 %vm1693_vm4, %v5271_v32  ;;  %v2019_v32 = vmul.f32 %v6583_v24, %v6539_v3 }
 0x141   : > { %1881 = vmatprep.mubr.bf16.mxu0 %v5990_v5 }
 0x148   : > { %4662 = vmatmul.mubr.msk.bf16.gmra.mrb[40].mxu0 %vm1693_vm4, %v5273_v33  ;;  %v6602_v33 = vpop.xlane.xlu1 %758 }
 0x149   : > { %1891 = vmatprep.mubr.bf16.mxu0 %v5990_v5  ;;  %8492 = vst [vmem:[#allocation47_spill] sm:$0xff] %v6602_v33 }
 0x14c   : > { %v6626_v20 = vpop.xlane.xlu1 %764 }
 0x14d   : > { %8495 = vst [vmem:[#allocation50_spill] sm:$0xff] %v6626_v20 }
 0x150   : > { %4663 = vmatmul.mubr.msk.bf16.gmra.mrb[44].mxu0 %vm1693_vm4, %v5275_v34 }
 0x151   : > { %1901 = vmatprep.mubr.bf16.mxu0 %v5990_v5 }
 0x158   : > { %4664 = vmatmul.mubr.msk.bf16.gmra.mrb[48].mxu0 %vm1693_vm4, %v5277_v35  ;;  %v6607_v35 = vrot.slane %v2146_v28, %v6565_v17  ;;  %v2024_v17 = vmul.f32 %v6578_v22, %v6547_v9  ;;  %v2025_v28 = vmul.f32 %v6583_v24, %v6547_v9 }
 0x159   : > { %1911 = vmatprep.mubr.bf16.mxu0 %v5990_v5 }
 0x160   : > { %4665 = vmatmul.mubr.msk.bf16.gmra.mrb[52].mxu0 %vm1693_vm4, %v5279_v37 }
 0x161   : > { %1921 = vmatprep.mubr.bf16.mxu0 %v5990_v5 }
 0x168   : > { %4666 = vmatmul.mubr.msk.bf16.gmra.mrb[56].mxu0 %vm1693_vm4, %v5281_v40 }
 0x169   : > { %1931 = vmatprep.mubr.bf16.mxu0 %v5990_v5  ;;  %v6505_v5 = vpop.f32.mrb[6].mxu1 }
 0x16a   : > { %8453 = vst [vmem:[#allocation8_spill] sm:$0xff] %v6505_v5  ;;  %v6507_v51 = vpop.f32.mrb[7].mxu1 }
 0x16b   : > { %8454 = vst [vmem:[#allocation9_spill] sm:$0xff] %v6507_v51  ;;  %v6509_v52 = vpop.f32.mrb[8].mxu1 }
 0x16c   : > { %8455 = vst [vmem:[#allocation10_spill] sm:$0xff] %v6509_v52  ;;  %v6511_v53 = vpop.f32.mrb[9].mxu1 }
 0x16d   : > { %8456 = vst [vmem:[#allocation11_spill] sm:$0xff] %v6511_v53  ;;  %v6513_v54 = vpop.f32.mrb[10].mxu1 }
 0x16e   : > { %8457 = vst [vmem:[#allocation12_spill] sm:$0xff] %v6513_v54  ;;  %v6515_v55 = vpop.f32.mrb[11].mxu1 }
 0x16f   : > { %8458 = vst [vmem:[#allocation13_spill] sm:$0xff] %v6515_v55  ;;  %v6517_v56 = vpop.f32.mrb[12].mxu1 }
 0x170   : > { %4667 = vmatmul.mubr.msk.bf16.gmra.mrb[60].mxu0 %vm1693_vm4, %v5283_v43  ;;  %8459 = vst [vmem:[#allocation14_spill] sm:$0xff] %v6517_v56  ;;  %v6519_v57 = vpop.f32.mrb[13].mxu1  ;;  %v6618_v43 = vpop.xlane.xlu0 %761 }
 0x171   : > { %8460 = vst [vmem:[#allocation15_spill] sm:$0xff] %v6519_v57  ;;  %v6521_v58 = vpop.f32.mrb[14].mxu1  ;;  %8494 = vst [vmem:[#allocation49_spill] sm:$0xff] %v6618_v43 }
 0x172   : > { %8461 = vst [vmem:[#allocation16_spill] sm:$0xff] %v6521_v58  ;;  %v6523_v59 = vpop.f32.mrb[15].mxu1 }
 0x173   : > { %8462 = vst [vmem:[#allocation17_spill] sm:$0xff] %v6523_v59  ;;  %v6525_v60 = vpop.f32.mrb[16].mxu1 }
 0x174   : > { %8463 = vst [vmem:[#allocation18_spill] sm:$0xff] %v6525_v60  ;;  %v6527_v61 = vpop.f32.mrb[17].mxu1 }
 0x175   : > { %8464 = vst [vmem:[#allocation19_spill] sm:$0xff] %v6527_v61  ;;  %v6529_v62 = vpop.f32.mrb[18].mxu1 }
 0x176   : > { %8465 = vst [vmem:[#allocation20_spill] sm:$0xff] %v6529_v62  ;;  %v6531_v63 = vpop.f32.mrb[19].mxu1 }
 0x177   : > { %8466 = vst [vmem:[#allocation21_spill] sm:$0xff] %v6531_v63  ;;  %v6533_v0 = vpop.f32.mrb[20].mxu1 }
 0x178   : > { %8467 = vst [vmem:[#allocation22_spill] sm:$0xff] %v6533_v0  ;;  %v6535_v1 = vpop.f32.mrb[21].mxu1 }
 0x179   : > { %8468 = vst [vmem:[#allocation23_spill] sm:$0xff] %v6535_v1  ;;  %v6537_v2 = vpop.f32.mrb[22].mxu1  ;;  %v6740_v1 = vmul.f32 %v6578_v22, %v6626_v20 }
 0x17a   : > { %8469 = vst [vmem:[#allocation24_spill] sm:$0xff] %v6537_v2  ;;  %v6541_v4 = vpop.f32.mrb[23].mxu1 }
 0x17b   : > { %8471 = vst [vmem:[#allocation26_spill] sm:$0xff] %v6541_v4  ;;  %v6549_v10 = vpop.f32.mrb[24].mxu1 }
 0x17c   : > { %8475 = vst [vmem:[#allocation30_spill] sm:$0xff] %v6549_v10  ;;  %v6551_v11 = vpop.f32.mrb[25].mxu1 }
 0x17d   : > { %8476 = vst [vmem:[#allocation31_spill] sm:$0xff] %v6551_v11  ;;  %v6558_v14 = vpop.f32.mrb[26].mxu1 }
 0x17e   : > { %8479 = vst [vmem:[#allocation34_spill] sm:$0xff] %v6558_v14  ;;  %v6562_v16 = vpop.f32.mrb[27].mxu1 }
 0x17f   : > { %8481 = vst [vmem:[#allocation36_spill] sm:$0xff] %v6562_v16  ;;  %v6587_v26 = vpop.f32.mrb[28].mxu1 }
 0x180   : > { %8488 = vst [vmem:[#allocation43_spill] sm:$0xff] %v6587_v26  ;;  %v6589_v27 = vpop.f32.mrb[29].mxu1 }
 0x181   : > { %8489 = vst [vmem:[#allocation44_spill] sm:$0xff] %v6589_v27  ;;  %v6598_v31 = vpop.f32.mrb[30].mxu1  ;;  %v6687_v27 = vmul.f32 %v6578_v22, %v6580_v23 }
 0x182   : > { %8491 = vst [vmem:[#allocation46_spill] sm:$0xff] %v6598_v31  ;;  %v6604_v34 = vpop.f32.mrb[31].mxu1 }
 0x183   : > { %8493 = vst [vmem:[#allocation48_spill] sm:$0xff] %v6604_v34  ;;  %v6639_v8 = vpop.f32.mrb[32].mxu1  ;;  %v6680_v34 = vpop.xlane.xlu1 %770 }
 0x184   : > { %8496 = vst [vmem:[#allocation51_spill] sm:$0xff] %v6639_v8  ;;  %8499 = vst [vmem:[#allocation54_spill] sm:$0xff] %v6680_v34  ;;  %v6766_v0 = vmul.f32 %v6578_v22, %v6680_v34 }
 0x1cb   : > { %v1783_v37 = vpop.f32.mrb[0].mxu0 }
 0x1cc   : > { %v2082_v40 = vadd.f32 %v2018_v29, %v1783_v37  ;;  %v1785_v41 = vpop.f32.mrb[1].mxu0 }
 0x1cd   : > { %v2083_v44 = vadd.f32 %v2019_v32, %v1785_v41  ;;  %v1787_v19 = vpop.f32.mrb[2].mxu0  ;;  %v6633_v32 = vmul.f32 %v6578_v22, %v6556_v13  ;;  %v6637_v41 = vmul.f32 %v6583_v24, %v6556_v13 }
 0x1ce   : > { %v6629_v29 = vadd.f32 %v6607_v35, %v2082_v40  ;;  %v2084_v37 = vadd.f32 %v2020_v36, %v1787_v19  ;;  %v1789_v12 = vpop.f32.mrb[3].mxu0  ;;  %v6646_v40 = vmul.f32 %v6578_v22, %v6560_v15  ;;  %v6650_v36 = vmul.f32 %v6583_v24, %v6560_v15  ;;  %v6652_v19 = vpop.f32.mrb[33].mxu1 }
 0x1cf   : > { %v6642_v3 = vadd.f32 %v6612_v38, %v2083_v44  ;;  %v2085_v9 = vadd.f32 %v2021_v39, %v1789_v12  ;;  %8497 = vst [vmem:[#allocation52_spill] sm:$0xff] %v6652_v19  ;;  %v6660_v44 = vmul.f32 %v6578_v22, %v6567_v18  ;;  %v6664_v12 = vmul.f32 %v6583_v24, %v6567_v18  ;;  %v6666_v39 = vpop.xlane.xlu0 %767  ;;  %v6682_v31 = vpop.f32.mrb[34].mxu1 }
 0x1d0   : > { %v4668_v6 = vmul.f32 -1.442695, %v6629_v29  ;;  %v6656_v13 = vadd.f32 %v6607_v35, %v2084_v37  ;;  %8498 = vst [vmem:[#allocation53_spill] sm:$0xff] %v6666_v39  ;;  %v6674_v19 = vmul.f32 %v6578_v22, %v6575_v21  ;;  %v6678_v37 = vmul.f32 %v6583_v24, %v6575_v21  ;;  %8500 = vst [vmem:[#allocation55_spill] sm:$0xff] %v6682_v31  ;;  %v6693_v26 = vpop.f32.mrb[35].mxu1 }
 0x1d1   : > { %v4669_v15 = vmul.f32 -1.442695, %v6642_v3  ;;  %v6670_v8 = vadd.f32 %v6612_v38, %v2085_v9  ;;  %v6691_v9 = vmul.f32 %v6583_v24, %v6580_v23  ;;  %8501 = vst [vmem:[#allocation56_spill] sm:$0xff] %v6693_v26  ;;  %v6698_v31 = vmul.f32 %v6578_v22, %v6585_v25 }
 0x1d2   : > { %5294 = vpow2.f32 %v4668_v6  ;;  %v4670_v18 = vmul.f32 -1.442695, %v6656_v13  ;;  %v6702_v6 = vmul.f32 %v6583_v24, %v6585_v25  ;;  %v6706_v23 = vmul.f32 %v6578_v22, %v6596_v30 }
 0x1d3   : > { %5296 = vpow2.f32 %v4669_v15  ;;  %v4671_v21 = vmul.f32 -1.442695, %v6670_v8  ;;  %v1793_v16 = vpop.f32.mrb[4].mxu0  ;;  %v6710_v15 = vmul.f32 %v6583_v24, %v6596_v30  ;;  %v6712_v26 = vpop.xlane.xlu0 %773  ;;  %v6716_v25 = vmul.f32 %v6578_v22, %v6602_v33 }
 0x1d4   : > { %5298 = vpow2.f32 %v4670_v18  ;;  %v2086_v14 = vadd.f32 %v2022_v42, %v1793_v16  ;;  %v1795_v11 = vpop.f32.mrb[5].mxu0  ;;  %8502 = vst [vmem:[#allocation57_spill] sm:$0xff] %v6712_v26  ;;  %v6720_v16 = vmul.f32 %v6583_v24, %v6602_v33  ;;  %v6722_v18 = vpop.xlane.xlu1 %776  ;;  %v6777_v62 = vmul.f32 %v6578_v22, %v6712_v26 }
 0x1d5   : > { %5300 = vpow2.f32 %v4671_v21  ;;  %v2087_v10 = vadd.f32 %v2023_v7, %v1795_v11  ;;  %v1797_v4 = vpop.f32.mrb[6].mxu0  ;;  %8503 = vst [vmem:[#allocation58_spill] sm:$0xff] %v6722_v18  ;;  %v6729_v21 = vmul.f32 %v6578_v22, %v6618_v43  ;;  %v6733_v7 = vmul.f32 %v6583_v24, %v6618_v43 }
 0x1d6   : > { %v6725_v42 = vadd.f32 %v6607_v35, %v2086_v14  ;;  %v2088_v30 = vadd.f32 %v2024_v17, %v1797_v4  ;;  %v1799_v2 = vpop.f32.mrb[7].mxu0  ;;  %v6744_v4 = vmul.f32 %v6583_v24, %v6626_v20  ;;  %v6752_v43 = vmul.f32 %v6578_v22, %v6666_v39 }
 0x1d7   : > { %v6736_v11 = vadd.f32 %v6612_v38, %v2087_v10  ;;  %v2089_v33 = vadd.f32 %v2025_v28, %v1799_v2  ;;  %v6756_v2 = vmul.f32 %v6583_v24, %v6666_v39  ;;  %v6758_v10 = vpop.xlane.xlu0 %779 }
 0x1d8   : > { %v4672_v14 = vmul.f32 -1.442695, %v6725_v42  ;;  %v6748_v17 = vadd.f32 %v6607_v35, %v2088_v30  ;;  %8504 = vst [vmem:[#allocation59_spill] sm:$0xff] %v6758_v10  ;;  %v6770_v30 = vmul.f32 %v6583_v24, %v6680_v34  ;;  %v6772_v63 = vpop.xlane.xlu1 %782  ;;  %v6786_v34 = vmul.f32 %v6578_v22, %v6722_v18 }
 0x1d9   : > { %v4673_v28 = vmul.f32 -1.442695, %v6736_v11  ;;  %v6762_v20 = vadd.f32 %v6612_v38, %v2089_v33  ;;  %8505 = vst [vmem:[#allocation60_spill] sm:$0xff] %v6772_v63  ;;  %v6781_v33 = vmul.f32 %v6583_v24, %v6712_v26  ;;  %v6795_v26 = vmul.f32 %v6578_v22, %v6758_v10 }
 0x1da   : > { %5302 = vpow2.f32 %v4672_v14  ;;  %v4674_v39 = vmul.f32 -1.442695, %v6748_v17  ;;  %8507 = vst [vmem:[#allocation62_spill] sm:$0xff] %v6786_v34  ;;  %v6790_v14 = vmul.f32 %v6583_v24, %v6722_v18 }
 0x1db   : > { %8506 = vst [vmem:[#allocation61_spill] sm:$0xff] %v6781_v33  ;;  %5304 = vpow2.f32 %v4673_v28  ;;  %v4675_v61 = vmul.f32 -1.442695, %v6762_v20  ;;  %v1803_v60 = vpop.f32.mrb[8].mxu0  ;;  %8509 = vst [vmem:[#allocation64_spill] sm:$0xff] %v6795_v26  ;;  %v6799_v28 = vmul.f32 %v6583_v24, %v6758_v10  ;;  %v6801_v56 = vpop.xlane.xlu0 %785 }
 0x1dc   : > { %8508 = vst [vmem:[#allocation63_spill] sm:$0xff] %v6790_v14  ;;  %v5295_v59 = vpop.eup %5294  ;;  %5306 = vpow2.f32 %v4674_v39  ;;  %v2090_v58 = vadd.f32 %v6633_v32, %v1803_v60  ;;  %v1805_v57 = vpop.f32.mrb[9].mxu0  ;;  %8511 = vst [vmem:[#allocation66_spill] sm:$0xff] %v6801_v56  ;;  %v6806_v60 = vmul.f32 %v6578_v22, %v6772_v63 }
 0x1dd   : > { %8510 = vst [vmem:[#allocation65_spill] sm:$0xff] %v6799_v28  ;;  %v5297_v55 = vpop.eup %5296  ;;  %v2414_v54 = vadd.f32 1.0, %v5295_v59  ;;  %5308 = vpow2.f32 %v4675_v61  ;;  %v2091_v18 = vadd.f32 %v6637_v41, %v1805_v57  ;;  %v1807_v53 = vpop.f32.mrb[10].mxu0  ;;  %v6816_v59 = vmul.f32 %v6583_v24, %v6772_v63 }
 0x1de   : > { %8512 = vst [vmem:[#allocation67_spill] sm:$0xff] %v6806_v60  ;;  %v6808_v32 = vpop.xlane.xlu1 %788  ;;  %v5299_v39 = vpop.eup %5298  ;;  %v2415_v26 = vadd.f32 1.0, %v5297_v55  ;;  %v6811_v52 = vadd.f32 %v6607_v35, %v2090_v58  ;;  %v2092_v10 = vadd.f32 %v6646_v40, %v1807_v53 }
 0x1df   : > { %8513 = vst [vmem:[#allocation68_spill] sm:$0xff] %v6808_v32  ;;  %v1809_v28 = vpop.f32.mrb[11].mxu0  ;;  %8514 = vst [vmem:[#allocation69_spill] sm:$0xff] %v6816_v59  ;;  %v5301_v57 = vpop.eup %5300  ;;  %5310 = vrcp.f32 %v2414_v54  ;;  %v2416_v61 = vadd.f32 1.0, %v5299_v39  ;;  %v6819_v41 = vadd.f32 %v6612_v38, %v2091_v18  ;;  %v6834_v18 = vmul.f32 %v6578_v22, %v6801_v56 }
 0x1e0   : > { %v2093_v60 = vadd.f32 %v6650_v36, %v1809_v28  ;;  %5312 = vrcp.f32 %v2415_v26  ;;  %v2417_v55 = vadd.f32 1.0, %v5301_v57  ;;  %v4676_v58 = vmul.f32 -1.442695, %v6811_v52  ;;  %v6826_v53 = vpop.xlane.xlu0 %791 }
 0x1e1   : > { %v6824_v14 = vadd.f32 %v6607_v35, %v2092_v10  ;;  %8515 = vst [vmem:[#allocation70_spill] sm:$0xff] %v6826_v53  ;;  %5314 = vrcp.f32 %v2416_v61  ;;  %v4677_v40 = vmul.f32 -1.442695, %v6819_v41  ;;  %8516 = vst [vmem:[#allocation71_spill] sm:$0xff] %v6834_v18  ;;  %v6841_v10 = vmul.f32 %v6583_v24, %v6801_v56 }
 0x1e2   : > { %v6830_v54 = vadd.f32 %v6612_v38, %v2093_v60  ;;  %v6836_v36 = vpop.xlane.xlu1 %794  ;;  %5316 = vrcp.f32 %v2417_v55  ;;  %v6845_v28 = vmul.f32 %v6578_v22, %v6808_v32  ;;  %v6850_v57 = vmul.f32 %v6583_v24, %v6808_v32 }
 0x1e3   : > { %8517 = vst [vmem:[#allocation72_spill] sm:$0xff] %v6836_v36  ;;  %v4678_v26 = vmul.f32 -1.442695, %v6824_v14  ;;  %8518 = vst [vmem:[#allocation73_spill] sm:$0xff] %v6841_v10  ;;  %5318 = vpow2.f32 %v4676_v58  ;;  %v1813_v39 = vpop.f32.mrb[12].mxu0  ;;  %v6854_v61 = vmul.f32 %v6578_v22, %v6826_v53  ;;  %v6863_v58 = vmul.f32 %v6578_v22, %v6836_v36 }
 0x1e4   : > { %8519 = vst [vmem:[#allocation74_spill] sm:$0xff] %v6845_v28  ;;  %v4679_v60 = vmul.f32 -1.442695, %v6830_v54  ;;  %8520 = vst [vmem:[#allocation75_spill] sm:$0xff] %v6850_v57  ;;  %v5303_v55 = vpop.eup %5302  ;;  %5320 = vpow2.f32 %v4677_v40  ;;  %v2094_v56 = vadd.f32 %v6660_v44, %v1813_v39  ;;  %v1815_v63 = vpop.f32.mrb[13].mxu0  ;;  %v6859_v28 = vmul.f32 %v6583_v24, %v6826_v53 }
 0x1e5   : > { %8521 = vst [vmem:[#allocation76_spill] sm:$0xff] %v6854_v61  ;;  %8523 = vst [vmem:[#allocation78_spill] sm:$0xff] %v6863_v58  ;;  %v6865_v10 = vpop.xlane.xlu0 %797  ;;  %v5305_v32 = vpop.eup %5304  ;;  %v2418_v57 = vadd.f32 1.0, %v5303_v55  ;;  %5322 = vpow2.f32 %v4678_v26  ;;  %v2095_v61 = vadd.f32 %v6664_v12, %v1815_v63  ;;  %v6870_v44 = vmul.f32 %v6583_v24, %v6836_v36 }
 0x1e6   : > { %8522 = vst [vmem:[#allocation77_spill] sm:$0xff] %v6859_v28  ;;  %8524 = vst [vmem:[#allocation79_spill] sm:$0xff] %v6865_v10  ;;  %v1817_v18 = vpop.f32.mrb[14].mxu0  ;;  %v5307_v40 = vpop.eup %5306  ;;  %v2419_v39 = vadd.f32 1.0, %v5305_v32  ;;  %5324 = vpow2.f32 %v4679_v60  ;;  %v6873_v53 = vadd.f32 %v6607_v35, %v2094_v56 }
 0x1e7   : > { %8525 = vst [vmem:[#allocation80_spill] sm:$0xff] %v6870_v44  ;;  %v2096_v58 = vadd.f32 %v6674_v19, %v1817_v18  ;;  %v1819_v28 = vpop.f32.mrb[15].mxu0  ;;  %v5309_v59 = vpop.eup %5308  ;;  %5326 = vrcp.f32 %v2418_v57  ;;  %v2420_v26 = vadd.f32 1.0, %v5307_v40  ;;  %v6877_v63 = vadd.f32 %v6612_v38, %v2095_v61 }
 0x1e8   : > { %v2097_v12 = vadd.f32 %v6678_v37, %v1819_v28  ;;  %v6880_v55 = vpop.xlane.xlu1 %800  ;;  %5328 = vrcp.f32 %v2419_v39  ;;  %v2421_v32 = vadd.f32 1.0, %v5309_v59  ;;  %v4680_v60 = vmul.f32 -1.442695, %v6873_v53 }
 0x1e9   : > { %8526 = vst [vmem:[#allocation81_spill] sm:$0xff] %v6880_v55  ;;  %v6884_v56 = vadd.f32 %v6607_v35, %v2096_v58  ;;  %v6886_v19 = vpop.xlane.xlu0 %803  ;;  %v5311_v18 = vpop.eup %5310  ;;  %5330 = vrcp.f32 %v2420_v26  ;;  %v4681_v57 = vmul.f32 -1.442695, %v6877_v63  ;;  %v6894_v37 = vmul.f32 %v6578_v22, %v6865_v10 }
 0x1ea   : > { %v6890_v61 = vadd.f32 %v6612_v38, %v2097_v12  ;;  %v5313_v28 = vpop.eup %5312  ;;  %5332 = vrcp.f32 %v2421_v32  ;;  %v6899_v58 = vmul.f32 %v6583_v24, %v6865_v10  ;;  %v6903_v40 = vmul.f32 %v6578_v22, %v6880_v55 }
 0x1eb   : > { %8527 = vst [vmem:[#allocation82_spill] sm:$0xff] %v6894_v37  ;;  %v4682_v59 = vmul.f32 -1.442695, %v6884_v56  ;;  %v5315_v39 = vpop.eup %5314  ;;  %5334 = vpow2.f32 %v4680_v60  ;;  %v1823_v12 = vpop.f32.mrb[16].mxu0  ;;  %v6908_v36 = vmul.f32 %v6583_v24, %v6880_v55  ;;  %v6912_v32 = vmul.f32 %v6578_v22, %v6886_v19 }
 0x1ec   : > { %8528 = vst [vmem:[#allocation83_spill] sm:$0xff] %v6899_v58  ;;  %8529 = vst [vmem:[#allocation84_spill] sm:$0xff] %v6903_v40  ;;  %v4683_v26 = vmul.f32 -1.442695, %v6890_v61  ;;  %v5317_v37 = vpop.eup %5316  ;;  %v2606_v10 = vmul.f32 %v5311_v18, %v6629_v29  ;;  %v2608_v58 = vmul.f32 %v5315_v39, %v6656_v13  ;;  %5336 = vpow2.f32 %v4681_v57  ;;  %v1825_v60 = vpop.f32.mrb[17].mxu0 }
 0x1ed   : > { %8530 = vst [vmem:[#allocation85_spill] sm:$0xff] %v6908_v36  ;;  %8531 = vst [vmem:[#allocation86_spill] sm:$0xff] %v6912_v32  ;;  %v2098_v40 = vadd.f32 %v6687_v27, %v1823_v12  ;;  %v5319_v44 = vpop.eup %5318  ;;  %v2607_v34 = vmul.f32 %v5313_v28, %v6642_v3  ;;  %v2609_v51 = vmul.f32 %v5317_v37, %v6670_v8  ;;  %5338 = vpow2.f32 %v4682_v59  ;;  %v1827_v36 = vpop.f32.mrb[18].mxu0 }
 0x1ee   : > { %v2099_v55 = vadd.f32 %v6691_v9, %v1825_v60  ;;  %v5321_v5 = vpop.eup %5320  ;;  %v2670_v32 = vpack.c.bf16 %v2608_v58, %v2606_v10  ;;  %v2422_v33 = vadd.f32 1.0, %v5319_v44  ;;  %5340 = vpow2.f32 %v4683_v26  ;;  %v1829_v13 = vpop.f32.mrb[19].mxu0 }
 0x1ef   : > { %v6921_v29 = vadd.f32 %v6607_v35, %v2098_v40  ;;  %v5323_v18 = vpop.eup %5322  ;;  %v2671_v27 = vpack.c.bf16 %v2609_v51, %v2607_v34  ;;  %v2423_v57 = vadd.f32 1.0, %v5321_v5  ;;  %v2100_v3 = vadd.f32 %v6698_v31, %v1827_v36  ;;  %v6927_v8 = vpop.xlane.xlu1 %806 }
 0x1f0   : > { %v6924_v39 = vadd.f32 %v6612_v38, %v2099_v55  ;;  %v5325_v9 = vpop.eup %5324  ;;  %5342 = vrcp.f32 %v2422_v33  ;;  %v2424_v37 = vadd.f32 1.0, %v5323_v18  ;;  %v2101_v44 = vadd.f32 %v6702_v6, %v1829_v13 }
 0x1f1   : > { %v4684_v10 = vmul.f32 -1.442695, %v6921_v29  ;;  %v5327_v28 = vpop.eup %5326  ;;  %5344 = vrcp.f32 %v2423_v57  ;;  %v2425_v59 = vadd.f32 1.0, %v5325_v9  ;;  %v6933_v5 = vadd.f32 %v6607_v35, %v2100_v3  ;;  %4742 = vmatprep.mubr.msk.bf16.mxu1 %vm2781_vm5, %v2671_v27 }
 0x1f2   : > { %v4685_v51 = vmul.f32 -1.442695, %v6924_v39  ;;  %v5329_v31 = vpop.eup %5328  ;;  %5346 = vrcp.f32 %v2424_v37  ;;  %v6937_v34 = vadd.f32 %v6612_v38, %v2101_v44  ;;  %2863 = vmatmul.mubr.bf16.vlgmr.msra.gmra.mrb[36].mxu1 %v2670_v32  ;;  %v6941_v33 = vmul.f32 %v6583_v24, %v6886_v19 }
 0x1f3   : > { %v6945_v6 = vmul.f32 %v6578_v22, %v6927_v8  ;;  %v5331_v36 = vpop.eup %5330  ;;  %v2610_v55 = vmul.f32 %v5327_v28, %v6725_v42  ;;  %5348 = vrcp.f32 %v2425_v59  ;;  %v4686_v58 = vmul.f32 -1.442695, %v6933_v5  ;;  %v1833_v40 = vpop.f32.mrb[20].mxu0 }
 0x1f4   : > { %v6951_v26 = vmul.f32 %v6583_v24, %v6927_v8  ;;  %v5333_v12 = vpop.eup %5332  ;;  %v2611_v32 = vmul.f32 %v5329_v31, %v6736_v11  ;;  %5350 = vpow2.f32 %v4684_v10  ;;  %v4687_v60 = vmul.f32 -1.442695, %v6937_v34  ;;  %v1835_v18 = vpop.f32.mrb[21].mxu0 }
 0x1f5   : > { %v2102_v13 = vadd.f32 %v6706_v23, %v1833_v40  ;;  %v5335_v27 = vpop.eup %5334  ;;  %v2612_v42 = vmul.f32 %v5331_v36, %v6748_v17  ;;  %v2613_v57 = vmul.f32 %v5333_v12, %v6762_v20  ;;  %5352 = vpow2.f32 %v4685_v51  ;;  %v1837_v9 = vpop.f32.mrb[22].mxu0 }
 0x1f6   : > { %v2103_v3 = vadd.f32 %v6710_v15, %v1835_v18  ;;  %v5337_v37 = vpop.eup %5336  ;;  %v2426_v44 = vadd.f32 1.0, %v5335_v27  ;;  %5354 = vpow2.f32 %v4686_v58  ;;  %v2104_v10 = vadd.f32 %v6716_v25, %v1837_v9  ;;  %v1839_v28 = vpop.f32.mrb[23].mxu0  ;;  %v5293_v15 = vld [vmem:[%s8388_s13] sm:$0xff]  }
 0x1f7   : > { %v6960_v11 = vadd.f32 %v6607_v35, %v2102_v13  ;;  %v5339_v23 = vpop.eup %5338  ;;  %v2673_v59 = vpack.c.bf16 %v2613_v57, %v2611_v32  ;;  %v2427_v31 = vadd.f32 1.0, %v5337_v37  ;;  %5356 = vpow2.f32 %v4687_v60  ;;  %v6966_v20 = vpop.xlane.xlu0 %809  ;;  %4959 = vmatprep.subr.bf16.mxu1 %v5293_v15 }
 0x1f8   : > { %v6964_v17 = vadd.f32 %v6612_v38, %v2103_v3  ;;  %v5341_v51 = vpop.eup %5340  ;;  %5358 = vrcp.f32 %v2426_v44  ;;  %v2428_v36 = vadd.f32 1.0, %v5339_v23  ;;  %v6973_v25 = vadd.f32 %v6607_v35, %v2104_v10  ;;  %v6975_v40 = vpop.xlane.xlu1 %812  ;;  %4960 = vmatpush3.bf16.msra.mxu1 %v5293_v15 }
 0x1f9   : > { %v4688_v58 = vmul.f32 -1.442695, %v6960_v11  ;;  %5360 = vrcp.f32 %v2427_v31  ;;  %v2429_v12 = vadd.f32 1.0, %v5341_v51  ;;  %v2105_v60 = vadd.f32 %v6720_v16, %v1839_v28  ;;  %4743 = vmatprep.mubr.msk.bf16.mxu1 %vm2781_vm5, %v2673_v59 }
 0x1fa   : > { %v4689_v32 = vmul.f32 -1.442695, %v6964_v17  ;;  %v5343_v13 = vpop.eup %5342  ;;  %5362 = vrcp.f32 %v2428_v36  ;;  %v4690_v18 = vmul.f32 -1.442695, %v6973_v25  ;;  %v2672_v27 = vpack.c.bf16 %v2612_v42, %v2610_v55 }
 0x1fb   : > { %v6983_v57 = vmul.f32 %v6578_v22, %v6966_v20  ;;  %v5345_v3 = vpop.eup %5344  ;;  %5364 = vrcp.f32 %v2429_v12  ;;  %v6986_v9 = vadd.f32 %v6612_v38, %v2105_v60  ;;  %v1843_v37 = vpop.f32.mrb[24].mxu0  ;;  %v6990_v16 = vmul.f32 %v6583_v24, %v6966_v20 }
 0x1fc   : > { %v6994_v44 = vmul.f32 %v6578_v22, %v6975_v40  ;;  %v5347_v55 = vpop.eup %5346  ;;  %v2615_v42 = vmul.f32 %v5345_v3, %v6819_v41  ;;  %5366 = vpow2.f32 %v4688_v58  ;;  %2871 = vmatmul.mubr.bf16.gmra.mrb[40].mxu1 %v2672_v27  ;;  %v2106_v10 = vadd.f32 %v6729_v21, %v1843_v37  ;;  %v1845_v28 = vpop.f32.mrb[25].mxu0 }
 0x1fd   : > { %v7000_v23 = vmul.f32 %v6583_v24, %v6975_v40  ;;  %v5349_v59 = vpop.eup %5348  ;;  %v2616_v31 = vmul.f32 %v5347_v55, %v6824_v14  ;;  %5368 = vpow2.f32 %v4689_v32  ;;  %v4691_v15 = vmul.f32 -1.442695, %v6986_v9  ;;  %v1847_v36 = vpop.f32.mrb[26].mxu0 }
 0x1fe   : > { %v2107_v51 = vadd.f32 %v6733_v7, %v1845_v28  ;;  %v5351_v12 = vpop.eup %5350  ;;  %v2617_v41 = vmul.f32 %v5349_v59, %v6830_v54  ;;  %5370 = vpow2.f32 %v4690_v18  ;;  %v7007_v21 = vadd.f32 %v6607_v35, %v2106_v10  ;;  %v1849_v60 = vpop.f32.mrb[27].mxu0 }
 0x1ff   : > { %v2108_v58 = vadd.f32 %v6740_v1, %v1847_v36  ;;  %v5353_v27 = vpop.eup %5352  ;;  %v2430_v3 = vadd.f32 1.0, %v5351_v12  ;;  %5372 = vpow2.f32 %v4691_v15  ;;  %v2109_v32 = vadd.f32 %v6744_v4, %v1849_v60  ;;  %v7018_v10 = vpop.xlane.xlu0 %815 }
 0x200   : > { %v7011_v14 = vadd.f32 %v6612_v38, %v2107_v51  ;;  %v5355_v7 = vpop.eup %5354  ;;  %v2614_v37 = vmul.f32 %v5343_v13, %v6811_v52  ;;  %v2675_v55 = vpack.c.bf16 %v2617_v41, %v2615_v42  ;;  %v2431_v54 = vadd.f32 1.0, %v5353_v27  ;;  %8532 = vst [vmem:[#allocation87_spill] sm:$0xff] %v7018_v10 }
 0x201   : > { %v7016_v18 = vadd.f32 %v6607_v35, %v2108_v58  ;;  %v5357_v1 = vpop.eup %5356  ;;  %5374 = vrcp.f32 %v2430_v3  ;;  %v2432_v28 = vadd.f32 1.0, %v5355_v7  ;;  %v4692_v59 = vmul.f32 -1.442695, %v7007_v21 }
 0x202   : > { %v7022_v15 = vadd.f32 %v6612_v38, %v2109_v32  ;;  %v5359_v51 = vpop.eup %5358  ;;  %5376 = vrcp.f32 %v2431_v54  ;;  %v2433_v4 = vadd.f32 1.0, %v5357_v1  ;;  %v4693_v52 = vmul.f32 -1.442695, %v7011_v14  ;;  %4744 = vmatprep.mubr.msk.bf16.mxu1 %vm2781_vm5, %v2675_v55 }
 0x203   : > { %v2674_v13 = vpack.c.bf16 %v2616_v31, %v2614_v37  ;;  %v5361_v42 = vpop.eup %5360  ;;  %5378 = vrcp.f32 %v2432_v28  ;;  %v4694_v36 = vmul.f32 -1.442695, %v7016_v18  ;;  %v1853_v12 = vpop.f32.mrb[28].mxu0  ;;  %v7029_v41 = vmul.f32 %v6578_v22, %v7018_v10 }
 0x204   : > { %v7033_v58 = vmul.f32 %v6583_v24, %v7018_v10  ;;  %v5363_v60 = vpop.eup %5362  ;;  %v2618_v27 = vmul.f32 %v5359_v51, %v6873_v53  ;;  %5380 = vrcp.f32 %v2433_v4  ;;  %v4695_v3 = vmul.f32 -1.442695, %v7022_v15  ;;  %v1855_v32 = vpop.f32.mrb[29].mxu0 }
 0x205   : > { %2879 = vmatmul.mubr.bf16.gmra.mrb[44].mxu1 %v2674_v13  ;;  %v4997_v31 = vadd.f32 %v1853_v12, %v6493_v45  ;;  %v5365_v7 = vpop.eup %5364  ;;  %v2619_v37 = vmul.f32 %v5361_v42, %v6877_v63  ;;  %v2620_v55 = vmul.f32 %v5363_v60, %v6884_v56  ;;  %5382 = vpow2.f32 %v4692_v59  ;;  %v1857_v1 = vpop.f32.mrb[30].mxu0 }
 0x206   : > { %v4998_v54 = vadd.f32 %v1855_v32, %v6495_v46  ;;  %v5367_v28 = vpop.eup %5366  ;;  %v2621_v10 = vmul.f32 %v5365_v7, %v6890_v61  ;;  %5384 = vpow2.f32 %v4693_v52  ;;  %v4999_v51 = vadd.f32 %v1857_v1, %v6497_v47  ;;  %v1859_v4 = vpop.f32.mrb[31].mxu0 }
 0x207   : > { %v2110_v53 = vadd.f32 %v4997_v31, %v6752_v43  ;;  %v5369_v45 = vpop.eup %5368  ;;  %v2434_v13 = vadd.f32 1.0, %v5367_v28  ;;  %5386 = vpow2.f32 %v4694_v36  ;;  %v5000_v56 = vadd.f32 %v1859_v4, %v6499_v48 }
 0x208   : > { %v2111_v63 = vadd.f32 %v4998_v54, %v6756_v2  ;;  %v5371_v59 = vpop.eup %5370  ;;  %v2677_v42 = vpack.c.bf16 %v2621_v10, %v2619_v37  ;;  %v2435_v46 = vadd.f32 1.0, %v5369_v45  ;;  %5388 = vpow2.f32 %v4695_v3 }
 0x209   : > { %v7047_v12 = vadd.f32 %v6607_v35, %v2110_v53  ;;  %v5373_v61 = vpop.eup %5372  ;;  %5390 = vrcp.f32 %v2434_v13  ;;  %v2436_v43 = vadd.f32 1.0, %v5371_v59  ;;  %v2112_v52 = vadd.f32 %v4999_v51, %v6766_v0  ;;  %v8534_v59 = vld [vmem:[#allocation8_spill] sm:$0xff] }
 0x20a   : > { %v7050_v47 = vadd.f32 %v6612_v38, %v2111_v63  ;;  %5392 = vrcp.f32 %v2435_v46  ;;  %v2437_v36 = vadd.f32 1.0, %v5373_v61  ;;  %v2113_v48 = vadd.f32 %v5000_v56, %v6770_v30  ;;  %4745 = vmatprep.mubr.msk.bf16.mxu1 %vm2781_vm5, %v2677_v42 }
 0x20b   : > { %v4696_v2 = vmul.f32 -1.442695, %v7047_v12  ;;  %v5375_v10 = vpop.eup %5374  ;;  %5394 = vrcp.f32 %v2436_v43  ;;  %v7058_v3 = vadd.f32 %v6607_v35, %v2112_v52  ;;  %v2676_v31 = vpack.c.bf16 %v2620_v55, %v2618_v27  ;;  %v1863_v32 = vpop.f32.mrb[32].mxu0 }
 0x20c   : > { %v4697_v60 = vmul.f32 -1.442695, %v7050_v47  ;;  %v5377_v7 = vpop.eup %5376  ;;  %v2622_v0 = vmul.f32 %v5375_v10, %v6921_v29  ;;  %5396 = vrcp.f32 %v2437_v36  ;;  %v7062_v37 = vadd.f32 %v6612_v38, %v2113_v48  ;;  %v1865_v54 = vpop.f32.mrb[33].mxu0 }
 0x20d   : > { %v5001_v30 = vadd.f32 %v1863_v32, %v6501_v49  ;;  %v5379_v1 = vpop.eup %5378  ;;  %v2623_v28 = vmul.f32 %v5377_v7, %v6924_v39  ;;  %5398 = vpow2.f32 %v4696_v2  ;;  %v4698_v53 = vmul.f32 -1.442695, %v7058_v3  ;;  %2887 = vmatmul.mubr.bf16.gmra.mrb[48].mxu1 %v2676_v31  ;;  %v1867_v55 = vpop.f32.mrb[34].mxu0  ;;  %v8533_v39 = vld [vmem:[#allocation61_spill] sm:$0xff]  ;;  %v8537_v32 = vld [vmem:[#allocation63_spill] sm:$0xff] }
 0x20e   : > { %v5002_v27 = vadd.f32 %v1865_v54, %v6503_v50  ;;  %v5381_v51 = vpop.eup %5380  ;;  %v2624_v29 = vmul.f32 %v5379_v1, %v6933_v5  ;;  %5400 = vpow2.f32 %v4697_v60  ;;  %v4699_v4 = vmul.f32 -1.442695, %v7062_v37  ;;  %v1869_v49 = vpop.f32.mrb[35].mxu0  ;;  %v8535_v5 = vld [vmem:[#allocation9_spill] sm:$0xff] }
 0x20f   : > { %v2114_v45 = vadd.f32 %v5001_v30, %v6777_v62  ;;  %v5383_v13 = vpop.eup %5382  ;;  %v2625_v63 = vmul.f32 %v5381_v51, %v6937_v34  ;;  %5402 = vpow2.f32 %v4698_v53  ;;  %v5003_v42 = vadd.f32 %v1867_v55, %v8534_v59  ;;  %v8536_v34 = vld [vmem:[#allocation62_spill] sm:$0xff] }
 0x210   : > { %v2115_v56 = vadd.f32 %v5002_v27, %v8533_v39  ;;  %v5385_v46 = vpop.eup %5384  ;;  %v2438_v50 = vadd.f32 1.0, %v5383_v13  ;;  %5404 = vpow2.f32 %v4699_v4  ;;  %v5004_v43 = vadd.f32 %v1869_v49, %v8535_v5  ;;  %v8538_v39 = vld [vmem:[#allocation10_spill] sm:$0xff] }
 0x211   : > { %v7075_v61 = vadd.f32 %v6607_v35, %v2114_v45  ;;  %v5387_v52 = vpop.eup %5386  ;;  %v2679_v36 = vpack.c.bf16 %v2625_v63, %v2623_v28  ;;  %v2439_v62 = vadd.f32 1.0, %v5385_v46  ;;  %v2116_v48 = vadd.f32 %v5003_v42, %v8536_v34 }
 0x212   : > { %v7079_v2 = vadd.f32 %v6612_v38, %v2115_v56  ;;  %v5389_v10 = vpop.eup %5388  ;;  %5406 = vrcp.f32 %v2438_v50  ;;  %v2440_v60 = vadd.f32 1.0, %v5387_v52  ;;  %v2117_v7 = vadd.f32 %v5004_v43, %v8537_v32  ;;  %v8539_v50 = vld [vmem:[#allocation11_spill] sm:$0xff] }
 0x213   : > { %v4700_v31 = vmul.f32 -1.442695, %v7075_v61  ;;  %v5391_v30 = vpop.eup %5390  ;;  %5408 = vrcp.f32 %v2439_v62  ;;  %v2441_v54 = vadd.f32 1.0, %v5389_v10  ;;  %v7086_v28 = vadd.f32 %v6607_v35, %v2116_v48  ;;  %4746 = vmatprep.mubr.msk.bf16.mxu1 %vm2781_vm5, %v2679_v36  ;;  %v1873_v53 = vpop.f32.mrb[36].mxu0  ;;  %v8541_v36 = vld [vmem:[#allocation12_spill] sm:$0xff]  ;;  %v8542_v10 = vld [vmem:[#allocation65_spill] sm:$0xff] }
 0x214   : > { %v4701_v1 = vmul.f32 -1.442695, %v7079_v2  ;;  %v5393_v27 = vpop.eup %5392  ;;  %v2626_v55 = vmul.f32 %v5391_v30, %v6960_v11  ;;  %5410 = vrcp.f32 %v2440_v60  ;;  %v7091_v51 = vadd.f32 %v6612_v38, %v2117_v7  ;;  %v1875_v45 = vpop.f32.mrb[37].mxu0  ;;  %v8543_v60 = vld [vmem:[#allocation13_spill] sm:$0xff] }
 0x215   : > { %v2678_v4 = vpack.c.bf16 %v2624_v29, %v2622_v0  ;;  %v5395_v49 = vpop.eup %5394  ;;  %v2627_v13 = vmul.f32 %v5393_v27, %v6964_v17  ;;  %5412 = vrcp.f32 %v2441_v54  ;;  %v4702_v63 = vmul.f32 -1.442695, %v7086_v28  ;;  %v1877_v59 = vpop.f32.mrb[38].mxu0  ;;  %v8540_v17 = vld [vmem:[#allocation64_spill] sm:$0xff]  ;;  %v8544_v27 = vld [vmem:[#allocation67_spill] sm:$0xff] }
 0x216   : > { %v5005_v56 = vadd.f32 %v1873_v53, %v8538_v39  ;;  %v5397_v42 = vpop.eup %5396  ;;  %v2628_v46 = vmul.f32 %v5395_v49, %v6973_v25  ;;  %5414 = vpow2.f32 %v4700_v31  ;;  %v4703_v11 = vmul.f32 -1.442695, %v7091_v51  ;;  %v1879_v0 = vpop.f32.mrb[39].mxu0 }
 0x217   : > { %2895 = vmatmul.mubr.bf16.gmra.mrb[52].mxu1 %v2678_v4  ;;  %v5006_v5 = vadd.f32 %v1875_v45, %v8539_v50  ;;  %v5399_v29 = vpop.eup %5398  ;;  %v2629_v43 = vmul.f32 %v5397_v42, %v6986_v9  ;;  %5416 = vpow2.f32 %v4701_v1  ;;  %v5007_v62 = vadd.f32 %v1877_v59, %v8541_v36 }
 0x218   : > { %v2118_v52 = vadd.f32 %v5005_v56, %v8540_v17  ;;  %v5401_v34 = vpop.eup %5400  ;;  %v2442_v48 = vadd.f32 1.0, %v5399_v29  ;;  %5418 = vpow2.f32 %v4702_v63  ;;  %v5008_v31 = vadd.f32 %v1879_v0, %v8543_v60  ;;  %v8545_v63 = vld [vmem:[#allocation69_spill] sm:$0xff]  ;;  %v8548_v60 = vld [vmem:[#allocation71_spill] sm:$0xff] }
 0x219   : > { %v2119_v25 = vadd.f32 %v5006_v5, %v8542_v10  ;;  %v5403_v32 = vpop.eup %5402  ;;  %v2681_v7 = vpack.c.bf16 %v2629_v43, %v2627_v13  ;;  %v2443_v30 = vadd.f32 1.0, %v5401_v34  ;;  %5420 = vpow2.f32 %v4703_v11  ;;  %v8546_v43 = vld [vmem:[#allocation14_spill] sm:$0xff] }
 0x21a   : > { %v7105_v54 = vadd.f32 %v6607_v35, %v2118_v52  ;;  %v5405_v9 = vpop.eup %5404  ;;  %5422 = vrcp.f32 %v2442_v48  ;;  %v2444_v1 = vadd.f32 1.0, %v5403_v32  ;;  %v2120_v4 = vadd.f32 %v5007_v62, %v8544_v27  ;;  %v8547_v48 = vld [vmem:[#allocation15_spill] sm:$0xff] }
 0x21b   : > { %v7108_v53 = vadd.f32 %v6612_v38, %v2119_v25  ;;  %5424 = vrcp.f32 %v2443_v30  ;;  %v2445_v45 = vadd.f32 1.0, %v5405_v9  ;;  %v2121_v39 = vadd.f32 %v5008_v31, %v8545_v63  ;;  %4747 = vmatprep.mubr.msk.bf16.mxu1 %vm2781_vm5, %v2681_v7  ;;  %v1883_v13 = vpop.f32.mrb[40].mxu0  ;;  %v8550_v9 = vld [vmem:[#allocation16_spill] sm:$0xff] }
 0x21c   : > { %v4704_v49 = vmul.f32 -1.442695, %v7105_v54  ;;  %v5407_v56 = vpop.eup %5406  ;;  %5426 = vrcp.f32 %v2444_v1  ;;  %v7116_v42 = vadd.f32 %v6607_v35, %v2120_v4  ;;  %v2680_v11 = vpack.c.bf16 %v2628_v46, %v2626_v55  ;;  %v1885_v50 = vpop.f32.mrb[41].mxu0 }
 0x21d   : > { %v4705_v59 = vmul.f32 -1.442695, %v7108_v53  ;;  %v5409_v5 = vpop.eup %5408  ;;  %v2630_v0 = vmul.f32 %v5407_v56, %v7007_v21  ;;  %5428 = vrcp.f32 %v2445_v45  ;;  %v7120_v29 = vadd.f32 %v6612_v38, %v2121_v39  ;;  %v1887_v52 = vpop.f32.mrb[42].mxu0 }
 0x21e   : > { %v5009_v17 = vadd.f32 %v1883_v13, %v8546_v43  ;;  %v5411_v36 = vpop.eup %5410  ;;  %v2631_v62 = vmul.f32 %v5409_v5, %v7011_v14  ;;  %5430 = vpow2.f32 %v4704_v49  ;;  %v4706_v34 = vmul.f32 -1.442695, %v7116_v42  ;;  %v1889_v46 = vpop.f32.mrb[43].mxu0  ;;  %v8549_v14 = vld [vmem:[#allocation73_spill] sm:$0xff]  ;;  %v8553_v43 = vld [vmem:[#allocation75_spill] sm:$0xff] }
 0x21f   : > { %2903 = vmatmul.mubr.bf16.gmra.mrb[56].mxu1 %v2680_v11  ;;  %v5010_v55 = vadd.f32 %v1885_v50, %v8547_v48  ;;  %v5413_v10 = vpop.eup %5412  ;;  %v2632_v21 = vmul.f32 %v5411_v36, %v7016_v18  ;;  %5432 = vpow2.f32 %v4705_v59  ;;  %v4707_v25 = vmul.f32 -1.442695, %v7120_v29  ;;  %v8551_v18 = vld [vmem:[#allocation17_spill] sm:$0xff] }
 0x220   : > { %v2122_v31 = vadd.f32 %v5009_v17, %v8548_v60  ;;  %v5415_v32 = vpop.eup %5414  ;;  %v2633_v7 = vmul.f32 %v5413_v10, %v7022_v15  ;;  %5434 = vpow2.f32 %v4706_v34  ;;  %v5011_v1 = vadd.f32 %v1887_v52, %v8550_v9  ;;  %v8552_v15 = vld [vmem:[#allocation74_spill] sm:$0xff]  ;;  %v8555_v9 = vld [vmem:[#allocation19_spill] sm:$0xff] }
 0x221   : > { %v2123_v30 = vadd.f32 %v5010_v55, %v8549_v14  ;;  %v5417_v27 = vpop.eup %5416  ;;  %v2446_v4 = vadd.f32 1.0, %v5415_v32  ;;  %5436 = vpow2.f32 %v4707_v25  ;;  %v5012_v49 = vadd.f32 %v1889_v46, %v8551_v18  ;;  %v8554_v60 = vld [vmem:[#allocation18_spill] sm:$0xff] }
 0x222   : > { %v7133_v45 = vadd.f32 %v6607_v35, %v2122_v31  ;;  %v5419_v63 = vpop.eup %5418  ;;  %v2683_v39 = vpack.c.bf16 %v2633_v7, %v2631_v62  ;;  %v2447_v13 = vadd.f32 1.0, %v5417_v27  ;;  %v2124_v59 = vadd.f32 %v5011_v1, %v8552_v15 }
 0x223   : > { %v7137_v56 = vadd.f32 %v6612_v38, %v2123_v30  ;;  %v5421_v11 = vpop.eup %5420  ;;  %5438 = vrcp.f32 %v2446_v4  ;;  %v2448_v50 = vadd.f32 1.0, %v5419_v63  ;;  %v2125_v17 = vadd.f32 %v5012_v49, %v8553_v43  ;;  %v1893_v52 = vpop.f32.mrb[44].mxu0  ;;  %v8556_v49 = vld [vmem:[#allocation76_spill] sm:$0xff] }
 0x224   : > { %v4708_v5 = vmul.f32 -1.442695, %v7133_v45  ;;  %v5423_v36 = vpop.eup %5422  ;;  %5440 = vrcp.f32 %v2447_v13  ;;  %v2449_v34 = vadd.f32 1.0, %v5421_v11  ;;  %v7144_v62 = vadd.f32 %v6607_v35, %v2124_v59  ;;  %4748 = vmatprep.mubr.msk.bf16.mxu1 %vm2781_vm5, %v2683_v39  ;;  %v1895_v55 = vpop.f32.mrb[45].mxu0  ;;  %v8559_v59 = vld [vmem:[#allocation21_spill] sm:$0xff] }
 0x225   : > { %v4709_v48 = vmul.f32 -1.442695, %v7137_v56  ;;  %v5425_v46 = vpop.eup %5424  ;;  %5442 = vrcp.f32 %v2448_v50  ;;  %v7148_v10 = vadd.f32 %v6612_v38, %v2125_v17  ;;  %v2682_v25 = vpack.c.bf16 %v2632_v21, %v2630_v0  ;;  %v1897_v32 = vpop.f32.mrb[46].mxu0  ;;  %v8557_v0 = vld [vmem:[#allocation20_spill] sm:$0xff]  ;;  %v8560_v17 = vld [vmem:[#allocation78_spill] sm:$0xff] }
 0x226   : > { %v5013_v31 = vadd.f32 %v1893_v52, %v8554_v60  ;;  %v5427_v7 = vpop.eup %5426  ;;  %v2635_v14 = vmul.f32 %v5425_v46, %v7050_v47  ;;  %5444 = vrcp.f32 %v2449_v34  ;;  %v4710_v30 = vmul.f32 -1.442695, %v7144_v62  ;;  %v1899_v27 = vpop.f32.mrb[47].mxu0  ;;  %v8558_v47 = vld [vmem:[#allocation77_spill] sm:$0xff] }
 0x227   : > { %v5014_v1 = vadd.f32 %v1895_v55, %v8555_v9  ;;  %v5429_v4 = vpop.eup %5428  ;;  %5446 = vpow2.f32 %v4708_v5  ;;  %v4711_v18 = vmul.f32 -1.442695, %v7148_v10  ;;  %2911 = vmatmul.mubr.bf16.gmra.mrb[60].mxu1 %v2682_v25  ;;  %v5015_v21 = vadd.f32 %v1897_v32, %v8557_v0 }
 0x228   : > { %v2126_v63 = vadd.f32 %v5013_v31, %v8556_v49  ;;  %v5431_v39 = vpop.eup %5430  ;;  %v2637_v13 = vmul.f32 %v5429_v4, %v7062_v37  ;;  %5448 = vpow2.f32 %v4709_v48  ;;  %v5016_v11 = vadd.f32 %v1899_v27, %v8559_v59  ;;  %v8561_v37 = vld [vmem:[#allocation80_spill] sm:$0xff]  ;;  %v8563_v59 = vld [vmem:[#allocation23_spill] sm:$0xff] }
 0x229   : > { %v2127_v15 = vadd.f32 %v5014_v1, %v8558_v47  ;;  %v5433_v50 = vpop.eup %5432  ;;  %v2450_v43 = vadd.f32 1.0, %v5431_v39  ;;  %5450 = vpow2.f32 %v4710_v30  ;;  %v2128_v52 = vadd.f32 %v5015_v21, %v8560_v17 }
 0x22a   : > { %v7161_v5 = vadd.f32 %v6607_v35, %v2126_v63  ;;  %v5435_v34 = vpop.eup %5434  ;;  %v2451_v55 = vadd.f32 1.0, %v5433_v50  ;;  %5452 = vpow2.f32 %v4711_v18  ;;  %v2129_v48 = vadd.f32 %v5016_v11, %v8561_v37  ;;  %v8562_v63 = vld [vmem:[#allocation22_spill] sm:$0xff]  ;;  %v8565_v37 = vld [vmem:[#allocation83_spill] sm:$0xff] }
 0x22b   : > { %v7165_v46 = vadd.f32 %v6612_v38, %v2127_v15  ;;  %v5437_v25 = vpop.eup %5436  ;;  %5454 = vrcp.f32 %v2450_v43  ;;  %v2452_v60 = vadd.f32 1.0, %v5435_v34  ;;  %v7170_v32 = vadd.f32 %v6607_v35, %v2128_v52  ;;  %v1903_v30 = vpop.f32.mrb[48].mxu0  ;;  %v8564_v34 = vld [vmem:[#allocation82_spill] sm:$0xff] }
 0x22c   : > { %v4712_v31 = vmul.f32 -1.442695, %v7161_v5  ;;  %5456 = vrcp.f32 %v2451_v55  ;;  %v2453_v9 = vadd.f32 1.0, %v5437_v25  ;;  %v7174_v27 = vadd.f32 %v6612_v38, %v2129_v48  ;;  %v1905_v4 = vpop.f32.mrb[49].mxu0  ;;  %v8566_v25 = vld [vmem:[#allocation24_spill] sm:$0xff] }
 0x22d   : > { %v4713_v1 = vmul.f32 -1.442695, %v7165_v46  ;;  %v5439_v18 = vpop.eup %5438  ;;  %5458 = vrcp.f32 %v2452_v60  ;;  %v4714_v49 = vmul.f32 -1.442695, %v7170_v32  ;;  %v5017_v0 = vadd.f32 %v1903_v30, %v8562_v63  ;;  %v1907_v39 = vpop.f32.mrb[50].mxu0  ;;  %v8567_v30 = vld [vmem:[#allocation26_spill] sm:$0xff] }
 0x22e   : > { %v2685_v21 = vpack.c.bf16 %v2637_v13, %v2635_v14  ;;  %v5441_v47 = vpop.eup %5440  ;;  %5460 = vrcp.f32 %v2453_v9  ;;  %v4715_v15 = vmul.f32 -1.442695, %v7174_v27  ;;  %v5018_v11 = vadd.f32 %v1905_v4, %v8563_v59  ;;  %v1909_v43 = vpop.f32.mrb[51].mxu0 }
 0x22f   : > { %v2634_v50 = vmul.f32 %v5423_v36, %v7047_v12  ;;  %v5443_v17 = vpop.eup %5442  ;;  %v2639_v52 = vmul.f32 %v5441_v47, %v7079_v2  ;;  %5462 = vpow2.f32 %v4712_v31  ;;  %v2130_v55 = vadd.f32 %v5017_v0, %v8564_v34  ;;  %v8569_v47 = vld [vmem:[#allocation85_spill] sm:$0xff] }
 0x230   : > { %4749 = vmatprep.mubr.msk.bf16.mxu1 %vm2781_vm5, %v2685_v21  ;;  %v2636_v14 = vmul.f32 %v5427_v7, %v7058_v3  ;;  %v5445_v13 = vpop.eup %5444  ;;  %5464 = vpow2.f32 %v4713_v1  ;;  %v2131_v48 = vadd.f32 %v5018_v11, %v8565_v37  ;;  %v5019_v60 = vadd.f32 %v1907_v39, %v8566_v25  ;;  %v8568_v7 = vld [vmem:[#allocation84_spill] sm:$0xff]  ;;  %v8570_v37 = vld [vmem:[#allocation30_spill] sm:$0xff] }
 0x231   : > { %v5020_v9 = vadd.f32 %v1909_v43, %v8567_v30  ;;  %v5447_v12 = vpop.eup %5446  ;;  %v2641_v36 = vmul.f32 %v5445_v13, %v7091_v51  ;;  %5466 = vpow2.f32 %v4714_v49  ;;  %v7190_v2 = vadd.f32 %v6607_v35, %v2130_v55  ;;  %v8571_v30 = vld [vmem:[#allocation31_spill] sm:$0xff] }
 0x232   : > { %v2684_v31 = vpack.c.bf16 %v2636_v14, %v2634_v50  ;;  %v5449_v4 = vpop.eup %5448  ;;  %v2454_v63 = vadd.f32 1.0, %v5447_v12  ;;  %5468 = vpow2.f32 %v4715_v15  ;;  %v7193_v3 = vadd.f32 %v6612_v38, %v2131_v48 }
 0x233   : > { %v2132_v1 = vadd.f32 %v5019_v60, %v8568_v7  ;;  %v5451_v0 = vpop.eup %5450  ;;  %v2455_v21 = vadd.f32 1.0, %v5449_v4  ;;  %v4716_v39 = vmul.f32 -1.442695, %v7190_v2  ;;  %v2133_v51 = vadd.f32 %v5020_v9, %v8569_v47  ;;  %v1913_v49 = vpop.f32.mrb[52].mxu0  ;;  %v8572_v7 = vld [vmem:[#allocation86_spill] sm:$0xff] }
 0x234   : > { %2919 = vmatmul.mubr.bf16.gmra.mrb[64].mxu1 %v2684_v31  ;;  %v2687_v59 = vpack.c.bf16 %v2641_v36, %v2639_v52  ;;  %v5453_v11 = vpop.eup %5452  ;;  %5470 = vrcp.f32 %v2454_v63  ;;  %v2456_v50 = vadd.f32 1.0, %v5451_v0  ;;  %v4717_v43 = vmul.f32 -1.442695, %v7193_v3  ;;  %v1915_v34 = vpop.f32.mrb[53].mxu0 }
 0x235   : > { %v7200_v15 = vadd.f32 %v6607_v35, %v2132_v1  ;;  %v7202_v55 = vpop.eup %5454  ;;  %5472 = vrcp.f32 %v2455_v21  ;;  %v2457_v14 = vadd.f32 1.0, %v5453_v11  ;;  %v7205_v13 = vadd.f32 %v6612_v38, %v2133_v51  ;;  %v1917_v52 = vpop.f32.mrb[54].mxu0  ;;  %v8573_v51 = vld [vmem:[#allocation34_spill] sm:$0xff] }
 0x236   : > { %v5021_v48 = vadd.f32 %v1913_v49, %v8570_v37  ;;  %4750 = vmatprep.mubr.msk.bf16.mxu1 %vm2781_vm5, %v2687_v59  ;;  %v5457_v25 = vpop.eup %5456  ;;  %5474 = vrcp.f32 %v2456_v50  ;;  %v5022_v9 = vadd.f32 %v1915_v34, %v8571_v30  ;;  %v2638_v12 = vmul.f32 %v5439_v18, %v7075_v61  ;;  %v1919_v36 = vpop.f32.mrb[55].mxu0 }
 0x237   : > { %v4718_v60 = vmul.f32 -1.442695, %v7200_v15  ;;  %v5459_v31 = vpop.eup %5458  ;;  %v2643_v4 = vmul.f32 %v5457_v25, %v7108_v53  ;;  %5476 = vrcp.f32 %v2457_v14  ;;  %v4719_v63 = vmul.f32 -1.442695, %v7205_v13  ;;  %v8574_v53 = vld [vmem:[#allocation36_spill] sm:$0xff]  ;;  %v7230_v30 = vpop.xlane.xlu1 %818 }
 0x238   : > { %v2134_v1 = vadd.f32 %v5021_v48, %v8572_v7  ;;  %v5461_v0 = vpop.eup %5460  ;;  %5478 = vpow2.f32 %v4716_v39  ;;  %v2135_v21 = vadd.f32 %v5022_v9, %v6941_v33  ;;  %v2640_v47 = vmul.f32 %v5443_v17, %v7086_v28 }
 0x239   : > { %v5023_v49 = vadd.f32 %v1917_v52, %v8573_v51  ;;  %v5463_v59 = vpop.eup %5462  ;;  %v2645_v61 = vmul.f32 %v5461_v0, %v7120_v29  ;;  %5480 = vpow2.f32 %v4717_v43  ;;  %v5024_v11 = vadd.f32 %v1919_v36, %v8574_v53  ;;  %v8575_v36 = vld [vmem:[#allocation43_spill] sm:$0xff] }
 0x23a   : > { %v7220_v18 = vadd.f32 %v6607_v35, %v2134_v1  ;;  %v5465_v50 = vpop.eup %5464  ;;  %v2458_v34 = vadd.f32 1.0, %v5463_v59  ;;  %5482 = vpow2.f32 %v4718_v60  ;;  %v7224_v39 = vadd.f32 %v6612_v38, %v2135_v21  ;;  %v8576_v21 = vld [vmem:[#allocation44_spill] sm:$0xff] }
 0x23b   : > { %v2686_v33 = vpack.c.bf16 %v2640_v47, %v2638_v12  ;;  %v5467_v14 = vpop.eup %5466  ;;  %v2459_v28 = vadd.f32 1.0, %v5465_v50  ;;  %5484 = vpow2.f32 %v4719_v63  ;;  %v2136_v29 = vadd.f32 %v5023_v49, %v6945_v6  ;;  %v1923_v43 = vpop.f32.mrb[56].mxu0 }
 0x23c   : > { %v4720_v17 = vmul.f32 -1.442695, %v7220_v18  ;;  %v5469_v37 = vpop.eup %5468  ;;  %5486 = vrcp.f32 %v2458_v34  ;;  %v2460_v48 = vadd.f32 1.0, %v5467_v14  ;;  %v4721_v52 = vmul.f32 -1.442695, %v7224_v39  ;;  %v1925_v60 = vpop.f32.mrb[57].mxu0 }
 0x23d   : > { %2927 = vmatmul.mubr.bf16.gmra.mrb[68].mxu1 %v2686_v33  ;;  %v2137_v25 = vadd.f32 %v5024_v11, %v6951_v26  ;;  %5488 = vrcp.f32 %v2459_v28  ;;  %v2461_v9 = vadd.f32 1.0, %v5469_v37  ;;  %v7233_v12 = vadd.f32 %v6607_v35, %v2136_v29  ;;  %v1927_v6 = vpop.f32.mrb[58].mxu0 }
 0x23e   : > { %v5025_v63 = vadd.f32 %v1923_v43, %v8575_v36  ;;  %v5471_v7 = vpop.eup %5470  ;;  %5490 = vrcp.f32 %v2460_v48  ;;  %v2689_v0 = vpack.c.bf16 %v2645_v61, %v2643_v4  ;;  %v5026_v47 = vadd.f32 %v1925_v60, %v8576_v21  ;;  %v1929_v26 = vpop.f32.mrb[59].mxu0 }
 0x23f   : > { %v7237_v1 = vadd.f32 %v6612_v38, %v2137_v25  ;;  %v5473_v51 = vpop.eup %5472  ;;  %5492 = vrcp.f32 %v2461_v9  ;;  %v4722_v49 = vmul.f32 -1.442695, %v7233_v12  ;;  %v7244_v53 = vmul.f32 %v6578_v22, %v7230_v30  ;;  %v8577_v22 = vld [vmem:[#allocation46_spill] sm:$0xff] }
 0x240   : > { %v2138_v59 = vadd.f32 %v5025_v63, %v6983_v57  ;;  %v5475_v11 = vpop.eup %5474  ;;  %5494 = vpow2.f32 %v4720_v17  ;;  %4751 = vmatprep.mubr.msk.bf16.mxu1 %vm2781_vm5, %v2689_v0  ;;  %v2139_v4 = vadd.f32 %v5026_v47, %v6990_v16  ;;  %v2642_v61 = vmul.f32 %v7202_v55, %v7105_v54  ;;  %v8578_v16 = vld [vmem:[#allocation48_spill] sm:$0xff] }
 0x241   : > { %v4723_v50 = vmul.f32 -1.442695, %v7237_v1  ;;  %v5477_v34 = vpop.eup %5476  ;;  %5496 = vpow2.f32 %v4721_v52  ;;  %v2644_v57 = vmul.f32 %v5459_v31, %v7116_v42  ;;  %v5027_v14 = vadd.f32 %v1927_v6, %v8577_v22 }
 0x242   : > { %v7252_v33 = vadd.f32 %v6607_v35, %v2138_v59  ;;  %v5479_v28 = vpop.eup %5478  ;;  %v2649_v17 = vmul.f32 %v5477_v34, %v7148_v10  ;;  %5498 = vpow2.f32 %v4722_v49  ;;  %v7258_v29 = vadd.f32 %v6612_v38, %v2139_v4 }
 0x243   : > { %v5028_v43 = vadd.f32 %v1929_v26, %v8578_v16  ;;  %v5481_v37 = vpop.eup %5480  ;;  %v2647_v54 = vmul.f32 %v5473_v51, %v7137_v56  ;;  %v2462_v55 = vadd.f32 1.0, %v5479_v28  ;;  %5500 = vpow2.f32 %v4723_v50  ;;  %v1933_v52 = vpop.f32.mrb[60].mxu0  ;;  %v8579_v56 = vld [vmem:[#allocation51_spill] sm:$0xff] }
 0x244   : > { %v2688_v48 = vpack.c.bf16 %v2644_v57, %v2642_v61  ;;  %v5483_v25 = vpop.eup %5482  ;;  %v2463_v42 = vadd.f32 1.0, %v5481_v37  ;;  %v4724_v31 = vmul.f32 -1.442695, %v7252_v33  ;;  %v4725_v60 = vmul.f32 -1.442695, %v7258_v29  ;;  %v1935_v9 = vpop.f32.mrb[61].mxu0 }
 0x245   : > { %v2140_v10 = vadd.f32 %v5027_v14, %v6994_v44  ;;  %v5485_v36 = vpop.eup %5484  ;;  %5502 = vrcp.f32 %v2462_v55  ;;  %v2464_v63 = vadd.f32 1.0, %v5483_v25  ;;  %v2141_v6 = vadd.f32 %v5028_v43, %v7000_v23  ;;  %v1937_v21 = vpop.f32.mrb[62].mxu0  ;;  %v8580_v61 = vld [vmem:[#allocation52_spill] sm:$0xff]  ;;  %v8581_v55 = vld [vmem:[#allocation55_spill] sm:$0xff] }
 0x246   : > { %2935 = vmatmul.mubr.bf16.gmra.mrb[72].mxu1 %v2688_v48  ;;  %v5029_v0 = vadd.f32 %v1933_v52, %v8579_v56  ;;  %v5487_v47 = vpop.eup %5486  ;;  %5504 = vrcp.f32 %v2463_v42  ;;  %v2465_v26 = vadd.f32 1.0, %v5485_v36  ;;  %v2691_v49 = vpack.c.bf16 %v2649_v17, %v2647_v54  ;;  %v1939_v59 = vpop.f32.mrb[63].mxu0 }
 0x247   : > { %v7268_v51 = vadd.f32 %v6607_v35, %v2140_v10  ;;  %v5489_v50 = vpop.eup %5488  ;;  %5506 = vrcp.f32 %v2464_v63  ;;  %v7271_v44 = vadd.f32 %v6612_v38, %v2141_v6  ;;  %v5030_v23 = vadd.f32 %v1935_v9, %v8580_v61 }
 0x248   : > { %v2142_v4 = vadd.f32 %v5029_v0, %v7029_v41  ;;  %v5491_v34 = vpop.eup %5490  ;;  %5508 = vrcp.f32 %v2465_v26  ;;  %4752 = vmatprep.mubr.msk.bf16.mxu1 %vm2781_vm5, %v2691_v49  ;;  %v2646_v22 = vmul.f32 %v5471_v7, %v7133_v45  ;;  %v2081_v14 = vmul.f32 %v6583_v24, %v7230_v30 }
 0x249   : > { %v4726_v57 = vmul.f32 -1.442695, %v7268_v51  ;;  %v5493_v28 = vpop.eup %5492  ;;  %5510 = vpow2.f32 %v4724_v31  ;;  %v4727_v17 = vmul.f32 -1.442695, %v7271_v44  ;;  %v2143_v41 = vadd.f32 %v5030_v23, %v7033_v58 }
 0x24a   : > { %v7282_v16 = vadd.f32 %v6607_v35, %v2142_v4  ;;  %v5495_v43 = vpop.eup %5494  ;;  %v2653_v37 = vmul.f32 %v5493_v28, %v7174_v27  ;;  %5512 = vpow2.f32 %v4725_v60  ;;  %v2648_v54 = vmul.f32 %v5475_v11, %v7144_v62  ;;  %v8582_v11 = vld [vmem:[#allocation56_spill] sm:$0xff] }
 0x24b   : > { %v5031_v45 = vadd.f32 %v1937_v21, %v8581_v55  ;;  %v5497_v7 = vpop.eup %5496  ;;  %v2651_v24 = vmul.f32 %v5489_v50, %v7165_v46  ;;  %v2466_v48 = vadd.f32 1.0, %v5495_v43  ;;  %5514 = vpow2.f32 %v4726_v57 }
 0x24c   : > { %v7290_v52 = vadd.f32 %v6612_v38, %v2143_v41  ;;  %v5499_v25 = vpop.eup %5498  ;;  %v2467_v42 = vadd.f32 1.0, %v5497_v7  ;;  %5516 = vpow2.f32 %v4727_v17  ;;  %v2690_v58 = vpack.c.bf16 %v2648_v54, %v2646_v22 }
 0x24d   : > { %v2144_v31 = vadd.f32 %v5031_v45, %v7244_v53  ;;  %v5501_v27 = vpop.eup %5500  ;;  %5518 = vrcp.f32 %v2466_v48  ;;  %v2468_v60 = vadd.f32 1.0, %v5499_v25  ;;  %v4728_v62 = vmul.f32 -1.442695, %v7282_v16 }
 0x24e   : > { %v5032_v10 = vadd.f32 %v1939_v59, %v8582_v11  ;;  %5520 = vrcp.f32 %v2467_v42  ;;  %v2469_v46 = vadd.f32 1.0, %v5501_v27  ;;  %2943 = vmatmul.mubr.bf16.gmra.mrb[76].mxu1 %v2690_v58  ;;  %v2693_v36 = vpack.c.bf16 %v2653_v37, %v2651_v24 }
 0x24f   : > { %v7296_v9 = vadd.f32 %v6607_v35, %v2144_v31  ;;  %v5503_v63 = vpop.eup %5502  ;;  %5522 = vrcp.f32 %v2468_v60  ;;  %v4729_v6 = vmul.f32 -1.442695, %v7290_v52  ;;  %v2650_v21 = vmul.f32 %v5487_v47, %v7161_v5 }
 0x250   : > { %v2145_v56 = vadd.f32 %v5032_v10, %v2081_v14  ;;  %v5505_v53 = vpop.eup %5504  ;;  %5524 = vrcp.f32 %v2469_v46  ;;  %4753 = vmatprep.mubr.msk.bf16.mxu1 %vm2781_vm5, %v2693_v36  ;;  %v2652_v26 = vmul.f32 %v5491_v34, %v7170_v32  ;;  %v2654_v4 = vmul.f32 %v5503_v63, %v7190_v2 }
 0x251   : > { %v4730_v0 = vmul.f32 -1.442695, %v7296_v9  ;;  %v5507_v49 = vpop.eup %5506  ;;  %5526 = vpow2.f32 %v4728_v62  ;;  %v2655_v57 = vmul.f32 %v5505_v53, %v7193_v3 }
 0x252   : > { %v5509_v35 = vpop.eup %5508  ;;  %v7304_v59 = vadd.f32 %v6612_v38, %v2145_v56  ;;  %v2692_v50 = vpack.c.bf16 %v2652_v26, %v2650_v21  ;;  %v2656_v61 = vmul.f32 %v5507_v49, %v7200_v15  ;;  %5528 = vpow2.f32 %v4729_v6 }
 0x253   : > { %v5511_v23 = vpop.eup %5510  ;;  %v2657_v22 = vmul.f32 %v5509_v35, %v7205_v13  ;;  %5530 = vpow2.f32 %v4730_v0  ;;  %v7330_v35 = vld [vmem:[%s8583_s28] ss:$0 sm:$0xff] }
 0x254   : > { %v5513_v5 = vpop.eup %5512  ;;  %v2470_v47 = vadd.f32 1.0, %v5511_v23  ;;  %v2694_v32 = vpack.c.bf16 %v2656_v61, %v2654_v4  ;;  %v4731_v2 = vmul.f32 -1.442695, %v7304_v59 }
 0x255   : > { %v5515_v34 = vpop.eup %5514  ;;  %v2471_v14 = vadd.f32 1.0, %v5513_v5  ;;  %v2695_v28 = vpack.c.bf16 %v2657_v22, %v2655_v57 }
 0x256   : > { %v5517_v38 = vpop.eup %5516  ;;  %5532 = vrcp.f32 %v2470_v47  ;;  %v2472_v17 = vadd.f32 1.0, %v5515_v34  ;;  %2951 = vmatmul.mubr.bf16.gmra.mrb[80].mxu1 %v2692_v50 }
 0x257   : > { %v5519_v15 = vpop.eup %5518  ;;  %5534 = vrcp.f32 %v2471_v14  ;;  %v2473_v41 = vadd.f32 1.0, %v5517_v38  ;;  %4754 = vmatprep.mubr.msk.bf16.mxu1 %vm2781_vm5, %v2695_v28 }
 0x258   : > { %v5521_v3 = vpop.eup %5520  ;;  %5536 = vrcp.f32 %v2472_v17  ;;  %v2658_v37 = vmul.f32 %v5519_v15, %v7220_v18 }
 0x259   : > { %v5523_v13 = vpop.eup %5522  ;;  %5538 = vrcp.f32 %v2473_v41  ;;  %v2659_v45 = vmul.f32 %v5521_v3, %v7224_v39 }
 0x25a   : > { %v5525_v43 = vpop.eup %5524  ;;  %5540 = vpow2.f32 %v4731_v2  ;;  %v2660_v54 = vmul.f32 %v5523_v13, %v7233_v12 }
 0x25b   : > { %v5527_v55 = vpop.eup %5526  ;;  %v2661_v7 = vmul.f32 %v5525_v43, %v7237_v1 }
 0x25c   : > { %v2474_v24 = vadd.f32 1.0, %v5527_v55  ;;  %v2696_v48 = vpack.c.bf16 %v2660_v54, %v2658_v37  ;;  %v5529_v25 = vpop.eup %5528 }
 0x25d   : > { %v2697_v42 = vpack.c.bf16 %v2661_v7, %v2659_v45  ;;  %v5531_v58 = vpop.eup %5530  ;;  %v2475_v18 = vadd.f32 1.0, %v5529_v25 }
 0x25e   : > { %2959 = vmatmul.mubr.bf16.gmra.mrb[84].mxu1 %v2694_v32  ;;  %5542 = vrcp.f32 %v2474_v24  ;;  %v2476_v31 = vadd.f32 1.0, %v5531_v58 }
 0x25f   : > { %4755 = vmatprep.mubr.msk.bf16.mxu1 %vm2781_vm5, %v2697_v42 }
 0x260   : > { %v5533_v27 = vpop.eup %5532  ;;  %5544 = vrcp.f32 %v2476_v31 }
 0x261   : > { %v5535_v60 = vpop.eup %5534  ;;  %v2662_v39 = vmul.f32 %v5533_v27, %v7252_v33  ;;  %5546 = vrcp.f32 %v2475_v18 }
 0x262   : > { %v5537_v12 = vpop.eup %5536  ;;  %v2663_v10 = vmul.f32 %v5535_v60, %v7258_v29 }
 0x263   : > { %v5539_v62 = vpop.eup %5538  ;;  %v2664_v1 = vmul.f32 %v5537_v12, %v7268_v51 }
 0x264   : > { %v5541_v11 = vpop.eup %5540  ;;  %v2665_v46 = vmul.f32 %v5539_v62, %v7271_v44 }
 0x265   : > { %v2477_v36 = vadd.f32 1.0, %v5541_v11  ;;  %v2698_v63 = vpack.c.bf16 %v2664_v1, %v2662_v39 }
 0x266   : > { %2967 = vmatmul.mubr.bf16.gmra.mrb[88].mxu1 %v2696_v48  ;;  %v2699_v6 = vpack.c.bf16 %v2665_v46, %v2663_v10 }
 0x267   : > { %5548 = vrcp.f32 %v2477_v36 }
 0x268   : > { %4756 = vmatprep.mubr.msk.bf16.mxu1 %vm2781_vm5, %v2699_v6  ;;  %v5543_v56 = vpop.eup %5542 }
 0x269   : > { %v2666_v0 = vmul.f32 %v5543_v56, %v7282_v16 }
 0x26a   : > { %v5545_v53 = vpop.eup %5544 }
 0x26b   : > { %v2668_v33 = vmul.f32 %v5545_v53, %v7296_v9  ;;  %v5547_v21 = vpop.eup %5546 }
 0x26c   : > { %v2667_v44 = vmul.f32 %v5547_v21, %v7290_v52 }
 0x26d   : > { %v2700_v51 = vpack.c.bf16 %v2668_v33, %v2666_v0 }
 0x26e   : > { %2975 = vmatmul.mubr.bf16.gmra.mrb[92].mxu1 %v2698_v63 }
 0x271   : > { %v5549_v29 = vpop.eup %5548 }
 0x272   : > { %v2669_v26 = vmul.f32 %v5549_v29, %v7304_v59 }
 0x274   : > { %v2701_v49 = vpack.c.bf16 %v2669_v26, %v2667_v44 }
 0x276   : > { %4757 = vmatprep.mubr.msk.bf16.mxu1 %vm2781_vm5, %v2701_v49 }
 0x277   : > { %2983 = vmatmul.mubr.bf16.gmra.mrb[96].mxu1 %v2700_v51 }
 0x2c5   : > { %v2864_v16 = vpop.f32.mrb[36].mxu1 }
 0x2c6   : > { %v2865_v9 = vadd.f32 %v7330_v35, %v2864_v16  ;;  %v2866_v50 = vpop.f32.mrb[37].mxu1 }
 0x2c7   : > { %v2867_v4 = vpop.f32.mrb[38].mxu1 }
 0x2c8   : > { %v4758_v61 = vmul.f32 -1.442695, %v2865_v9  ;;  %v2868_v23 = vadd.f32 %v7330_v35, %v2867_v4  ;;  %v2869_v52 = vpop.f32.mrb[39].mxu1 }
 0x2ca   : > { %5550 = vpow2.f32 %v4758_v61  ;;  %v4759_v59 = vmul.f32 -1.442695, %v2868_v23 }
 0x2cc   : > { %5552 = vpow2.f32 %v4759_v59 }
 0x2cf   : > { %v2872_v57 = vpop.f32.mrb[40].mxu1 }
 0x2d0   : > { %v7335_v22 = vadd.f32 %v7330_v35, %v2872_v57  ;;  %v2874_v5 = vpop.f32.mrb[41].mxu1 }
 0x2d1   : > { %v2875_v47 = vpop.f32.mrb[42].mxu1 }
 0x2d2   : > { %v4760_v32 = vmul.f32 -1.442695, %v7335_v22  ;;  %v2876_v34 = vadd.f32 %v7330_v35, %v2875_v47  ;;  %v2877_v14 = vpop.f32.mrb[43].mxu1 }
 0x2d4   : > { %v5551_v28 = vpop.eup %5550  ;;  %5554 = vpow2.f32 %v4760_v32  ;;  %v4761_v38 = vmul.f32 -1.442695, %v2876_v34 }
 0x2d5   : > { %v3087_v17 = vadd.f32 1.0, %v5551_v28 }
 0x2d6   : > { %v5553_v2 = vpop.eup %5552  ;;  %5556 = vpow2.f32 %v4761_v38 }
 0x2d7   : > { %5558 = vrcp.f32 %v3087_v17  ;;  %v3088_v15 = vadd.f32 1.0, %v5553_v2 }
 0x2d8   : > { %v2880_v41 = vpop.f32.mrb[44].mxu1 }
 0x2d9   : > { %v7340_v3 = vadd.f32 %v7330_v35, %v2880_v41  ;;  %v2882_v13 = vpop.f32.mrb[45].mxu1  ;;  %5560 = vrcp.f32 %v3088_v15 }
 0x2da   : > { %v2883_v43 = vpop.f32.mrb[46].mxu1 }
 0x2db   : > { %v4762_v37 = vmul.f32 -1.442695, %v7340_v3  ;;  %v7344_v54 = vadd.f32 %v7330_v35, %v2883_v43  ;;  %v2885_v55 = vpop.f32.mrb[47].mxu1 }
 0x2dd   : > { %5562 = vpow2.f32 %v4762_v37  ;;  %v4763_v45 = vmul.f32 -1.442695, %v7344_v54 }
 0x2de   : > { %v5555_v7 = vpop.eup %5554 }
 0x2df   : > { %5564 = vpow2.f32 %v4763_v45  ;;  %v3089_v24 = vadd.f32 1.0, %v5555_v7 }
 0x2e0   : > { %v5557_v48 = vpop.eup %5556  ;;  %v2888_v25 = vpop.f32.mrb[48].mxu1 }
 0x2e1   : > { %v5559_v42 = vpop.eup %5558  ;;  %5566 = vrcp.f32 %v3089_v24  ;;  %v3090_v58 = vadd.f32 1.0, %v5557_v48  ;;  %v7348_v31 = vadd.f32 %v7330_v35, %v2888_v25  ;;  %v2890_v27 = vpop.f32.mrb[49].mxu1 }
 0x2e2   : > { %v2891_v60 = vpop.f32.mrb[50].mxu1  ;;  %v3183_v1 = vmul.f32 %v5559_v42, %v2865_v9 }
 0x2e3   : > { %v5561_v18 = vpop.eup %5560  ;;  %5568 = vrcp.f32 %v3090_v58  ;;  %v4764_v12 = vmul.f32 -1.442695, %v7348_v31  ;;  %v7352_v62 = vadd.f32 %v7330_v35, %v2891_v60  ;;  %v2893_v39 = vpop.f32.mrb[51].mxu1 }
 0x2e4   : > { %v3184_v11 = vmul.f32 %v5561_v18, %v2868_v23 }
 0x2e5   : > { %5570 = vpow2.f32 %v4764_v12  ;;  %v4765_v10 = vmul.f32 -1.442695, %v7352_v62 }
 0x2e6   : > { %v3215_v36 = vpack.c.bf16 %v3184_v11, %v3183_v1  ;;  %v5142_v63 = vpack.i.bf16 %v3184_v11, %v3183_v1 }
 0x2e7   : > { %v5563_v46 = vpop.eup %5562  ;;  %5572 = vpow2.f32 %v4765_v10 }
 0x2e8   : > { %v3091_v6 = vadd.f32 1.0, %v5563_v46  ;;  %5143 = vrot.lane.b32.xlu1 %v5142_v63, %s5991_s16  ;;  %4961 = vmatprep.mubr.msk.bf16.mxu1 %vm2781_vm5, %v3215_v36 }
 0x2e9   : > { %v5565_v56 = vpop.eup %5564 }
 0x2ea   : > { %5574 = vrcp.f32 %v3091_v6  ;;  %v3092_v53 = vadd.f32 1.0, %v5565_v56  ;;  %v2896_v0 = vpop.f32.mrb[52].mxu1 }
 0x2eb   : > { %v7358_v33 = vadd.f32 %v7330_v35, %v2896_v0  ;;  %v2898_v51 = vpop.f32.mrb[53].mxu1  ;;  %v5567_v21 = vpop.eup %5566 }
 0x2ec   : > { %5576 = vrcp.f32 %v3092_v53  ;;  %v2899_v29 = vpop.f32.mrb[54].mxu1  ;;  %v3185_v9 = vmul.f32 %v5567_v21, %v7335_v22 }
 0x2ed   : > { %v4766_v44 = vmul.f32 -1.442695, %v7358_v33  ;;  %v7362_v26 = vadd.f32 %v7330_v35, %v2899_v29  ;;  %v2901_v49 = vpop.f32.mrb[55].mxu1  ;;  %v5569_v16 = vpop.eup %5568 }
 0x2ee   : > { %v3186_v50 = vmul.f32 %v5569_v16, %v2876_v34 }
 0x2ef   : > { %5578 = vpow2.f32 %v4766_v44  ;;  %v4767_v4 = vmul.f32 -1.442695, %v7362_v26  ;;  %v5571_v61 = vpop.eup %5570 }
 0x2f0   : > { %v3216_v23 = vpack.c.bf16 %v3186_v50, %v3185_v9  ;;  %v3093_v52 = vadd.f32 1.0, %v5571_v61  ;;  %v5147_v59 = vpack.i.bf16 %v3186_v50, %v3185_v9 }
 0x2f1   : > { %5580 = vpow2.f32 %v4767_v4  ;;  %v5573_v57 = vpop.eup %5572 }
 0x2f2   : > { %v2904_v5 = vpop.f32.mrb[56].mxu1  ;;  %5582 = vrcp.f32 %v3093_v52  ;;  %v3094_v47 = vadd.f32 1.0, %v5573_v57  ;;  %5148 = vrot.lane.b32.xlu1 %v5147_v59, %s5991_s16  ;;  %4962 = vmatmul.mubr.msk.bf16.vlgmr.msra.gmra.mrb[100].mxu1 %vm2781_vm5, %v3216_v23 }
 0x2f3   : > { %v7367_v32 = vadd.f32 %v7330_v35, %v2904_v5  ;;  %v2906_v14 = vpop.f32.mrb[57].mxu1 }
 0x2f4   : > { %v5575_v22 = vpop.eup %5574  ;;  %v2907_v34 = vpop.f32.mrb[58].mxu1  ;;  %5584 = vrcp.f32 %v3094_v47 }
 0x2f5   : > { %v4768_v28 = vmul.f32 -1.442695, %v7367_v32  ;;  %v7373_v38 = vadd.f32 %v7330_v35, %v2907_v34  ;;  %v2909_v17 = vpop.f32.mrb[59].mxu1  ;;  %v3187_v15 = vmul.f32 %v5575_v22, %v7340_v3 }
 0x2f6   : > { %v5577_v2 = vpop.eup %5576 }
 0x2f7   : > { %v3188_v41 = vmul.f32 %v5577_v2, %v7344_v54  ;;  %5586 = vpow2.f32 %v4768_v28  ;;  %v4769_v13 = vmul.f32 -1.442695, %v7373_v38 }
 0x2f9   : > { %v5579_v43 = vpop.eup %5578  ;;  %v3217_v37 = vpack.c.bf16 %v3188_v41, %v3187_v15  ;;  %5588 = vpow2.f32 %v4769_v13  ;;  %v5152_v55 = vpack.i.bf16 %v3188_v41, %v3187_v15 }
 0x2fa   : > { %v3095_v45 = vadd.f32 1.0, %v5579_v43  ;;  %v2912_v24 = vpop.f32.mrb[60].mxu1 }
 0x2fb   : > { %v5581_v7 = vpop.eup %5580  ;;  %5153 = vrot.lane.b32.xlu1 %v5152_v55, %s5991_s16  ;;  %4965 = vmatprep.mubr.msk.bf16.mxu1 %vm2781_vm5, %v3217_v37  ;;  %v7381_v3 = vadd.f32 %v7330_v35, %v2912_v24  ;;  %v2914_v54 = vpop.f32.mrb[61].mxu1 }
 0x2fc   : > { %5590 = vrcp.f32 %v3095_v45  ;;  %v3096_v48 = vadd.f32 1.0, %v5581_v7  ;;  %v5583_v25 = vpop.eup %5582  ;;  %v2915_v42 = vpop.f32.mrb[62].mxu1 }
 0x2fd   : > { %v4770_v58 = vmul.f32 -1.442695, %v7381_v3  ;;  %v7385_v27 = vadd.f32 %v7330_v35, %v2915_v42  ;;  %v2917_v60 = vpop.f32.mrb[63].mxu1  ;;  %v3189_v12 = vmul.f32 %v5583_v25, %v7348_v31 }
 0x2fe   : > { %5592 = vrcp.f32 %v3096_v48  ;;  %v5585_v18 = vpop.eup %5584 }
 0x2ff   : > { %v3190_v39 = vmul.f32 %v5585_v18, %v7352_v62  ;;  %5594 = vpow2.f32 %v4770_v58  ;;  %v4771_v1 = vmul.f32 -1.442695, %v7385_v27 }
 0x301   : > { %v5587_v11 = vpop.eup %5586  ;;  %v3218_v10 = vpack.c.bf16 %v3190_v39, %v3189_v12  ;;  %5596 = vpow2.f32 %v4771_v1  ;;  %v5157_v36 = vpack.i.bf16 %v3190_v39, %v3189_v12 }
 0x302   : > { %v3097_v46 = vadd.f32 1.0, %v5587_v11 }
 0x303   : > { %v5589_v63 = vpop.eup %5588  ;;  %5158 = vrot.lane.b32.xlu1 %v5157_v36, %s5991_s16  ;;  %4966 = vmatmul.mubr.msk.bf16.gmra.mrb[104].mxu1 %vm2781_vm5, %v3218_v10 }
 0x304   : > { %5598 = vrcp.f32 %v3097_v46  ;;  %v3098_v6 = vadd.f32 1.0, %v5589_v63 }
 0x306   : > { %v5591_v56 = vpop.eup %5590  ;;  %5600 = vrcp.f32 %v3098_v6 }
 0x307   : > { %v2920_v31 = vpop.f32.mrb[64].mxu1  ;;  %v3191_v51 = vmul.f32 %v5591_v56, %v7358_v33 }
 0x308   : > { %v5593_v53 = vpop.eup %5592  ;;  %v7393_v62 = vadd.f32 %v7330_v35, %v2920_v31  ;;  %v2922_v0 = vpop.f32.mrb[65].mxu1 }
 0x309   : > { %v3192_v21 = vmul.f32 %v5593_v53, %v7362_v26  ;;  %v2923_v29 = vpop.f32.mrb[66].mxu1  ;;  %v5595_v44 = vpop.eup %5594 }
 0x30a   : > { %v4772_v49 = vmul.f32 -1.442695, %v7393_v62  ;;  %v7399_v16 = vadd.f32 %v7330_v35, %v2923_v29  ;;  %v2925_v9 = vpop.f32.mrb[67].mxu1  ;;  %v3099_v4 = vadd.f32 1.0, %v5595_v44 }
 0x30b   : > { %v3219_v50 = vpack.c.bf16 %v3192_v21, %v3191_v51  ;;  %v5162_v61 = vpack.i.bf16 %v3192_v21, %v3191_v51  ;;  %v5597_v23 = vpop.eup %5596 }
 0x30c   : > { %5602 = vpow2.f32 %v4772_v49  ;;  %v4773_v52 = vmul.f32 -1.442695, %v7399_v16  ;;  %v3100_v59 = vadd.f32 1.0, %v5597_v23 }
 0x30d   : > { %5604 = vrcp.f32 %v3099_v4  ;;  %5163 = vrot.lane.b32.xlu1 %v5162_v61, %s5991_s16  ;;  %4969 = vmatprep.mubr.msk.bf16.mxu1 %vm2781_vm5, %v3219_v50 }
 0x30e   : > { %v5599_v33 = vpop.eup %5598  ;;  %5606 = vpow2.f32 %v4773_v52 }
 0x30f   : > { %5608 = vrcp.f32 %v3100_v59  ;;  %v3193_v5 = vmul.f32 %v5599_v33, %v7367_v32 }
 0x310   : > { %v5601_v26 = vpop.eup %5600  ;;  %v2928_v57 = vpop.f32.mrb[68].mxu1 }
 0x311   : > { %v3194_v47 = vmul.f32 %v5601_v26, %v7373_v38  ;;  %v7407_v14 = vadd.f32 %v7330_v35, %v2928_v57  ;;  %v2930_v22 = vpop.f32.mrb[69].mxu1 }
 0x312   : > { %v2931_v34 = vpop.f32.mrb[70].mxu1 }
 0x313   : > { %v3220_v28 = vpack.c.bf16 %v3194_v47, %v3193_v5  ;;  %v4774_v17 = vmul.f32 -1.442695, %v7407_v14  ;;  %v7411_v2 = vadd.f32 %v7330_v35, %v2931_v34  ;;  %v2933_v15 = vpop.f32.mrb[71].mxu1  ;;  %v5167_v41 = vpack.i.bf16 %v3194_v47, %v3193_v5 }
 0x315   : > { %5610 = vpow2.f32 %v4774_v17  ;;  %v4775_v13 = vmul.f32 -1.442695, %v7411_v2  ;;  %5168 = vrot.lane.b32.xlu1 %v5167_v41, %s5991_s16  ;;  %4970 = vmatmul.mubr.msk.bf16.gmra.mrb[108].mxu1 %vm2781_vm5, %v3220_v28 }
 0x316   : > { %v5603_v32 = vpop.eup %5602 }
 0x317   : > { %v5605_v38 = vpop.eup %5604  ;;  %v3101_v43 = vadd.f32 1.0, %v5603_v32  ;;  %5612 = vpow2.f32 %v4775_v13 }
 0x318   : > { %v5607_v37 = vpop.eup %5606  ;;  %v7417_v24 = vmul.f32 %v5605_v38, %v7381_v3 }
 0x319   : > { %v5609_v55 = vpop.eup %5608  ;;  %5614 = vrcp.f32 %v3101_v43  ;;  %v3102_v45 = vadd.f32 1.0, %v5607_v37  ;;  %v2936_v7 = vpop.f32.mrb[72].mxu1 }
 0x31a   : > { %v7420_v48 = vmul.f32 %v5609_v55, %v7385_v27  ;;  %v7423_v54 = vadd.f32 %v7330_v35, %v2936_v7  ;;  %v2938_v25 = vpop.f32.mrb[73].mxu1 }
 0x31b   : > { %5616 = vrcp.f32 %v3102_v45  ;;  %v2939_v42 = vpop.f32.mrb[74].mxu1 }
 0x31c   : > { %v3221_v58 = vpack.c.bf16 %v7420_v48, %v7417_v24  ;;  %v4776_v60 = vmul.f32 -1.442695, %v7423_v54  ;;  %v7429_v18 = vadd.f32 %v7330_v35, %v2939_v42  ;;  %v2941_v12 = vpop.f32.mrb[75].mxu1  ;;  %v5207_v3 = vpack.i.bf16 %v7420_v48, %v7417_v24 }
 0x31d   : > { %v7766_v24 = vstv %s5126_s20 }
 0x31e   : > { %5618 = vpow2.f32 %v4776_v60  ;;  %v4777_v27 = vmul.f32 -1.442695, %v7429_v18  ;;  %4973 = vmatprep.mubr.msk.bf16.mxu1 %vm2781_vm5, %v3221_v58 }
 0x31f   : > { %v5611_v39 = vpop.eup %5610 }
 0x320   : > { %v3103_v1 = vadd.f32 1.0, %v5611_v39  ;;  %5620 = vpow2.f32 %v4777_v27 }
 0x321   : > { %v5613_v11 = vpop.eup %5612  ;;  %v2944_v46 = vpop.f32.mrb[76].mxu1 }
 0x322   : > { %5622 = vrcp.f32 %v3103_v1  ;;  %v3104_v10 = vadd.f32 1.0, %v5613_v11  ;;  %v7436_v63 = vadd.f32 %v7330_v35, %v2944_v46  ;;  %v2946_v6 = vpop.f32.mrb[77].mxu1 }
 0x323   : > { %v5615_v36 = vpop.eup %5614  ;;  %v2947_v56 = vpop.f32.mrb[78].mxu1 }
 0x324   : > { %5624 = vrcp.f32 %v3104_v10  ;;  %v4778_v53 = vmul.f32 -1.442695, %v7436_v63  ;;  %v7440_v0 = vadd.f32 %v7330_v35, %v2947_v56  ;;  %v2949_v51 = vpop.f32.mrb[79].mxu1  ;;  %v7443_v21 = vmul.f32 %v5615_v36, %v7393_v62 }
 0x325   : > { %v5617_v31 = vpop.eup %5616 }
 0x326   : > { %v7446_v29 = vmul.f32 %v5617_v31, %v7399_v16  ;;  %5626 = vpow2.f32 %v4778_v53  ;;  %v4779_v44 = vmul.f32 -1.442695, %v7440_v0 }
 0x328   : > { %v5619_v49 = vpop.eup %5618  ;;  %v3222_v9 = vpack.c.bf16 %v7446_v29, %v7443_v21  ;;  %v5217_v50 = vpack.i.bf16 %v7446_v29, %v7443_v21  ;;  %5628 = vpow2.f32 %v4779_v44 }
 0x329   : > { %v3105_v4 = vadd.f32 1.0, %v5619_v49  ;;  %v2952_v23 = vpop.f32.mrb[80].mxu1 }
 0x32a   : > { %v5621_v61 = vpop.eup %5620  ;;  %4974 = vmatmul.mubr.msk.bf16.gmra.mrb[112].mxu1 %vm2781_vm5, %v3222_v9  ;;  %v7455_v16 = vadd.f32 %v7330_v35, %v2952_v23  ;;  %v2954_v52 = vpop.f32.mrb[81].mxu1 }
 0x32b   : > { %5630 = vrcp.f32 %v3105_v4  ;;  %v3106_v62 = vadd.f32 1.0, %v5621_v61  ;;  %v2955_v33 = vpop.f32.mrb[82].mxu1 }
 0x32c   : > { %v5623_v59 = vpop.eup %5622  ;;  %v4780_v26 = vmul.f32 -1.442695, %v7455_v16  ;;  %v7459_v57 = vadd.f32 %v7330_v35, %v2955_v33  ;;  %v2957_v5 = vpop.f32.mrb[83].mxu1 }
 0x32d   : > { %5632 = vrcp.f32 %v3106_v62  ;;  %v3199_v22 = vmul.f32 %v5623_v59, %v7407_v14 }
 0x32e   : > { %v5625_v47 = vpop.eup %5624  ;;  %5634 = vpow2.f32 %v4780_v26  ;;  %v4781_v28 = vmul.f32 -1.442695, %v7459_v57 }
 0x32f   : > { %v3200_v34 = vmul.f32 %v5625_v47, %v7411_v2 }
 0x330   : > { %v5627_v17 = vpop.eup %5626  ;;  %5636 = vpow2.f32 %v4781_v28 }
 0x331   : > { %v3223_v15 = vpack.c.bf16 %v3200_v34, %v3199_v22  ;;  %v5172_v41 = vpack.i.bf16 %v3200_v34, %v3199_v22  ;;  %v3107_v13 = vadd.f32 1.0, %v5627_v17  ;;  %v2960_v32 = vpop.f32.mrb[84].mxu1 }
 0x332   : > { %v5629_v38 = vpop.eup %5628  ;;  %v7465_v43 = vadd.f32 %v7330_v35, %v2960_v32  ;;  %v2962_v37 = vpop.f32.mrb[85].mxu1 }
 0x333   : > { %5173 = vrot.lane.b32.xlu0 %v5172_v41, %s5991_s16  ;;  %4977 = vmatprep.mubr.msk.bf16.mxu1 %vm2781_vm5, %v3223_v15  ;;  %5638 = vrcp.f32 %v3107_v13  ;;  %v3108_v14 = vadd.f32 1.0, %v5629_v38  ;;  %v2963_v2 = vpop.f32.mrb[86].mxu1 }
 0x334   : > { %v4782_v45 = vmul.f32 -1.442695, %v7465_v43  ;;  %v7471_v7 = vadd.f32 %v7330_v35, %v2963_v2  ;;  %v2965_v25 = vpop.f32.mrb[87].mxu1 }
 0x335   : > { %v5631_v55 = vpop.eup %5630  ;;  %5640 = vrcp.f32 %v3108_v14 }
 0x336   : > { %5642 = vpow2.f32 %v4782_v45  ;;  %v4783_v58 = vmul.f32 -1.442695, %v7471_v7  ;;  %v3201_v60 = vmul.f32 %v5631_v55, %v7423_v54 }
 0x337   : > { %v5633_v42 = vpop.eup %5632 }
 0x338   : > { %v3202_v12 = vmul.f32 %v5633_v42, %v7429_v18  ;;  %v5635_v27 = vpop.eup %5634  ;;  %5644 = vpow2.f32 %v4783_v58 }
 0x339   : > { %v3109_v1 = vadd.f32 1.0, %v5635_v27  ;;  %v2968_v11 = vpop.f32.mrb[88].mxu1 }
 0x33a   : > { %v3224_v39 = vpack.c.bf16 %v3202_v12, %v3201_v60  ;;  %v5177_v10 = vpack.i.bf16 %v3202_v12, %v3201_v60  ;;  %v5637_v46 = vpop.eup %5636  ;;  %v7477_v36 = vadd.f32 %v7330_v35, %v2968_v11  ;;  %v2970_v6 = vpop.f32.mrb[89].mxu1 }
 0x33b   : > { %5646 = vrcp.f32 %v3109_v1  ;;  %v3110_v56 = vadd.f32 1.0, %v5637_v46  ;;  %v2971_v31 = vpop.f32.mrb[90].mxu1 }
 0x33c   : > { %5178 = vrot.lane.b32.xlu1 %v5177_v10, %s5991_s16  ;;  %4978 = vmatmul.mubr.msk.bf16.gmra.mrb[116].mxu1 %vm2781_vm5, %v3224_v39  ;;  %v4784_v54 = vmul.f32 -1.442695, %v7477_v36  ;;  %v7483_v18 = vadd.f32 %v7330_v35, %v2971_v31  ;;  %v2973_v53 = vpop.f32.mrb[91].mxu1 }
 0x33d   : > { %v5639_v51 = vpop.eup %5638  ;;  %5648 = vrcp.f32 %v3110_v56 }
 0x33e   : > { %5650 = vpow2.f32 %v4784_v54  ;;  %v4785_v44 = vmul.f32 -1.442695, %v7483_v18  ;;  %v3203_v4 = vmul.f32 %v5639_v51, %v7436_v63 }
 0x33f   : > { %v5641_v49 = vpop.eup %5640 }
 0x340   : > { %v5643_v9 = vpop.eup %5642  ;;  %v3204_v61 = vmul.f32 %v5641_v49, %v7440_v0  ;;  %5652 = vpow2.f32 %v4785_v44 }
 0x341   : > { %v3111_v23 = vadd.f32 1.0, %v5643_v9  ;;  %v2976_v62 = vpop.f32.mrb[92].mxu1 }
 0x342   : > { %v5645_v52 = vpop.eup %5644  ;;  %v3225_v59 = vpack.c.bf16 %v3204_v61, %v3203_v4  ;;  %v7489_v33 = vadd.f32 %v7330_v35, %v2976_v62  ;;  %v2978_v26 = vpop.f32.mrb[93].mxu1  ;;  %v5182_v5 = vpack.i.bf16 %v3204_v61, %v3203_v4 }
 0x343   : > { %5654 = vrcp.f32 %v3111_v23  ;;  %v3112_v47 = vadd.f32 1.0, %v5645_v52  ;;  %v2979_v22 = vpop.f32.mrb[94].mxu1 }
 0x344   : > { %v4786_v34 = vmul.f32 -1.442695, %v7489_v33  ;;  %v7493_v28 = vadd.f32 %v7330_v35, %v2979_v22  ;;  %5183 = vrot.lane.b32.xlu0 %v5182_v5, %s5991_s16  ;;  %v2981_v63 = vpop.f32.mrb[95].mxu1  ;;  %4981 = vmatprep.mubr.msk.bf16.mxu1 %vm2781_vm5, %v3225_v59 }
 0x345   : > { %v5647_v0 = vpop.eup %5646  ;;  %5656 = vrcp.f32 %v3112_v47 }
 0x346   : > { %5658 = vpow2.f32 %v4786_v34  ;;  %v4787_v17 = vmul.f32 -1.442695, %v7493_v28  ;;  %v3205_v13 = vmul.f32 %v5647_v0, %v7455_v16 }
 0x347   : > { %v5649_v15 = vpop.eup %5648 }
 0x348   : > { %v5651_v41 = vpop.eup %5650  ;;  %v3206_v32 = vmul.f32 %v5649_v15, %v7459_v57  ;;  %5660 = vpow2.f32 %v4787_v17 }
 0x349   : > { %v3113_v38 = vadd.f32 1.0, %v5651_v41 }
 0x34a   : > { %v5653_v37 = vpop.eup %5652  ;;  %v3226_v14 = vpack.c.bf16 %v3206_v32, %v3205_v13  ;;  %v2984_v2 = vpop.f32.mrb[96].mxu1  ;;  %v5187_v55 = vpack.i.bf16 %v3206_v32, %v3205_v13 }
 0x34b   : > { %5662 = vrcp.f32 %v3113_v38  ;;  %v3114_v45 = vadd.f32 1.0, %v5653_v37  ;;  %v2985_v25 = vadd.f32 %v7330_v35, %v2984_v2  ;;  %v2986_v42 = vpop.f32.mrb[97].mxu1 }
 0x34c   : > { %v2987_v58 = vpop.f32.mrb[98].mxu1  ;;  %5188 = vrot.lane.b32.xlu0 %v5187_v55, %s5991_s16  ;;  %4982 = vmatmul.mubr.msk.bf16.gmra.mrb[120].mxu1 %vm2781_vm5, %v3226_v14 }
 0x34d   : > { %v5655_v60 = vpop.eup %5654  ;;  %5664 = vrcp.f32 %v3114_v45  ;;  %v4788_v16 = vmul.f32 -1.442695, %v2985_v25  ;;  %v2988_v57 = vadd.f32 %v7330_v35, %v2987_v58  ;;  %v2989_v12 = vpop.f32.mrb[99].mxu1 }
 0x34e   : > { %v3207_v11 = vmul.f32 %v5655_v60, %v7465_v43 }
 0x34f   : > { %v5657_v27 = vpop.eup %5656  ;;  %5666 = vpow2.f32 %v4788_v16  ;;  %v4789_v39 = vmul.f32 -1.442695, %v2988_v57 }
 0x350   : > { %v5659_v1 = vpop.eup %5658  ;;  %v3208_v10 = vmul.f32 %v5657_v27, %v7471_v7 }
 0x351   : > { %v3115_v46 = vadd.f32 1.0, %v5659_v1  ;;  %5668 = vpow2.f32 %v4789_v39 }
 0x352   : > { %v5661_v6 = vpop.eup %5660  ;;  %v3227_v56 = vpack.c.bf16 %v3208_v10, %v3207_v11  ;;  %v5192_v31 = vpack.i.bf16 %v3208_v10, %v3207_v11 }
 0x353   : > { %5670 = vrcp.f32 %v3115_v46  ;;  %v3116_v54 = vadd.f32 1.0, %v5661_v6 }
 0x354   : > { %5193 = vrot.lane.b32.xlu0 %v5192_v31, %s5991_s16  ;;  %4985 = vmatprep.mubr.msk.bf16.mxu1 %vm2781_vm5, %v3227_v56 }
 0x355   : > { %v5663_v35 = vpop.eup %5662  ;;  %5672 = vrcp.f32 %v3116_v54 }
 0x356   : > { %v3209_v51 = vmul.f32 %v5663_v35, %v7477_v36 }
 0x357   : > { %v5665_v53 = vpop.eup %5664 }
 0x358   : > { %v3210_v43 = vmul.f32 %v5665_v53, %v7483_v18 }
 0x359   : > { %v5667_v44 = vpop.eup %5666 }
 0x35a   : > { %v3228_v7 = vpack.c.bf16 %v3210_v43, %v3209_v51  ;;  %v3117_v49 = vadd.f32 1.0, %v5667_v44  ;;  %v5197_v9 = vpack.i.bf16 %v3210_v43, %v3209_v51  ;;  %v7560_v43 = vld [vmem:[%s8585_s30] ss:$0 sm:$0xff] }
 0x35b   : > { %v5669_v4 = vpop.eup %5668 }
 0x35c   : > { %5674 = vrcp.f32 %v3117_v49  ;;  %v3118_v61 = vadd.f32 1.0, %v5669_v4  ;;  %5198 = vrot.lane.b32.xlu0 %v5197_v9, %s5991_s16  ;;  %4986 = vmatmul.mubr.msk.bf16.gmra.mrb[124].mxu1 %vm2781_vm5, %v3228_v7 }
 0x35d   : > { %v5671_v23 = vpop.eup %5670 }
 0x35e   : > { %5676 = vrcp.f32 %v3118_v61  ;;  %v7513_v52 = vmul.f32 %v5671_v23, %v7489_v33 }
 0x35f   : > { %v5673_v62 = vpop.eup %5672 }
 0x360   : > { %v7516_v36 = vmul.f32 %v5673_v62, %v7493_v28  ;;  %v7535_v28 = vld [vmem:[%s8584_s29] ss:$0 sm:$0xff] }
 0x362   : > { %v3229_v18 = vpack.c.bf16 %v7516_v36, %v7513_v52  ;;  %v5202_v59 = vpack.i.bf16 %v7516_v36, %v7513_v52 }
 0x364   : > { %4989 = vmatprep.mubr.msk.bf16.mxu1 %vm2781_vm5, %v3229_v18 }
 0x366   : > { %v5675_v26 = vpop.eup %5674 }
 0x367   : > { %v7523_v47 = vmul.f32 %v5675_v26, %v2985_v25 }
 0x368   : > { %v5677_v5 = vpop.eup %5676 }
 0x369   : > { %v7525_v22 = vmul.f32 %v5677_v5, %v2988_v57 }
 0x36b   : > { %v3230_v33 = vpack.c.bf16 %v7525_v22, %v7523_v47  ;;  %v5212_v34 = vpack.i.bf16 %v7525_v22, %v7523_v47 }
 0x36d   : > { %4990 = vmatmul.mubr.msk.bf16.gmra.mrb[128].mxu1 %vm2781_vm5, %v3230_v33 }
 0x3c5   : > { %v4963_v63 = vpop.f32.mrb[100].mxu1 }
 0x3c6   : > { %v3337_v0 = vadd.f32 %v4963_v63, %v7535_v28  ;;  %v3328_v17 = vpop.f32.mrb[101].mxu1 }
 0x3c7   : > { %v3329_v15 = vadd.f32 %v7535_v28, %v3328_v17  ;;  %v4964_v41 = vpop.f32.mrb[102].mxu1 }
 0x3c8   : > { %v4810_v13 = vmul.f32 -1.442695, %v3337_v0  ;;  %v3340_v32 = vadd.f32 %v4964_v41, %v7535_v28  ;;  %v3331_v38 = vpop.f32.mrb[103].mxu1 }
 0x3c9   : > { %v4808_v37 = vmul.f32 -1.442695, %v3329_v15  ;;  %v3332_v14 = vadd.f32 %v7535_v28, %v3331_v38 }
 0x3ca   : > { %5678 = vpow2.f32 %v4810_v13  ;;  %v4811_v2 = vmul.f32 -1.442695, %v3340_v32 }
 0x3cb   : > { %5680 = vpow2.f32 %v4808_v37  ;;  %v4809_v55 = vmul.f32 -1.442695, %v3332_v14 }
 0x3cc   : > { %5682 = vpow2.f32 %v4811_v2 }
 0x3cd   : > { %5684 = vpow2.f32 %v4809_v55 }
 0x3d4   : > { %v5679_v45 = vpop.eup %5678 }
 0x3d5   : > { %v5681_v25 = vpop.eup %5680  ;;  %v3553_v42 = vadd.f32 1.0, %v5679_v45 }
 0x3d6   : > { %v5683_v58 = vpop.eup %5682  ;;  %v3551_v60 = vadd.f32 1.0, %v5681_v25  ;;  %v4967_v16 = vpop.f32.mrb[104].mxu1 }
 0x3d7   : > { %v5685_v57 = vpop.eup %5684  ;;  %5686 = vrcp.f32 %v3553_v42  ;;  %v3554_v12 = vadd.f32 1.0, %v5683_v58  ;;  %v7542_v27 = vadd.f32 %v4967_v16, %v7535_v28  ;;  %v3344_v39 = vpop.f32.mrb[105].mxu1 }
 0x3d8   : > { %5688 = vrcp.f32 %v3551_v60  ;;  %v3552_v1 = vadd.f32 1.0, %v5685_v57  ;;  %v7545_v11 = vadd.f32 %v7535_v28, %v3344_v39  ;;  %v4968_v10 = vpop.f32.mrb[106].mxu1 }
 0x3d9   : > { %5690 = vrcp.f32 %v3554_v12  ;;  %v4814_v46 = vmul.f32 -1.442695, %v7542_v27  ;;  %v7549_v6 = vadd.f32 %v4968_v10, %v7535_v28  ;;  %v3347_v56 = vpop.f32.mrb[107].mxu1 }
 0x3da   : > { %5692 = vrcp.f32 %v3552_v1  ;;  %v4812_v31 = vmul.f32 -1.442695, %v7545_v11  ;;  %v7553_v54 = vadd.f32 %v7535_v28, %v3347_v56 }
 0x3db   : > { %5694 = vpow2.f32 %v4814_v46  ;;  %v4815_v35 = vmul.f32 -1.442695, %v7549_v6 }
 0x3dc   : > { %5696 = vpow2.f32 %v4812_v31  ;;  %v4813_v53 = vmul.f32 -1.442695, %v7553_v54 }
 0x3dd   : > { %5698 = vpow2.f32 %v4815_v35 }
 0x3de   : > { %5700 = vpow2.f32 %v4813_v53 }
 0x3e1   : > { %v5687_v51 = vpop.eup %5686 }
 0x3e2   : > { %v5689_v44 = vpop.eup %5688  ;;  %v3649_v7 = vmul.f32 %v5687_v51, %v3337_v0 }
 0x3e3   : > { %v5691_v49 = vpop.eup %5690  ;;  %v3647_v9 = vmul.f32 %v5689_v44, %v3329_v15 }
 0x3e4   : > { %v5693_v4 = vpop.eup %5692  ;;  %v3650_v61 = vmul.f32 %v5691_v49, %v3340_v32  ;;  %v3688_v23 = vmul.f32 %v7560_v43, %v3649_v7 }
 0x3e5   : > { %v5695_v62 = vpop.eup %5694  ;;  %v3648_v18 = vmul.f32 %v5693_v4, %v3332_v14  ;;  %v3686_v17 = vmul.f32 %v7560_v43, %v3647_v9 }
 0x3e6   : > { %v5697_v26 = vpop.eup %5696  ;;  %v3557_v5 = vadd.f32 1.0, %v5695_v62  ;;  %v3725_v33 = vsel %vm3718_vm6, %v3688_v23, 0.0  ;;  %v3689_v63 = vmul.f32 %v7560_v43, %v3650_v61 }
 0x3e7   : > { %v5699_v41 = vpop.eup %5698  ;;  %v3555_v13 = vadd.f32 1.0, %v5697_v26  ;;  %3726 = vadd.xlane.f32.xlu0 %v3725_v33  ;;  %v3687_v15 = vmul.f32 %v7560_v43, %v3648_v18  ;;  %v3719_v16 = vsel %vm3718_vm6, %v3686_v17, 0.0 }
 0x3e8   : > { %v4971_v0 = vpop.f32.mrb[108].mxu1  ;;  %v5701_v38 = vpop.eup %5700  ;;  %5702 = vrcp.f32 %v3557_v5  ;;  %v3558_v32 = vadd.f32 1.0, %v5699_v41  ;;  %v3728_v2 = vsel %vm3718_vm6, %v3689_v63, 0.0 }
 0x3e9   : > { %v7568_v37 = vadd.f32 %v4971_v0, %v7535_v28  ;;  %v3360_v14 = vpop.f32.mrb[109].mxu1  ;;  %5704 = vrcp.f32 %v3555_v13  ;;  %v3556_v55 = vadd.f32 1.0, %v5701_v38  ;;  %3729 = vadd.xlane.f32.xlu1 %v3728_v2  ;;  %v3722_v1 = vsel %vm3718_vm6, %v3687_v15, 0.0 }
 0x3ea   : > { %v7572_v45 = vadd.f32 %v7535_v28, %v3360_v14  ;;  %v4972_v25 = vpop.f32.mrb[110].mxu1  ;;  %5706 = vrcp.f32 %v3558_v32 }
 0x3eb   : > { %v4818_v42 = vmul.f32 -1.442695, %v7568_v37  ;;  %v7576_v58 = vadd.f32 %v4972_v25, %v7535_v28  ;;  %v3363_v60 = vpop.f32.mrb[111].mxu1  ;;  %5708 = vrcp.f32 %v3556_v55  ;;  %3720 = vadd.xlane.f32.xlu0 %v3719_v16 }
 0x3ec   : > { %v4816_v57 = vmul.f32 -1.442695, %v7572_v45  ;;  %v7581_v12 = vadd.f32 %v7535_v28, %v3363_v60 }
 0x3ed   : > { %5710 = vpow2.f32 %v4818_v42  ;;  %v4819_v39 = vmul.f32 -1.442695, %v7576_v58  ;;  %3723 = vadd.xlane.f32.xlu1 %v3722_v1 }
 0x3ee   : > { %5712 = vpow2.f32 %v4816_v57  ;;  %v4817_v10 = vmul.f32 -1.442695, %v7581_v12 }
 0x3ef   : > { %5714 = vpow2.f32 %v4819_v39 }
 0x3f0   : > { %5716 = vpow2.f32 %v4817_v10 }
 0x3f2   : > { %v5703_v46 = vpop.eup %5702 }
 0x3f3   : > { %v5705_v56 = vpop.eup %5704  ;;  %v3653_v31 = vmul.f32 %v5703_v46, %v7542_v27 }
 0x3f4   : > { %v5707_v35 = vpop.eup %5706  ;;  %v3651_v53 = vmul.f32 %v5705_v56, %v7545_v11 }
 0x3f5   : > { %v5709_v51 = vpop.eup %5708  ;;  %v3654_v44 = vmul.f32 %v5707_v35, %v7549_v6  ;;  %v3692_v7 = vmul.f32 %v7560_v43, %v3653_v31 }
 0x3f6   : > { %v3652_v9 = vmul.f32 %v5709_v51, %v7553_v54  ;;  %v3690_v18 = vmul.f32 %v7560_v43, %v3651_v53 }
 0x3f7   : > { %v5711_v49 = vpop.eup %5710  ;;  %v3737_v23 = vsel %vm3718_vm6, %v3692_v7, 0.0  ;;  %v3693_v62 = vmul.f32 %v7560_v43, %v3654_v44 }
 0x3f8   : > { %v5713_v4 = vpop.eup %5712  ;;  %v3561_v61 = vadd.f32 1.0, %v5711_v49  ;;  %3738 = vadd.xlane.f32.xlu0 %v3737_v23  ;;  %v3691_v33 = vmul.f32 %v7560_v43, %v3652_v9  ;;  %v3731_v63 = vsel %vm3718_vm6, %v3690_v18, 0.0 }
 0x3f9   : > { %v5715_v27 = vpop.eup %5714  ;;  %v3559_v26 = vadd.f32 1.0, %v5713_v4  ;;  %v3740_v6 = vsel %vm3718_vm6, %v3693_v62, 0.0 }
 0x3fa   : > { %v5717_v11 = vpop.eup %5716  ;;  %5718 = vrcp.f32 %v3561_v61  ;;  %v3562_v5 = vadd.f32 1.0, %v5715_v27  ;;  %3741 = vadd.xlane.f32.xlu1 %v3740_v6  ;;  %v3734_v0 = vsel %vm3718_vm6, %v3691_v33, 0.0 }
 0x3fb   : > { %5720 = vrcp.f32 %v3559_v26  ;;  %v3560_v54 = vadd.f32 1.0, %v5717_v11 }
 0x3fc   : > { %5722 = vrcp.f32 %v3562_v5  ;;  %3732 = vadd.xlane.f32.xlu0 %v3731_v63 }
 0x3fd   : > { %5724 = vrcp.f32 %v3560_v54  ;;  %v4975_v17 = vpop.f32.mrb[112].mxu1 }
 0x3fe   : > { %v7598_v41 = vadd.f32 %v4975_v17, %v7535_v28  ;;  %v3376_v13 = vpop.f32.mrb[113].mxu1  ;;  %3735 = vadd.xlane.f32.xlu1 %v3734_v0 }
 0x3ff   : > { %v7602_v15 = vadd.f32 %v7535_v28, %v3376_v13  ;;  %v4976_v38 = vpop.f32.mrb[114].mxu1 }
 0x400   : > { %v4822_v32 = vmul.f32 -1.442695, %v7598_v41  ;;  %v7606_v14 = vadd.f32 %v4976_v38, %v7535_v28  ;;  %v3379_v2 = vpop.f32.mrb[115].mxu1 }
 0x401   : > { %v4820_v55 = vmul.f32 -1.442695, %v7602_v15  ;;  %v7610_v25 = vadd.f32 %v7535_v28, %v3379_v2 }
 0x402   : > { %5726 = vpow2.f32 %v4822_v32  ;;  %v4823_v42 = vmul.f32 -1.442695, %v7606_v14 }
 0x403   : > { %5728 = vpow2.f32 %v4820_v55  ;;  %v4821_v60 = vmul.f32 -1.442695, %v7610_v25 }
 0x404   : > { %v5719_v16 = vpop.eup %5718  ;;  %5730 = vpow2.f32 %v4823_v42 }
 0x405   : > { %v5721_v57 = vpop.eup %5720  ;;  %v3657_v39 = vmul.f32 %v5719_v16, %v7568_v37  ;;  %5732 = vpow2.f32 %v4821_v60 }
 0x406   : > { %v5723_v1 = vpop.eup %5722  ;;  %v3655_v10 = vmul.f32 %v5721_v57, %v7572_v45 }
 0x407   : > { %v5725_v46 = vpop.eup %5724  ;;  %v3658_v56 = vmul.f32 %v5723_v1, %v7576_v58  ;;  %v3696_v31 = vmul.f32 %v7560_v43, %v3657_v39 }
 0x408   : > { %v3656_v35 = vmul.f32 %v5725_v46, %v7581_v12  ;;  %v3694_v44 = vmul.f32 %v7560_v43, %v3655_v10 }
 0x409   : > { %v3749_v53 = vsel %vm3718_vm6, %v3696_v31, 0.0  ;;  %v3697_v51 = vmul.f32 %v7560_v43, %v3658_v56 }
 0x40a   : > { %3750 = vadd.xlane.f32.xlu0 %v3749_v53  ;;  %v3695_v7 = vmul.f32 %v7560_v43, %v3656_v35  ;;  %v3743_v58 = vsel %vm3718_vm6, %v3694_v44, 0.0 }
 0x40b   : > { %v3752_v37 = vsel %vm3718_vm6, %v3697_v51, 0.0 }
 0x40c   : > { %v5727_v49 = vpop.eup %5726  ;;  %3753 = vadd.xlane.f32.xlu1 %v3752_v37  ;;  %v3746_v18 = vsel %vm3718_vm6, %v3695_v7, 0.0 }
 0x40d   : > { %v5729_v45 = vpop.eup %5728  ;;  %v3565_v9 = vadd.f32 1.0, %v5727_v49 }
 0x40e   : > { %v5731_v4 = vpop.eup %5730  ;;  %v3563_v61 = vadd.f32 1.0, %v5729_v45  ;;  %3744 = vadd.xlane.f32.xlu0 %v3743_v58 }
 0x40f   : > { %v5733_v12 = vpop.eup %5732  ;;  %5734 = vrcp.f32 %v3565_v9  ;;  %v3566_v23 = vadd.f32 1.0, %v5731_v4  ;;  %v4979_v62 = vpop.f32.mrb[116].mxu1 }
 0x410   : > { %5736 = vrcp.f32 %v3563_v61  ;;  %v3564_v27 = vadd.f32 1.0, %v5733_v12  ;;  %v7627_v26 = vadd.f32 %v4979_v62, %v7535_v28  ;;  %v3392_v11 = vpop.f32.mrb[117].mxu1  ;;  %3747 = vadd.xlane.f32.xlu1 %v3746_v18 }
 0x411   : > { %5738 = vrcp.f32 %v3566_v23  ;;  %v7630_v5 = vadd.f32 %v7535_v28, %v3392_v11  ;;  %v4980_v6 = vpop.f32.mrb[118].mxu1 }
 0x412   : > { %5740 = vrcp.f32 %v3564_v27  ;;  %v4826_v33 = vmul.f32 -1.442695, %v7627_v26  ;;  %v7634_v54 = vadd.f32 %v4980_v6, %v7535_v28  ;;  %v3395_v63 = vpop.f32.mrb[119].mxu1 }
 0x413   : > { %v4824_v17 = vmul.f32 -1.442695, %v7630_v5  ;;  %v7638_v13 = vadd.f32 %v7535_v28, %v3395_v63 }
 0x414   : > { %5742 = vpow2.f32 %v4826_v33  ;;  %v4827_v0 = vmul.f32 -1.442695, %v7634_v54 }
 0x415   : > { %5744 = vpow2.f32 %v4824_v17  ;;  %v4825_v38 = vmul.f32 -1.442695, %v7638_v13 }
 0x416   : > { %5746 = vpow2.f32 %v4827_v0 }
 0x417   : > { %5748 = vpow2.f32 %v4825_v38 }
 0x419   : > { %v5735_v32 = vpop.eup %5734 }
 0x41a   : > { %v5737_v2 = vpop.eup %5736  ;;  %v3661_v55 = vmul.f32 %v5735_v32, %v7598_v41 }
 0x41b   : > { %v5739_v42 = vpop.eup %5738  ;;  %v3659_v60 = vmul.f32 %v5737_v2, %v7602_v15 }
 0x41c   : > { %v5741_v16 = vpop.eup %5740  ;;  %v3662_v57 = vmul.f32 %v5739_v42, %v7606_v14  ;;  %v3700_v39 = vmul.f32 %v7560_v43, %v3661_v55 }
 0x41d   : > { %v3660_v1 = vmul.f32 %v5741_v16, %v7610_v25  ;;  %v3698_v31 = vmul.f32 %v7560_v43, %v3659_v60 }
 0x41e   : > { %v5743_v10 = vpop.eup %5742  ;;  %v3761_v46 = vsel %vm3718_vm6, %v3700_v39, 0.0  ;;  %v3701_v56 = vmul.f32 %v7560_v43, %v3662_v57 }
 0x41f   : > { %v5745_v35 = vpop.eup %5744  ;;  %v3569_v53 = vadd.f32 1.0, %v5743_v10  ;;  %3762 = vadd.xlane.f32.xlu0 %v3761_v46  ;;  %v4983_v15 = vpop.f32.mrb[120].mxu1  ;;  %v3699_v14 = vmul.f32 %v7560_v43, %v3660_v1  ;;  %v3755_v4 = vsel %vm3718_vm6, %v3698_v31, 0.0 }
 0x420   : > { %v5747_v41 = vpop.eup %5746  ;;  %v3567_v51 = vadd.f32 1.0, %v5745_v35  ;;  %v3764_v44 = vsel %vm3718_vm6, %v3701_v56, 0.0  ;;  %v7653_v7 = vadd.f32 %v4983_v15, %v7535_v28  ;;  %v3408_v49 = vpop.f32.mrb[121].mxu1 }
 0x421   : > { %v5749_v37 = vpop.eup %5748  ;;  %5750 = vrcp.f32 %v3569_v53  ;;  %v3570_v25 = vadd.f32 1.0, %v5747_v41  ;;  %3765 = vadd.xlane.f32.xlu1 %v3764_v44  ;;  %v7656_v9 = vadd.f32 %v7535_v28, %v3408_v49  ;;  %v4984_v58 = vpop.f32.mrb[122].mxu1  ;;  %v3758_v27 = vsel %vm3718_vm6, %v3699_v14, 0.0 }
 0x422   : > { %5752 = vrcp.f32 %v3567_v51  ;;  %v3568_v45 = vadd.f32 1.0, %v5749_v37  ;;  %v4830_v61 = vmul.f32 -1.442695, %v7653_v7  ;;  %v7661_v12 = vadd.f32 %v4984_v58, %v7535_v28  ;;  %v3411_v23 = vpop.f32.mrb[123].mxu1 }
 0x423   : > { %5754 = vrcp.f32 %v3570_v25  ;;  %3756 = vadd.xlane.f32.xlu0 %v3755_v4  ;;  %v4828_v62 = vmul.f32 -1.442695, %v7656_v9  ;;  %v7665_v18 = vadd.f32 %v7535_v28, %v3411_v23 }
 0x424   : > { %5756 = vrcp.f32 %v3568_v45  ;;  %v4831_v11 = vmul.f32 -1.442695, %v7661_v12 }
 0x425   : > { %5758 = vpow2.f32 %v4830_v61  ;;  %3759 = vadd.xlane.f32.xlu1 %v3758_v27  ;;  %v4829_v6 = vmul.f32 -1.442695, %v7665_v18 }
 0x426   : > { %5760 = vpow2.f32 %v4828_v62 }
 0x427   : > { %5762 = vpow2.f32 %v4831_v11 }
 0x428   : > { %5764 = vpow2.f32 %v4829_v6 }
 0x42b   : > { %v5751_v33 = vpop.eup %5750 }
 0x42c   : > { %v5753_v63 = vpop.eup %5752  ;;  %v3665_v17 = vmul.f32 %v5751_v33, %v7627_v26 }
 0x42d   : > { %v5755_v0 = vpop.eup %5754  ;;  %v3663_v38 = vmul.f32 %v5753_v63, %v7630_v5 }
 0x42e   : > { %v5757_v32 = vpop.eup %5756  ;;  %v3666_v2 = vmul.f32 %v5755_v0, %v7634_v54  ;;  %v3704_v55 = vmul.f32 %v7560_v43, %v3665_v17 }
 0x42f   : > { %v5759_v42 = vpop.eup %5758  ;;  %v3664_v60 = vmul.f32 %v5757_v32, %v7638_v13  ;;  %v4987_v39 = vpop.f32.mrb[124].mxu1  ;;  %v3702_v26 = vmul.f32 %v7560_v43, %v3663_v38 }
 0x430   : > { %v5761_v16 = vpop.eup %5760  ;;  %v3573_v57 = vadd.f32 1.0, %v5759_v42  ;;  %v3773_v1 = vsel %vm3718_vm6, %v3704_v55, 0.0  ;;  %v3705_v10 = vmul.f32 %v7560_v43, %v3666_v2  ;;  %v7679_v5 = vadd.f32 %v4987_v39, %v7535_v28  ;;  %v3424_v54 = vpop.f32.mrb[125].mxu1 }
 0x431   : > { %v5763_v46 = vpop.eup %5762  ;;  %v3571_v56 = vadd.f32 1.0, %v5761_v16  ;;  %3774 = vadd.xlane.f32.xlu0 %v3773_v1  ;;  %v3703_v31 = vmul.f32 %v7560_v43, %v3664_v60  ;;  %v7683_v53 = vadd.f32 %v7535_v28, %v3424_v54  ;;  %v4988_v41 = vpop.f32.mrb[126].mxu1  ;;  %v3767_v45 = vsel %vm3718_vm6, %v3702_v26, 0.0 }
 0x432   : > { %v5765_v35 = vpop.eup %5764  ;;  %5766 = vrcp.f32 %v3573_v57  ;;  %v3574_v13 = vadd.f32 1.0, %v5763_v46  ;;  %v3776_v51 = vsel %vm3718_vm6, %v3705_v10, 0.0  ;;  %v4834_v44 = vmul.f32 -1.442695, %v7679_v5  ;;  %v3427_v37 = vpop.f32.mrb[127].mxu1 }
 0x433   : > { %5768 = vrcp.f32 %v3571_v56  ;;  %v3572_v15 = vadd.f32 1.0, %v5765_v35  ;;  %v7688_v14 = vadd.f32 %v4988_v41, %v7535_v28  ;;  %3777 = vadd.xlane.f32.xlu1 %v3776_v51  ;;  %v4832_v25 = vmul.f32 -1.442695, %v7683_v53 }
 0x434   : > { %5770 = vrcp.f32 %v3574_v13  ;;  %v7692_v49 = vadd.f32 %v7535_v28, %v3427_v37  ;;  %v3770_v61 = vsel %vm3718_vm6, %v3703_v31, 0.0 }
 0x435   : > { %5772 = vrcp.f32 %v3572_v15  ;;  %v4835_v58 = vmul.f32 -1.442695, %v7688_v14  ;;  %3768 = vadd.xlane.f32.xlu0 %v3767_v45 }
 0x436   : > { %5774 = vpow2.f32 %v4834_v44  ;;  %v4833_v4 = vmul.f32 -1.442695, %v7692_v49 }
 0x437   : > { %5776 = vpow2.f32 %v4832_v25  ;;  %3771 = vadd.xlane.f32.xlu1 %v3770_v61 }
 0x438   : > { %5778 = vpow2.f32 %v4835_v58 }
 0x439   : > { %5780 = vpow2.f32 %v4833_v4 }
 0x43c   : > { %v5767_v23 = vpop.eup %5766 }
 0x43d   : > { %v5769_v62 = vpop.eup %5768  ;;  %v3669_v27 = vmul.f32 %v5767_v23, %v7653_v7 }
 0x43e   : > { %v5771_v11 = vpop.eup %5770  ;;  %v3667_v6 = vmul.f32 %v5769_v62, %v7656_v9 }
 0x43f   : > { %v5773_v33 = vpop.eup %5772  ;;  %v3670_v63 = vmul.f32 %v5771_v11, %v7661_v12  ;;  %v3708_v17 = vmul.f32 %v7560_v43, %v3669_v27 }
 0x440   : > { %v5775_v0 = vpop.eup %5774  ;;  %v3668_v38 = vmul.f32 %v5773_v33, %v7665_v18  ;;  %v4991_v55 = vpop.f32.mrb[128].mxu1  ;;  %v3706_v7 = vmul.f32 %v7560_v43, %v3667_v6 }
 0x441   : > { %v5777_v32 = vpop.eup %5776  ;;  %v3577_v2 = vadd.f32 1.0, %v5775_v0  ;;  %v3785_v42 = vsel %vm3718_vm6, %v3708_v17, 0.0  ;;  %v3709_v60 = vmul.f32 %v7560_v43, %v3670_v63  ;;  %v3449_v9 = vadd.f32 %v4991_v55, %v7535_v28  ;;  %v3440_v39 = vpop.f32.mrb[129].mxu1 }
 0x442   : > { %v5779_v16 = vpop.eup %5778  ;;  %v3575_v57 = vadd.f32 1.0, %v5777_v32  ;;  %3786 = vadd.xlane.f32.xlu0 %v3785_v42  ;;  %v3707_v12 = vmul.f32 %v7560_v43, %v3668_v38  ;;  %v3441_v10 = vadd.f32 %v7535_v28, %v3440_v39  ;;  %v4992_v26 = vpop.f32.mrb[130].mxu1  ;;  %v3779_v13 = vsel %vm3718_vm6, %v3706_v7, 0.0 }
 0x443   : > { %v5781_v1 = vpop.eup %5780  ;;  %5782 = vrcp.f32 %v3577_v2  ;;  %v3578_v18 = vadd.f32 1.0, %v5779_v16  ;;  %v3788_v46 = vsel %vm3718_vm6, %v3709_v60, 0.0  ;;  %v4838_v54 = vmul.f32 -1.442695, %v3449_v9  ;;  %v3443_v31 = vpop.f32.mrb[131].mxu1 }
 0x444   : > { %5784 = vrcp.f32 %v3575_v57  ;;  %v3576_v56 = vadd.f32 1.0, %v5781_v1  ;;  %3789 = vadd.xlane.f32.xlu1 %v3788_v46  ;;  %v4836_v35 = vmul.f32 -1.442695, %v3441_v10  ;;  %v3782_v41 = vsel %vm3718_vm6, %v3707_v12, 0.0  ;;  %v7724_v17 = vpop.permute.xlu1 %5143  ;;  %v7731_v60 = vpop.permute.xlu0 %5173 }
 0x445   : > { %5786 = vrcp.f32 %v3578_v18  ;;  %v7727_v38 = vadd.f32 %v4992_v26, %v7535_v28  ;;  %v7736_v57 = vadd.f32 %v7535_v28, %v3443_v31  ;;  %v8587_v31 = vld [vmem:[#allocation29_spill] sm:$0xff] }
 0x446   : > { %5788 = vrcp.f32 %v3576_v56  ;;  %3780 = vadd.xlane.f32.xlu0 %v3779_v13  ;;  %v8586_v56 = vld [vmem:[#allocation27_spill] sm:$0xff] }
 0x447   : > { %5790 = vpow2.f32 %v4838_v54  ;;  %v4839_v16 = vmul.f32 -1.442695, %v7727_v38 }
 0x448   : > { %5792 = vpow2.f32 %v4836_v35  ;;  %3783 = vadd.xlane.f32.xlu1 %v3782_v41  ;;  %v7729_v2 = vpop.permute.xlu1 %5148  ;;  %v7742_v18 = vpop.permute.xlu0 %5183  ;;  %v8588_v41 = vld [vmem:[#allocation25_spill] sm:$0xff] }
 0x449   : > { %v5150_v36 = vunpack.i.l.bf16 %v7729_v2 }
 0x44c   : > { %v7738_v39 = vpop.permute.xlu1 %5153  ;;  %v7748_v46 = vpop.permute.xlu0 %5188 }
 0x44d   : > { %v5783_v51 = vpop.eup %5782 }
 0x44e   : > { %v5785_v15 = vpop.eup %5784  ;;  %v3673_v44 = vmul.f32 %v5783_v51, %v7679_v5  ;;  %v8589_v51 = vld [vmem:[#allocation28_spill] sm:$0xff] }
 0x44f   : > { %v5787_v37 = vpop.eup %5786  ;;  %v3671_v25 = vmul.f32 %v5785_v15, %v7683_v53 }
 0x450   : > { %v5789_v45 = vpop.eup %5788  ;;  %v3674_v58 = vmul.f32 %v5787_v37, %v7688_v14  ;;  %v3712_v4 = vmul.f32 %v7560_v43, %v3673_v44  ;;  %v7757_v54 = vpop.permute.xlu0 %5193 }
 0x451   : > { %v5791_v61 = vpop.eup %5790  ;;  %v3672_v23 = vmul.f32 %v5789_v45, %v7692_v49  ;;  %v3710_v33 = vmul.f32 %v7560_v43, %v3671_v25 }
 0x452   : > { %v5793_v62 = vpop.eup %5792  ;;  %v3581_v27 = vadd.f32 1.0, %v5791_v61  ;;  %v3797_v11 = vsel %vm3718_vm6, %v3712_v4, 0.0  ;;  %v3713_v6 = vmul.f32 %v7560_v43, %v3674_v58 }
 0x453   : > { %v3579_v5 = vadd.f32 1.0, %v5793_v62  ;;  %3798 = vadd.xlane.f32.xlu0 %v3797_v11  ;;  %v3711_v14 = vmul.f32 %v7560_v43, %v3672_v23  ;;  %v3791_v63 = vsel %vm3718_vm6, %v3710_v33, 0.0 }
 0x454   : > { %5794 = vrcp.f32 %v3581_v27  ;;  %v3800_v53 = vsel %vm3718_vm6, %v3713_v6, 0.0  ;;  %v7764_v15 = vpop.permute.xlu0 %5198 }
 0x455   : > { %5796 = vrcp.f32 %v3579_v5  ;;  %3801 = vadd.xlane.f32.xlu1 %v3800_v53  ;;  %v3794_v49 = vsel %vm3718_vm6, %v3711_v14, 0.0 }
 0x456   : > { %5798 = vpow2.f32 %v4839_v16  ;;  %v8591_v16 = vld [vmem:[#allocation40_spill] sm:$0xff] }
 0x457   : > { %3792 = vadd.xlane.f32.xlu0 %v3791_v63 }
 0x459   : > { %3795 = vadd.xlane.f32.xlu1 %v3794_v49  ;;  %v5934_v49 = vld [vmem:[%s6129_s15 + $0x10] sm:$0xff] }
 0x45e   : > { %v5795_v0 = vpop.eup %5794 }
 0x45f   : > { %v5797_v32 = vpop.eup %5796  ;;  %v3677_v55 = vmul.f32 %v5795_v0, %v3449_v9  ;;  %v4837_v9 = vmul.f32 -1.442695, %v7736_v57 }
 0x460   : > { %v3675_v42 = vmul.f32 %v5797_v32, %v3441_v10  ;;  %v7745_v10 = vpop.permute.xlu1 %5158  ;;  %v5799_v13 = vpop.eup %5798  ;;  %v8590_v32 = vld [vmem:[#allocation38_spill] sm:$0xff] }
 0x461   : > { %v3716_v7 = vmul.f32 %v7560_v43, %v3677_v55  ;;  %5800 = vpow2.f32 %v4837_v9  ;;  %v5936_v9 = vld [vmem:[%s6129_s15] sm:$0xff] }
 0x462   : > { %v3714_v1 = vmul.f32 %v7560_v43, %v3675_v42  ;;  %5802 = vrsqrt.f32 %v8586_v56  ;;  %v5935_v42 = vld [vmem:[%s6129_s15 + $0x18] sm:$0xff] }
 0x463   : > { %v3809_v12 = vsel %vm3718_vm6, %v3716_v7, 0.0  ;;  %5804 = vrsqrt.f32 %v8587_v31  ;;  %v8592_v31 = vld [vmem:[#allocation33_spill] sm:$0xff] }
 0x464   : > { %3810 = vadd.xlane.f32.xlu0 %v3809_v12  ;;  %v3803_v26 = vsel %vm3718_vm6, %v3714_v1, 0.0  ;;  %v7754_v28 = vpop.permute.xlu1 %5163  ;;  %5806 = vrsqrt.f32 %v8588_v41  ;;  %v7782_v12 = vstv %s5128_s19  ;;  %v5937_v41 = vld [vmem:[%s6129_s15 + $0x8] sm:$0xff] }
 0x465   : > { %5808 = vrsqrt.f32 %v8589_v51 }
 0x468   : > { %3804 = vadd.xlane.f32.xlu0 %v3803_v26  ;;  %v7760_v35 = vpop.permute.xlu1 %5168 }
 0x46a   : > { %5208 = vrot.lane.b32.xlu1 %v5207_v3, %s5991_s16  ;;  %v3582_v3 = vadd.f32 1.0, %v5799_v13 }
 0x46b   : > { %v5801_v44 = vpop.eup %5800 }
 0x46c   : > { %v7768_v48 = vpop.permute.xlu1 %5178  ;;  %v5803_v25 = vpop.eup %5802  ;;  %5810 = vrcp.f32 %v3582_v3  ;;  %v3580_v58 = vadd.f32 1.0, %v5801_v44  ;;  %v8593_v3 = vld [vmem:[#allocation35_spill] sm:$0xff] }
 0x46d   : > { %v5805_v61 = vpop.eup %5804  ;;  %v3916_v62 = vmin.f32 %v5803_v25, 1e+08 }
 0x46e   : > { %v5807_v11 = vpop.eup %5806  ;;  %v3917_v5 = vmin.f32 %v5805_v61, 1e+08 }
 0x46f   : > { %v5809_v33 = vpop.eup %5808  ;;  %v3914_v63 = vmin.f32 %v5807_v11, 1e+08  ;;  %v3948_v0 = vmul.f32 %v5934_v49, %v3916_v62  ;;  %v5145_v62 = vunpack.i.l.bf16 %v7724_v17 }
 0x470   : > { %v3915_v55 = vmin.f32 %v5809_v33, 1e+08  ;;  %v3949_v7 = vmul.f32 %v5935_v42, %v3917_v5 }
 0x471   : > { %v3946_v26 = vmul.f32 %v5936_v9, %v3914_v63  ;;  %v3983_v56 = vmul.f32 %v7782_v12, %v3948_v0 }
 0x472   : > { %v3947_v51 = vmul.f32 %v5937_v41, %v3915_v55  ;;  %v3984_v52 = vmul.f32 %v7782_v12, %v3949_v7 }
 0x474   : > { %v3727_v37 = vpop.xlane.xlu0 %3726  ;;  %v3982_v47 = vmul.f32 %v7782_v12, %v3947_v51  ;;  %v5938_v51 = vld [vmem:[%s6129_s15 + $0x30] sm:$0xff] }
 0x475   : > { %v3820_v45 = vadd.f32 %v7766_v24, %v3727_v37 }
 0x476   : > { %v3730_v4 = vpop.xlane.xlu1 %3729  ;;  %v5811_v1 = vpop.eup %5810 }
 0x477   : > { %5812 = vtanh.f32 %v3820_v45  ;;  %v3821_v23 = vadd.f32 %v7766_v24, %v3730_v4  ;;  %v3678_v37 = vmul.f32 %v5811_v1, %v7727_v38  ;;  %v3981_v45 = vmul.f32 %v7782_v12, %v3946_v26 }
 0x478   : > { %v3721_v27 = vpop.xlane.xlu0 %3720  ;;  %v5176_v26 = vunpack.i.h.bf16 %v7731_v60 }
 0x479   : > { %5814 = vtanh.f32 %v3821_v23  ;;  %v3818_v6 = vadd.f32 %v7766_v24, %v3721_v27  ;;  %v3717_v5 = vmul.f32 %v7560_v43, %v3678_v37  ;;  %v8595_v37 = vld [vmem:[#allocation47_spill] sm:$0xff] }
 0x47a   : > { %5816 = vrcp.f32 %v3580_v58  ;;  %v3724_v53 = vpop.xlane.xlu1 %3723  ;;  %v5151_v58 = vunpack.i.h.bf16 %v7729_v2  ;;  %v5146_v2 = vunpack.i.h.bf16 %v7724_v17 }
 0x47b   : > { %5818 = vtanh.f32 %v3818_v6  ;;  %v3819_v14 = vadd.f32 %v7766_v24, %v3724_v53 }
 0x47c   : > { %5820 = vrsqrt.f32 %v8590_v32 }
 0x47d   : > { %5822 = vtanh.f32 %v3819_v14 }
 0x47e   : > { %5203 = vrot.lane.b32.xlu0 %v5202_v59, %s5991_s16  ;;  %5824 = vrsqrt.f32 %v8591_v16 }
 0x47f   : > { %5826 = vrsqrt.f32 %v8592_v31 }
 0x480   : > { %5828 = vrsqrt.f32 %v8593_v3 }
 0x481   : > { %v5813_v13 = vpop.eup %5812 }
 0x482   : > { %5213 = vrot.lane.b32.xlu0 %v5212_v34, %s5991_s16  ;;  %v4015_v59 = vmul.f32 %v5813_v13, %v3983_v56  ;;  %v3812_v56 = vsel %vm3718_vm6, %v3717_v5, 0.0 }
 0x483   : > { %v5815_v44 = vpop.eup %5814 }
 0x484   : > { %v5817_v25 = vpop.eup %5816  ;;  %v4016_v4 = vmul.f32 %v5815_v44, %v3984_v52  ;;  %v7799_v61 = vsel %vm8430_vm3, %v4015_v59, %v5150_v36  ;;  %v8594_v52 = vld [vmem:[#allocation45_spill] sm:$0xff]  ;;  %v5939_v59 = vld [vmem:[%s6129_s15 + $0x38] sm:$0xff] }
 0x485   : > { %v5819_v23 = vpop.eup %5818  ;;  %v3739_v22 = vpop.xlane.xlu0 %3738  ;;  %v3676_v33 = vmul.f32 %v5817_v25, %v7736_v57  ;;  %v8596_v25 = vld [vmem:[#allocation41_spill] sm:$0xff] }
 0x486   : > { %v5821_v34 = vpop.eup %5820  ;;  %v4013_v27 = vmul.f32 %v5819_v23, %v3981_v45  ;;  %v3824_v11 = vadd.f32 %v7766_v24, %v3739_v22  ;;  %v7805_v38 = vsel %vm8430_vm3, %v4016_v4, %v5151_v58  ;;  %v5940_v45 = vld [vmem:[%s6129_s15 + $0x20] sm:$0xff] }
 0x487   : > { %v5823_v6 = vpop.eup %5822  ;;  %v3742_v53 = vpop.xlane.xlu1 %3741  ;;  %v3920_v55 = vmin.f32 %v5821_v34, 1e+08  ;;  %v3715_v31 = vmul.f32 %v7560_v43, %v3676_v33  ;;  %v8597_v34 = vld [vmem:[#allocation42_spill] sm:$0xff]  ;;  %v5161_v33 = vunpack.i.h.bf16 %v7745_v10 }
 0x488   : > { %v5825_v63 = vpop.eup %5824  ;;  %v4014_v49 = vmul.f32 %v5823_v6, %v3982_v47  ;;  %5830 = vtanh.f32 %v3824_v11  ;;  %v3825_v0 = vadd.f32 %v7766_v24, %v3742_v53  ;;  %v7814_v32 = vsel %vm8430_vm3, %v4013_v27, %v5145_v62  ;;  %v5941_v47 = vld [vmem:[%s6129_s15 + $0x28] sm:$0xff] }
 0x489   : > { %v3733_v42 = vpop.xlane.xlu0 %3732  ;;  %v5827_v17 = vpop.eup %5826  ;;  %v3921_v1 = vmin.f32 %v5825_v63, 1e+08  ;;  %v3952_v3 = vmul.f32 %v5938_v51, %v3920_v55  ;;  %v3806_v43 = vsel %vm3718_vm6, %v3715_v31, 0.0  ;;  %v5160_v27 = vunpack.i.l.bf16 %v7745_v10 }
 0x48a   : > { %5832 = vtanh.f32 %v3825_v0  ;;  %v3822_v57 = vadd.f32 %v7766_v24, %v3733_v42  ;;  %v7818_v7 = vsel %vm8430_vm3, %v4014_v49, %v5146_v2  ;;  %v5829_v16 = vpop.eup %5828  ;;  %v3918_v41 = vmin.f32 %v5827_v17, 1e+08 }
 0x48b   : > { %v3736_v9 = vpop.xlane.xlu1 %3735  ;;  %v3919_v36 = vmin.f32 %v5829_v16, 1e+08  ;;  %v3953_v44 = vmul.f32 %v5939_v59, %v3921_v1  ;;  %v3987_v4 = vmul.f32 %v7782_v12, %v3952_v3  ;;  %v5155_v42 = vunpack.i.l.bf16 %v7738_v39 }
 0x48c   : > { %5834 = vtanh.f32 %v3822_v57  ;;  %v3823_v13 = vadd.f32 %v7766_v24, %v3736_v9  ;;  %v3950_v58 = vmul.f32 %v5940_v45, %v3918_v41  ;;  %v5156_v10 = vunpack.i.h.bf16 %v7738_v39 }
 0x48d   : > { %5836 = vrsqrt.f32 %v8594_v52  ;;  %v3951_v22 = vmul.f32 %v5941_v47, %v3919_v36  ;;  %v3988_v62 = vmul.f32 %v7782_v12, %v3953_v44 }
 0x48e   : > { %3813 = vadd.xlane.f32.xlu1 %v3812_v56  ;;  %5838 = vtanh.f32 %v3823_v13  ;;  %v3985_v2 = vmul.f32 %v7782_v12, %v3950_v58 }
 0x48f   : > { %5840 = vrsqrt.f32 %v8595_v37  ;;  %v3986_v49 = vmul.f32 %v7782_v12, %v3951_v22  ;;  %v5943_v22 = vld [vmem:[%s6129_s15 + $0x58] sm:$0xff] }
 0x490   : > { %5842 = vrsqrt.f32 %v8596_v25 }
 0x491   : > { %5844 = vrsqrt.f32 %v8597_v34 }
 0x492   : > { %3807 = vadd.xlane.f32.xlu1 %v3806_v43  ;;  %v5831_v23 = vpop.eup %5830 }
 0x493   : > { %v4019_v11 = vmul.f32 %v5831_v23, %v3987_v4  ;;  %v5942_v4 = vld [vmem:[%s6129_s15 + $0x50] sm:$0xff] }
 0x494   : > { %v5833_v6 = vpop.eup %5832 }
 0x495   : > { %v4020_v5 = vmul.f32 %v5833_v6, %v3988_v62  ;;  %v7840_v53 = vsel %vm8430_vm3, %v4019_v11, %v5160_v27  ;;  %v8598_v62 = vld [vmem:[#allocation53_spill] sm:$0xff]  ;;  %v5944_v27 = vld [vmem:[%s6129_s15 + $0x40] sm:$0xff] }
 0x496   : > { %v5835_v63 = vpop.eup %5834 }
 0x497   : > { %v3751_v0 = vpop.xlane.xlu0 %3750  ;;  %v5837_v55 = vpop.eup %5836  ;;  %v4017_v17 = vmul.f32 %v5835_v63, %v3985_v2  ;;  %v7846_v16 = vsel %vm8430_vm3, %v4020_v5, %v5161_v33  ;;  %v8599_v2 = vld [vmem:[#allocation49_spill] sm:$0xff] }
 0x498   : > { %v3828_v57 = vadd.f32 %v7766_v24, %v3751_v0  ;;  %v5839_v1 = vpop.eup %5838  ;;  %v3924_v52 = vmin.f32 %v5837_v55, 1e+08  ;;  %v5945_v5 = vld [vmem:[%s6129_s15 + $0x48] sm:$0xff]  ;;  %v8600_v0 = vld [vmem:[#allocation54_spill] sm:$0xff]  ;;  %v5170_v55 = vunpack.i.l.bf16 %v7760_v35 }
 0x499   : > { %v3754_v9 = vpop.xlane.xlu1 %3753  ;;  %v5841_v31 = vpop.eup %5840  ;;  %v4018_v13 = vmul.f32 %v5839_v1, %v3986_v49  ;;  %v7853_v51 = vsel %vm8430_vm3, %v4017_v17, %v5155_v42  ;;  %v8601_v1 = vld [vmem:[#allocation50_spill] sm:$0xff] }
 0x49a   : > { %5846 = vtanh.f32 %v3828_v57  ;;  %v3829_v41 = vadd.f32 %v7766_v24, %v3754_v9  ;;  %v5843_v3 = vpop.eup %5842  ;;  %v3925_v37 = vmin.f32 %v5841_v31, 1e+08  ;;  %v3956_v23 = vmul.f32 %v5942_v4, %v3924_v52 }
 0x49b   : > { %v3745_v36 = vpop.xlane.xlu0 %3744  ;;  %v7857_v59 = vsel %vm8430_vm3, %v4018_v13, %v5156_v10  ;;  %v5845_v44 = vpop.eup %5844  ;;  %v3922_v45 = vmin.f32 %v5843_v3, 1e+08  ;;  %v5171_v10 = vunpack.i.h.bf16 %v7760_v35  ;;  %v5165_v31 = vunpack.i.l.bf16 %v7754_v28 }
 0x49c   : > { %5848 = vtanh.f32 %v3829_v41  ;;  %v3826_v39 = vadd.f32 %v7766_v24, %v3745_v36  ;;  %v3923_v47 = vmin.f32 %v5845_v44, 1e+08  ;;  %v3957_v34 = vmul.f32 %v5943_v22, %v3925_v37 }
 0x49d   : > { %v3748_v25 = vpop.xlane.xlu1 %3747  ;;  %v3954_v11 = vmul.f32 %v5944_v27, %v3922_v45  ;;  %v3991_v6 = vmul.f32 %v7782_v12, %v3956_v23  ;;  %v5166_v35 = vunpack.i.h.bf16 %v7754_v28  ;;  %v8634_v52 = vmov 0 }
 0x49e   : > { %5850 = vtanh.f32 %v3826_v39  ;;  %v3827_v58 = vadd.f32 %v7766_v24, %v3748_v25  ;;  %v3955_v63 = vmul.f32 %v5945_v5, %v3923_v47  ;;  %v3992_v49 = vmul.f32 %v7782_v12, %v3957_v34 }
 0x49f   : > { %v3989_v57 = vmul.f32 %v7782_v12, %v3954_v11 }
 0x4a0   : > { %5852 = vtanh.f32 %v3827_v58  ;;  %v3990_v9 = vmul.f32 %v7782_v12, %v3955_v63 }
 0x4a1   : > { %5854 = vrsqrt.f32 %v8598_v62 }
 0x4a2   : > { %5856 = vrsqrt.f32 %v8599_v2 }
 0x4a3   : > { %5218 = vrot.lane.b32.xlu1 %v5217_v50, %s5991_s16  ;;  %5858 = vrsqrt.f32 %v8600_v0 }
 0x4a4   : > { %v5847_v33 = vpop.eup %5846  ;;  %5860 = vrsqrt.f32 %v8601_v1 }
 0x4a5   : > { %v4023_v42 = vmul.f32 %v5847_v33, %v3991_v6  ;;  %v8602_v6 = vlaneseq  ;;  %v5946_v33 = vld [vmem:[%s6129_s15 + $0x70] sm:$0xff] }
 0x4a6   : > { %v5849_v17 = vpop.eup %5848 }
 0x4a7   : > { %v4024_v21 = vmul.f32 %v5849_v17, %v3992_v49  ;;  %v7880_v29 = vsel %vm8430_vm3, %v4023_v42, %v5170_v55  ;;  %v4051_v2 = vand.u32 127, %v8602_v6  ;;  %v8603_v49 = vld [vmem:[#allocation57_spill] sm:$0xff]  ;;  %v4046_v55 = vld [vmem:[%s630_s24] sm:$0x3]  ;;  %v4047_v42 = vstv %s7894_s1 }
 0x4a8   : > { %v5851_v50 = vpop.eup %5850 }
 0x4a9   : > { %v4021_v13 = vmul.f32 %v5851_v50, %v3989_v57  ;;  %v7885_v41 = vsel %vm8430_vm3, %v4024_v21, %v5171_v10  ;;  %v4048_v57 = vsub.s32 %v4046_v55, %v4047_v42  ;;  %v4052_v1 = vadd.s32 128, %v4051_v2  ;;  %v5947_v10 = vld [vmem:[%s6129_s15 + $0x60] sm:$0xff] }
 0x4aa   : > { %v5853_v3 = vpop.eup %5852 }
 0x4ab   : > { %v5855_v36 = vpop.eup %5854  ;;  %v4022_v39 = vmul.f32 %v5853_v3, %v3990_v9  ;;  %v7891_v44 = vsel %vm8430_vm3, %v4021_v13, %v5165_v31  ;;  %v8604_v9 = vld [vmem:[#allocation59_spill] sm:$0xff]  ;;  %v4053_v31 = vstv %s4841_s25  ;;  %v8605_v3 = vld [vmem:[#allocation32_spill] sm:$0xff] }
 0x4ac   : > { %v3763_v37 = vpop.xlane.xlu0 %3762  ;;  %v5857_v25 = vpop.eup %5856  ;;  %v3928_v4 = vmin.f32 %v5855_v36, 1e+08  ;;  %v7917_v13 = vadd.s32 %v4053_v31, %v4052_v1  ;;  %v4060_v36 = vadd.s32 8, %v8605_v3 }
 0x4ad   : > { %v3832_v45 = vadd.f32 %v7766_v24, %v3763_v37  ;;  %v7898_v58 = vsel %vm8430_vm3, %v4022_v39, %v5166_v35  ;;  %v5859_v47 = vpop.eup %5858  ;;  %v3926_v34 = vmin.f32 %v5857_v25, 1e+08  ;;  %v8606_v35 = vld [vmem:[#allocation39_spill] sm:$0xff] }
 0x4ae   : > { %v3766_v23 = vpop.xlane.xlu1 %3765  ;;  %v5861_v27 = vpop.eup %5860  ;;  %v3960_v5 = vmul.f32 %v5946_v33, %v3928_v4  ;;  %v3929_v63 = vmin.f32 %v5859_v47, 1e+08  ;;  %v7921_v39 = vrot.slane %v4048_v57, %v8606_v35  ;;  %v5948_v25 = vld [vmem:[%s6129_s15 + $0x78] sm:$0xff]  ;;  %v7925_v4 = vadd.s32 %v4053_v31, %v4051_v2 }
 0x4af   : > { %5862 = vtanh.f32 %v3832_v45  ;;  %v3833_v22 = vadd.f32 %v7766_v24, %v3766_v23  ;;  %v3958_v21 = vmul.f32 %v5947_v10, %v3926_v34  ;;  %v3927_v50 = vmin.f32 %v5861_v27, 1e+08  ;;  %v8607_v23 = vld [vmem:[#allocation37_spill] sm:$0xff] }
 0x4b0   : > { %v3757_v62 = vpop.xlane.xlu0 %3756  ;;  %v3995_v37 = vmul.f32 %v7782_v12, %v3960_v5  ;;  %v3961_v45 = vmul.f32 %v5948_v25, %v3929_v63  ;;  %v7928_v47 = vrot.slane %v4048_v57, %v8607_v23  ;;  %vm8432_vm7 = vcmp.lt.s32.totalorder %v7917_v13, 600 }
 0x4b1   : > { %5864 = vtanh.f32 %v3833_v22  ;;  %v3830_v11 = vadd.f32 %v7766_v24, %v3757_v62  ;;  %v8608_v22 = vld [vmem:[#allocation60_spill] sm:$0xff]  ;;  %vm4079_vm8 = vcmp.eq.s32.totalorder %v8605_v3, %v7921_v39  ;;  %vm4081_vm9 = vcmp.eq.s32.totalorder %v4060_v36, %v7921_v39 }
 0x4b2   : > { %5866 = vrsqrt.f32 %v8603_v49  ;;  %v3760_v0 = vpop.xlane.xlu1 %3759  ;;  %vm8429_vm10 = vcmp.lt.s32.totalorder %v7925_v4, 600  ;;  %vm4080_vm11 = vcmp.eq.s32.totalorder %v4060_v36, %v7928_v47  ;;  %vm4105_vm12 = vmand %vm4079_vm8, %vm8432_vm7  ;;  %vm4078_vm13 = vcmp.eq.s32.totalorder %v8605_v3, %v7928_v47  ;;  %v5949_v62 = vld [vmem:[%s6129_s15 + $0x68] sm:$0xff] }
 0x4b3   : > { %5868 = vtanh.f32 %v3830_v11  ;;  %v3831_v17 = vadd.f32 %v7766_v24, %v3760_v0  ;;  %v3959_v27 = vmul.f32 %v5949_v62, %v3927_v50  ;;  %v8609_v11 = vld [vmem:[#allocation58_spill] sm:$0xff]  ;;  %vm4107_vm14 = vmand %vm4081_vm9, %vm8432_vm7  ;;  %v3996_v6 = vmul.f32 %v7782_v12, %v3961_v45 }
 0x4b4   : > { %5870 = vrsqrt.f32 %v8604_v9  ;;  %vm4864_vm15 = vmpackc.low %vm4107_vm14, %vm4105_vm12  ;;  %v4061_v33 = vadd.s32 16, %v8605_v3  ;;  %v4062_v5 = vadd.s32 24, %v8605_v3  ;;  %v8427_v49 = vmov 1.0|1.0  }
 0x4b5   : > { %5872 = vtanh.f32 %v3831_v17  ;;  %4865 = vmatprep.mubr.msk.bf16.mxu1 %vm4864_vm15, %v8427_v49  ;;  %vm7953_vm0 = vmand %vm4078_vm13, %vm8429_vm10  ;;  %v3993_v42 = vmul.f32 %v7782_v12, %v3958_v21  ;;  %v3994_v21 = vmul.f32 %v7782_v12, %v3959_v27 }
 0x4b6   : > { %5874 = vrsqrt.f32 %v8608_v22  ;;  %vm7964_vm1 = vmand %vm4080_vm11, %vm8429_vm10  ;;  %vm4083_vm2 = vcmp.eq.s32.totalorder %v4061_v33, %v7921_v39  ;;  %vm4085_vm4 = vcmp.eq.s32.totalorder %v4062_v5, %v7921_v39  ;;  %vm4082_vm8 = vcmp.eq.s32.totalorder %v4061_v33, %v7928_v47 }
 0x4b7   : > { %5876 = vrsqrt.f32 %v8609_v11  ;;  %vm7979_vm6 = vmand %vm4083_vm2, %vm8432_vm7  ;;  %vm4084_vm11 = vcmp.eq.s32.totalorder %v4062_v5, %v7928_v47  ;;  %v4064_v33 = vadd.s32 40, %v8605_v3 }
 0x4b8   : > { %vm7987_vm9 = vmand %vm4085_vm4, %vm8432_vm7 }
 0x4b9   : > { %v5863_v34 = vpop.eup %5862  ;;  %vm8001_vm13 = vmand %vm4082_vm8, %vm8429_vm10  ;;  %vm4089_vm4 = vcmp.eq.s32.totalorder %v4064_v33, %v7921_v39  ;;  %vm4088_vm12 = vcmp.eq.s32.totalorder %v4064_v33, %v7928_v47 }
 0x4ba   : > { %v7946_v2 = vmul.f32 %v5863_v34, %v3995_v37  ;;  %vm8007_vm14 = vmand %vm4084_vm11, %vm8429_vm10  ;;  %v4439_v34 = vld [vmem:[%s8337_s22] sm:$0xff] }
 0x4bb   : > { %v5865_v63 = vpop.eup %5864  ;;  %vm8032_vm15 = vmand %vm4089_vm4, %vm8432_vm7 }
 0x4bc   : > { %v5867_v55 = vpop.eup %5866  ;;  %v7958_v17 = vmul.f32 %v5865_v63, %v3996_v6  ;;  %v4063_v6 = vadd.s32 32, %v8605_v3  ;;  %vm8052_vm5 = vmand %vm4088_vm12, %vm8429_vm10 }
 0x4bd   : > { %v5869_v1 = vpop.eup %5868 }
 0x4be   : > { %v5871_v10 = vpop.eup %5870  ;;  %v3775_v50 = vpop.xlane.xlu0 %3774  ;;  %v7975_v9 = vmul.f32 %v5869_v1, %v3993_v42  ;;  %vm4087_vm2 = vcmp.eq.s32.totalorder %v4063_v6, %v7921_v39  ;;  %vm4086_vm11 = vcmp.eq.s32.totalorder %v4063_v6, %v7928_v47  ;;  %v8628_v6 = vmov 0 }
 0x4bf   : > { %v5873_v36 = vpop.eup %5872  ;;  %v3836_v35 = vadd.f32 %v7766_v24, %v3775_v50  ;;  %v3932_v62 = vmin.f32 %v5871_v10, 1e+08  ;;  %v3930_v10 = vmin.f32 %v5867_v55, 1e+08  ;;  %vm8023_vm8 = vmand %vm4087_vm2, %vm8432_vm7  ;;  %v8622_v50 = vmov 0 }
 0x4c0   : > { %v3778_v25 = vpop.xlane.xlu1 %3777  ;;  %v7992_v45 = vmul.f32 %v5873_v36, %v3994_v21  ;;  %v5875_v23 = vpop.eup %5874  ;;  %v8623_v50 = vsel %vm8023_vm8, 4294967295, %v8622_v50  ;;  %v5950_v36 = vld [vmem:[%s6129_s15 + $0x90] sm:$0xff]  ;;  %vm8045_vm4 = vmand %vm4086_vm11, %vm8429_vm10 }
 0x4c1   : > { %5878 = vtanh.f32 %v3836_v35  ;;  %v3837_v22 = vadd.f32 %v7766_v24, %v3778_v25  ;;  %v5877_v5 = vpop.eup %5876  ;;  %v3933_v42 = vmin.f32 %v5875_v23, 1e+08  ;;  %v3964_v35 = vmul.f32 %v5950_v36, %v3932_v62  ;;  %v8624_v25 = vld [vmem:[#allocation70_spill] sm:$0xff] }
 0x4c2   : > { %v3769_v27 = vpop.xlane.xlu0 %3768  ;;  %v3931_v23 = vmin.f32 %v5877_v5, 1e+08  ;;  %v8629_v6 = vsel %vm8045_vm4, 4294967295, %v8628_v6  ;;  %v8630_v5 = vmov 0  ;;  %v4066_v36 = vadd.s32 56, %v8605_v3 }
 0x4c3   : > { %5880 = vtanh.f32 %v3837_v22  ;;  %v3834_v63 = vadd.f32 %v7766_v24, %v3769_v27  ;;  %v5951_v22 = vld [vmem:[%s6129_s15 + $0x98] sm:$0xff]  ;;  %v8627_v27 = vld [vmem:[#allocation72_spill] sm:$0xff]  ;;  %v8631_v5 = vsel %vm8052_vm5, 4294967295, %v8630_v5  ;;  %vm8642_vm4 = vcmp.lt.s32.totalorder %v7925_v4, 600 }
 0x4c4   : > { %v3772_v1 = vpop.xlane.xlu1 %3771  ;;  %v3965_v62 = vmul.f32 %v5951_v22, %v3933_v42  ;;  %v4065_v42 = vadd.s32 48, %v8605_v3  ;;  %vm4093_vm2 = vcmp.eq.s32.totalorder %v4066_v36, %v7921_v39 }
 0x4c5   : > { %5882 = vtanh.f32 %v3834_v63  ;;  %v3835_v21 = vadd.f32 %v7766_v24, %v3772_v1  ;;  %v5952_v63 = vld [vmem:[%s6129_s15 + $0x80] sm:$0xff]  ;;  %v3999_v1 = vmul.f32 %v7782_v12, %v3964_v35  ;;  %vm8081_vm3 = vmand %vm4093_vm2, %vm8432_vm7  ;;  %vm8640_vm2 = vcmask 23552  }
 0x4c6   : > { %5884 = vrsqrt.f32 %v8624_v25  ;;  %v3962_v33 = vmul.f32 %v5952_v63, %v3930_v10  ;;  %v5953_v25 = vld [vmem:[%s6129_s15 + $0x88] sm:$0xff]  ;;  %v4000_v63 = vmul.f32 %v7782_v12, %v3965_v62  ;;  %vm4091_vm12 = vcmp.eq.s32.totalorder %v4065_v42, %v7921_v39 }
 0x4c7   : > { %5886 = vtanh.f32 %v3835_v21  ;;  %v8632_v21 = vld [vmem:[#allocation66_spill] sm:$0xff]  ;;  %v3963_v22 = vmul.f32 %v5953_v25, %v3931_v23  ;;  %vm8072_vm11 = vmand %vm4091_vm12, %vm8432_vm7  ;;  %vm4090_vm10 = vcmp.eq.s32.totalorder %v4065_v42, %v7928_v47  ;;  %v5181_v23 = vunpack.i.h.bf16 %v7768_v48 }
 0x4c8   : > { %5888 = vrsqrt.f32 %v8627_v27  ;;  %v8633_v27 = vld [vmem:[#allocation68_spill] sm:$0xff]  ;;  %v8635_v52 = vsel %vm8072_vm11, 4294967295, %v8634_v52  ;;  %v5180_v62 = vunpack.i.l.bf16 %v7768_v48  ;;  %vm8641_vm7 = vmmov %vm8640_vm2  ;;  %vm8646_vm11 = vcmp.eq.s32.totalorder %v4066_v36, %v7928_v47 }
 0x4c9   : > { %5890 = vrsqrt.f32 %v8632_v21  ;;  %v3997_v21 = vmul.f32 %v7782_v12, %v3962_v33  ;;  %8636 = vst [vmem:[#allocation61_spill] sm:$0xff] %v8635_v52  ;;  %v3998_v25 = vmul.f32 %v7782_v12, %v3963_v22  ;;  %vm8099_vm5 = vmand %vm4090_vm10, %vm8642_vm4  ;;  %v8643_v22 = vmov 0 }
 0x4ca   : > { %5892 = vrsqrt.f32 %v8633_v27  ;;  %v5175_v27 = vunpack.i.l.bf16 %v7731_v60  ;;  %v8644_v22 = vsel %vm8099_vm5, 4294967295, %v8643_v22  ;;  %vm8645_vm12 = vmmov %vm8642_vm4  ;;  %v4068_v36 = vadd.s32 72, %v8605_v3 }
 0x4cb   : > { %v5879_v10 = vpop.eup %5878  ;;  %vm8649_vm4 = vmmov %vm8641_vm7 }
 0x4cc   : > { %v4031_v49 = vmul.f32 %v5879_v10, %v3999_v1  ;;  %v8637_v10 = vmov 0 }
 0x4cd   : > { %v5881_v35 = vpop.eup %5880  ;;  %v8638_v10 = vsel %vm8081_vm3, 4294967295, %v8637_v10 }
 0x4ce   : > { %v4032_v1 = vmul.f32 %v5881_v35, %v4000_v63  ;;  %8639 = vst [vmem:[#allocation8_spill] sm:$0xff] %v8638_v10  ;;  %v4328_v56 = vsel %vm8640_vm2, %v4031_v49, %v5180_v62  ;;  %vm8108_vm2 = vmand %vm8646_vm11, %vm8645_vm12  ;;  %vm4097_vm12 = vcmp.eq.s32.totalorder %v4068_v36, %v7921_v39 }
 0x4cf   : > { %v5883_v33 = vpop.eup %5882  ;;  %v3787_v28 = vpop.xlane.xlu0 %3786 }
 0x4d0   : > { %v5885_v48 = vpop.eup %5884  ;;  %v3840_v63 = vadd.f32 %v7766_v24, %v3787_v28  ;;  %v4029_v35 = vmul.f32 %v5883_v33, %v3997_v21  ;;  %v4329_v43 = vsel %vm8641_vm7, %v4032_v1, %v5181_v23  ;;  %v8647_v28 = vmov 0  ;;  %v8702_v57 = vld [vmem:[#allocation61_spill] sm:$0xff] }
 0x4d1   : > { %v5887_v14 = vpop.eup %5886  ;;  %v3790_v52 = vpop.xlane.xlu1 %3789  ;;  %v4351_v10 = vpack.c.bf16 %v4329_v43, %v4328_v56  ;;  %v8648_v28 = vsel %vm8108_vm2, 4294967295, %v8647_v28  ;;  %v3936_v60 = vmin.f32 %v5885_v48, 1e+08  ;;  %v4067_v43 = vadd.s32 64, %v8605_v3 }
 0x4d2   : > { %v5889_v49 = vpop.eup %5888  ;;  %5894 = vtanh.f32 %v3840_v63  ;;  %v3841_v42 = vadd.f32 %v7766_v24, %v3790_v52  ;;  %v4030_v21 = vmul.f32 %v5887_v14, %v3998_v25  ;;  %v4326_v23 = vsel %vm8641_vm7, %v4029_v35, %v5175_v27  ;;  %v5954_v35 = vld [vmem:[%s6129_s15 + $0xb0] sm:$0xff] }
 0x4d3   : > { %v3781_v56 = vpop.xlane.xlu0 %3780  ;;  %v5891_v62 = vpop.eup %5890  ;;  %v3937_v33 = vmin.f32 %v5889_v49, 1e+08  ;;  %vm4095_vm11 = vcmp.eq.s32.totalorder %v4067_v43, %v7921_v39  ;;  %vm8650_vm7 = vcmp.lt.s32.totalorder %v7917_v13, 600  ;;  %v3968_v49 = vmul.f32 %v5954_v35, %v3936_v60 }
 0x4d4   : > { %5896 = vtanh.f32 %v3841_v42  ;;  %v3838_v1 = vadd.f32 %v7766_v24, %v3781_v56  ;;  %v4327_v14 = vsel %vm8649_vm4, %v4030_v21, %v5176_v26  ;;  %v5893_v52 = vpop.eup %5892  ;;  %vm8127_vm10 = vmand %vm4095_vm11, %vm8650_vm7  ;;  %vm4094_vm4 = vcmp.eq.s32.totalorder %v4067_v43, %v7928_v47 }
 0x4d5   : > { %v3784_v25 = vpop.xlane.xlu1 %3783  ;;  %v4350_v27 = vpack.c.bf16 %v4327_v14, %v4326_v23  ;;  %v3934_v26 = vmin.f32 %v5891_v62, 1e+08  ;;  %vm8653_vm5 = vmmov %vm8650_vm7  ;;  %vm4096_vm11 = vcmp.eq.s32.totalorder %v4068_v36, %v7928_v47  ;;  %v3935_v21 = vmin.f32 %v5893_v52, 1e+08  ;;  %v5956_v36 = vld [vmem:[%s6129_s15 + $0xa0] sm:$0xff]  ;;  %v8664_v52 = vld [vmem:[#allocation81_spill] sm:$0xff] }
 0x4d6   : > { %5898 = vtanh.f32 %v3838_v1  ;;  %v3839_v48 = vadd.f32 %v7766_v24, %v3784_v25  ;;  %vm8136_vm2 = vmand %vm4097_vm12, %vm8653_vm5  ;;  %v8656_v23 = vpack.c.bf16 %v7818_v7, %v7814_v32  ;;  %vm8657_vm5 = vcmp.lt.s32.totalorder %v7925_v4, 600  ;;  %v5957_v1 = vld [vmem:[%s6129_s15 + $0xa8] sm:$0xff] }
 0x4d7   : > { %5900 = vrsqrt.f32 %v6886_v19  ;;  %4907 = vmatprep.subr.bf16.mxu1 %v4350_v27  ;;  %v5955_v19 = vld [vmem:[%s6129_s15 + $0xb8] sm:$0xff]  ;;  %vm8154_vm12 = vmand %vm4094_vm4, %vm8657_vm5  ;;  %v8658_v56 = vmov 0  ;;  %v8661_v32 = vmov 0  ;;  %v4069_v7 = vadd.s32 80, %v8605_v3  ;;  %v8700_v0 = vld [vmem:[#allocation8_spill] sm:$0xff] }
 0x4d8   : > { %5902 = vtanh.f32 %v3839_v48  ;;  %4908 = vmatpush3.bf16.msra.mxu1 %v8656_v23  ;;  %v3969_v60 = vmul.f32 %v5955_v19, %v3937_v33  ;;  %v8659_v56 = vsel %vm8154_vm12, 4294967295, %v8658_v56  ;;  %vm8660_vm3 = vmmov %vm8657_vm5  ;;  %v3966_v62 = vmul.f32 %v5956_v36, %v3934_v26 }
 0x4d9   : > { %5904 = vrsqrt.f32 %v6927_v8  ;;  %4909 = vmatprep.subr.bf16.mxu1 %v4351_v10  ;;  %vm8160_vm8 = vmand %vm4096_vm11, %vm8660_vm3  ;;  %v4003_v8 = vmul.f32 %v7782_v12, %v3968_v49  ;;  %v8663_v10 = vld [vmem:[#allocation79_spill] sm:$0xff]  ;;  %v3967_v14 = vmul.f32 %v5957_v1, %v3935_v21  ;;  %v8665_v33 = vpack.c.bf16 %v7805_v38, %v7799_v61 }
 0x4da   : > { %v8662_v32 = vsel %vm8160_vm8, 4294967295, %v8661_v32  ;;  %5906 = vrsqrt.f32 %v8663_v10  ;;  %vm4099_vm3 = vcmp.eq.s32.totalorder %v4069_v7, %v7921_v39  ;;  %vm4098_vm11 = vcmp.eq.s32.totalorder %v4069_v7, %v7928_v47  ;;  %vm8666_vm5 = vmmov %vm8650_vm7 }
 0x4db   : > { %5908 = vrsqrt.f32 %v8664_v52  ;;  %v4004_v3 = vmul.f32 %v7782_v12, %v3969_v60  ;;  %v5190_v25 = vunpack.i.l.bf16 %v7748_v46  ;;  %vm8183_vm4 = vmand %vm4099_vm3, %vm8666_vm5  ;;  %v4001_v35 = vmul.f32 %v7782_v12, %v3966_v62 }
 0x4dc   : > { %v5895_v43 = vpop.eup %5894  ;;  %4910 = vmatpush3.bf16.msra.mxu1 %v8665_v33  ;;  %v5191_v61 = vunpack.i.h.bf16 %v7748_v46  ;;  %vm8669_vm7 = vcmask 23552   ;;  %vm8670_vm12 = vcmp.lt.s32.totalorder %v7925_v4, 600  ;;  %v4002_v13 = vmul.f32 %v7782_v12, %v3967_v14 }
 0x4dd   : > { %v4035_v27 = vmul.f32 %v5895_v43, %v4003_v8  ;;  %vm8192_vm8 = vmand %vm4098_vm11, %vm8670_vm12  ;;  %v5185_v19 = vunpack.i.l.bf16 %v7742_v18  ;;  %v5186_v62 = vunpack.i.h.bf16 %v7742_v18 }
 0x4de   : > { %v5897_v26 = vpop.eup %5896  ;;  %vm8673_vm3 = vmmov %vm8669_vm7 }
 0x4df   : > { %v4036_v38 = vmul.f32 %v5897_v26, %v4004_v3  ;;  %v4332_v39 = vsel %vm8669_vm7, %v4035_v27, %v5190_v25  ;;  %vm8674_vm7 = vmmov %vm8673_vm3 }
 0x4e0   : > { %v5899_v49 = vpop.eup %5898  ;;  %v3799_v21 = vpop.xlane.xlu0 %3798  ;;  %vm8675_vm12 = vmmov %vm8673_vm3 }
 0x4e1   : > { %v5901_v23 = vpop.eup %5900  ;;  %v3844_v60 = vadd.f32 %v7766_v24, %v3799_v21  ;;  %v4033_v7 = vmul.f32 %v5899_v49, %v4001_v35  ;;  %v4333_v46 = vsel %vm8673_vm3, %v4036_v38, %v5191_v61  ;;  %v5958_v49 = vld [vmem:[%s6129_s15 + $0xd0] sm:$0xff]  ;;  %vm8677_vm11 = vmmov %vm8673_vm3 }
 0x4e2   : > { %v5903_v36 = vpop.eup %5902  ;;  %v3802_v4 = vpop.xlane.xlu1 %3801  ;;  %v4353_v8 = vpack.c.bf16 %v4333_v46, %v4332_v39  ;;  %v3940_v52 = vmin.f32 %v5901_v23, 1e+08  ;;  %v8676_v23 = vpack.c.bf16 %v7857_v59, %v7853_v51  ;;  %vm8678_vm5 = vmmov %vm8673_vm3  ;;  %v8679_v59 = vpack.c.bf16 %v7846_v16, %v7840_v53 }
 0x4e3   : > { %v5905_v10 = vpop.eup %5904  ;;  %5910 = vtanh.f32 %v3844_v60  ;;  %v3845_v43 = vadd.f32 %v7766_v24, %v3802_v4  ;;  %v4034_v1 = vmul.f32 %v5903_v36, %v4002_v13  ;;  %v4330_v14 = vsel %vm8674_vm7, %v4033_v7, %v5185_v19  ;;  %v5959_v19 = vld [vmem:[%s6129_s15 + $0xd8] sm:$0xff]  ;;  %vm8680_vm7 = vmmov %vm8673_vm3 }
 0x4e4   : > { %v3793_v33 = vpop.xlane.xlu0 %3792  ;;  %v5907_v3 = vpop.eup %5906  ;;  %v3941_v26 = vmin.f32 %v5905_v10, 1e+08  ;;  %v3972_v13 = vmul.f32 %v5958_v49, %v3940_v52  ;;  %v5195_v53 = vunpack.i.l.bf16 %v7757_v54 }
 0x4e5   : > { %5912 = vtanh.f32 %v3845_v43  ;;  %v3842_v25 = vadd.f32 %v7766_v24, %v3793_v33  ;;  %v4331_v27 = vsel %vm8675_vm12, %v4034_v1, %v5186_v62  ;;  %v5909_v18 = vpop.eup %5908  ;;  %v3938_v39 = vmin.f32 %v5907_v3, 1e+08  ;;  %v5960_v62 = vld [vmem:[%s6129_s15 + $0xc0] sm:$0xff]  ;;  %v5961_v1 = vld [vmem:[%s6129_s15 + $0xc8] sm:$0xff]  ;;  %vm8681_vm12 = vmmov %vm8673_vm3 }
 0x4e6   : > { %v3796_v35 = vpop.xlane.xlu1 %3795  ;;  %v4352_v61 = vpack.c.bf16 %v4331_v27, %v4330_v14  ;;  %v3939_v21 = vmin.f32 %v5909_v18, 1e+08  ;;  %v3973_v60 = vmul.f32 %v5959_v19, %v3941_v26  ;;  %v4007_v10 = vmul.f32 %v7782_v12, %v3972_v13 }
 0x4e7   : > { %5914 = vtanh.f32 %v3842_v25  ;;  %v3843_v38 = vadd.f32 %v7766_v24, %v3796_v35  ;;  %v3970_v4 = vmul.f32 %v5960_v62, %v3938_v39  ;;  %v5200_v18 = vunpack.i.l.bf16 %v7764_v15 }
 0x4e8   : > { %4911 = vmatprep.subr.bf16.mxu1 %v4352_v61  ;;  %v3971_v14 = vmul.f32 %v5961_v1, %v3939_v21  ;;  %v5196_v13 = vunpack.i.h.bf16 %v7757_v54  ;;  %v8685_v54 = vld [vmem:[#allocation87_spill] sm:$0xff] }
 0x4e9   : > { %5916 = vtanh.f32 %v3843_v38  ;;  %4912 = vmatpush3.bf16.msra.mxu1 %v8676_v23  ;;  %v4005_v27 = vmul.f32 %v7782_v12, %v3970_v4 }
 0x4ea   : > { %v5209_v7 = vpop.permute.xlu1 %5208  ;;  %4913 = vmatprep.subr.bf16.mxu1 %v4353_v8  ;;  %v4008_v8 = vmul.f32 %v7782_v12, %v3973_v60  ;;  %v4006_v35 = vmul.f32 %v7782_v12, %v3971_v14  ;;  %v8683_v60 = vpack.c.bf16 %v7898_v58, %v7891_v44  ;;  %5918 = vrsqrt.f32 %v6966_v20 }
 0x4eb   : > { %v5211_v46 = vunpack.i.h.bf16 %v5209_v7  ;;  %v5210_v36 = vunpack.i.l.bf16 %v5209_v7  ;;  %v8684_v7 = vpack.c.bf16 %v7885_v41, %v7880_v29  ;;  %5920 = vrsqrt.f32 %v7230_v30 }
 0x4ec   : > { %5922 = vrsqrt.f32 %v6975_v40 }
 0x4ed   : > { %v5911_v43 = vpop.eup %5910  ;;  %v8216_v52 = vsel %vm8677_vm11, %v7992_v45, %v5211_v46  ;;  %v8220_v51 = vsel %vm8678_vm5, %v7975_v9, %v5210_v36  ;;  %4914 = vmatpush3.bf16.msra.mxu1 %v8679_v59  ;;  %v5201_v45 = vunpack.i.h.bf16 %v7764_v15  ;;  %vm8682_vm11 = vmmov %vm8673_vm3  ;;  %5924 = vrsqrt.f32 %v8685_v54 }
 0x4ee   : > { %v4348_v33 = vpack.c.bf16 %v8216_v52, %v8220_v51  ;;  %v4039_v3 = vmul.f32 %v5911_v43, %v4007_v10  ;;  %vm8686_vm5 = vmmov %vm8673_vm3  ;;  %v4442_v52 = vld [vmem:[%s8337_s22 + $0x18] sm:$0xff] }
 0x4ef   : > { %v5913_v25 = vpop.eup %5912 }
 0x4f0   : > { %v4040_v26 = vmul.f32 %v5913_v25, %v4008_v8  ;;  %v4336_v61 = vsel %vm8673_vm3, %v4039_v3, %v5200_v18 }
 0x4f1   : > { %v5915_v9 = vpop.eup %5914  ;;  %v3811_v46 = vpop.xlane.xlu0 %3810 }
 0x4f2   : > { %v4037_v16 = vmul.f32 %v5915_v9, %v4005_v27  ;;  %v4337_v38 = vsel %vm8680_vm7, %v4040_v26, %v5201_v45  ;;  %v3848_v44 = vadd.f32 %v7766_v24, %v3811_v46  ;;  %v5962_v45 = vld [vmem:[%s6129_s15 + $0xe0] sm:$0xff]  ;;  %v5963_v26 = vld [vmem:[%s6129_s15 + $0xf8] sm:$0xff]  ;;  %vm8687_vm7 = vmmov %vm8673_vm3 }
 0x4f3   : > { %v5917_v39 = vpop.eup %5916  ;;  %v4355_v49 = vpack.c.bf16 %v4337_v38, %v4336_v61  ;;  %v5965_v38 = vld [vmem:[%s6129_s15 + $0xf0] sm:$0xff] }
 0x4f4   : > { %v4038_v21 = vmul.f32 %v5917_v39, %v4006_v35  ;;  %v4334_v23 = vsel %vm8681_vm12, %v4037_v16, %v5195_v53  ;;  %v5919_v10 = vpop.eup %5918  ;;  %v5964_v16 = vld [vmem:[%s6129_s15 + $0xe8] sm:$0xff]  ;;  %vm8688_vm12 = vmmov %vm8673_vm3 }
 0x4f5   : > { %v3805_v36 = vpop.xlane.xlu0 %3804  ;;  %v5921_v29 = vpop.eup %5920  ;;  %v3942_v43 = vmin.f32 %v5919_v10, 1e+08 }
 0x4f6   : > { %v4335_v15 = vsel %vm8682_vm11, %v4038_v21, %v5196_v13  ;;  %v3846_v62 = vadd.f32 %v7766_v24, %v3805_v36  ;;  %v5923_v20 = vpop.eup %5922  ;;  %v3945_v1 = vmin.f32 %v5921_v29, 1e+08  ;;  %vm8689_vm11 = vmmov %vm8673_vm3 }
 0x4f7   : > { %v4354_v19 = vpack.c.bf16 %v4335_v15, %v4334_v23  ;;  %v5925_v41 = vpop.eup %5924  ;;  %v3943_v14 = vmin.f32 %v5923_v20, 1e+08  ;;  %v3974_v18 = vmul.f32 %v5962_v45, %v3942_v43 }
 0x4f8   : > { %5926 = vtanh.f32 %v3846_v62  ;;  %v3944_v59 = vmin.f32 %v5925_v41, 1e+08  ;;  %v3977_v9 = vmul.f32 %v5963_v26, %v3945_v1 }
 0x4f9   : > { %4915 = vmatprep.subr.bf16.mxu1 %v4354_v19  ;;  %v5204_v3 = vpop.permute.xlu0 %5203  ;;  %v3975_v61 = vmul.f32 %v5964_v16, %v3943_v14  ;;  %v4009_v21 = vmul.f32 %v7782_v12, %v3974_v18 }
 0x4fa   : > { %4916 = vmatpush3.bf16.msra.mxu1 %v8683_v60  ;;  %v3976_v39 = vmul.f32 %v5965_v38, %v3944_v59  ;;  %v4012_v23 = vmul.f32 %v7782_v12, %v3977_v9  ;;  %v5206_v54 = vunpack.i.h.bf16 %v5204_v3  ;;  %v5205_v36 = vunpack.i.l.bf16 %v5204_v3  ;;  %v4443_v59 = vld [vmem:[%s8337_s22 + $0x20] sm:$0xff]  ;;  %v4446_v38 = vld [vmem:[%s8337_s22 + $0x38] sm:$0xff] }
 0x4fb   : > { %4917 = vmatprep.subr.bf16.mxu1 %v4355_v49  ;;  %v4010_v60 = vmul.f32 %v7782_v12, %v3975_v61 }
 0x4fd   : > { %v5214_v19 = vpop.permute.xlu0 %5213 }
 0x4fe   : > { %4918 = vmatpush3.bf16.msra.mxu1 %v8684_v7  ;;  %v5216_v62 = vunpack.i.h.bf16 %v5214_v19 }
 0x502   : > { %v5927_v53 = vpop.eup %5926 }
 0x503   : > { %v4041_v7 = vmul.f32 %v5927_v53, %v4009_v21 }
 0x505   : > { %v4338_v10 = vsel %vm8687_vm7, %v4041_v7, %v5205_v36  ;;  %vm8693_vm7 = vmpackc.low %vm7987_vm9, %vm7979_vm6  ;;  %vm8698_vm6 = vnez %v8629_v6  ;;  %v4440_v6 = vld [vmem:[%s8337_s22 + $0x8] sm:$0xff] }
 0x506   : > { %v4448_v7 = vld [vmem:[%s8337_s22 + $0x48] sm:$0xff] }
 0x51b   : > { %v3814_v4 = vpop.xlane.xlu1 %3813 }
 0x51c   : > { %v3849_v58 = vadd.f32 %v7766_v24, %v3814_v4  ;;  %v5215_v4 = vunpack.i.l.bf16 %v5214_v19 }
 0x51e   : > { %5928 = vtanh.f32 %v3849_v58 }
 0x51f   : > { %v3808_v30 = vpop.xlane.xlu1 %3807  ;;  %5930 = vtanh.f32 %v3848_v44 }
 0x520   : > { %v3847_v40 = vadd.f32 %v7766_v24, %v3808_v30 }
 0x522   : > { %5932 = vtanh.f32 %v3847_v40  ;;  %v8691_v40 = vmov 1.0|1.0  }
 0x523   : > { %v5219_v8 = vpop.permute.xlu1 %5218 }
 0x524   : > { %v5221_v25 = vunpack.i.h.bf16 %v5219_v8  ;;  %v5220_v27 = vunpack.i.l.bf16 %v5219_v8 }
 0x526   : > { %v4325_v35 = vsel %vm8686_vm5, %v7958_v17, %v5221_v25  ;;  %v4324_v24 = vsel %vm8673_vm3, %v7946_v2, %v5220_v27  ;;  %v4011_v17 = vmul.f32 %v7782_v12, %v3976_v39  ;;  %vm8690_vm5 = vmmov %vm8673_vm3  ;;  %v4444_v27 = vld [vmem:[%s8337_s22 + $0x28] sm:$0xff] }
 0x527   : > { %v4349_v49 = vpack.c.bf16 %v4325_v35, %v4324_v24  ;;  %vm8692_vm3 = vmpackc.low %vm7964_vm1, %vm7953_vm0  ;;  %vm8695_vm0 = vnez %v8623_v50  ;;  %v4445_v24 = vld [vmem:[%s8337_s22 + $0x30] sm:$0xff] }
 0x528   : > { %v5929_v13 = vpop.eup %5928  ;;  %vm8696_vm1 = vmpackc.low %vm8032_vm15, %vm8695_vm0  ;;  %vm8706_vm15 = vnez %v8644_v22 }
 0x529   : > { %v5931_v15 = vpop.eup %5930  ;;  %v4044_v46 = vmul.f32 %v5929_v13, %v4012_v23  ;;  %vm4884_vm0 = vmpackc.low %vm8183_vm4, %vm8183_vm4 }
 0x52a   : > { %v4043_v58 = vmul.f32 %v5931_v15, %v4011_v17  ;;  %v4447_v15 = vld [vmem:[%s8337_s22 + $0x40] sm:$0xff] }
 0x52b   : > { %v4341_v20 = vsel %vm8689_vm11, %v4044_v46, %v5216_v62  ;;  %vm8697_vm11 = vnez %v8631_v5 }
 0x52c   : > { %v5933_v2 = vpop.eup %5932  ;;  %v4340_v41 = vsel %vm8690_vm5, %v4043_v58, %v5215_v4  ;;  %vm8699_vm9 = vmpackc.low %vm8697_vm11, %vm8698_vm6  ;;  %vm8701_vm5 = vnez %v8700_v0  ;;  %vm8710_vm11 = vnez %v8659_v56  ;;  %v4441_v56 = vld [vmem:[%s8337_s22 + $0x10] sm:$0xff] }
 0x52d   : > { %v4042_v44 = vmul.f32 %v5933_v2, %v4010_v60  ;;  %v4357_v12 = vpack.c.bf16 %v4341_v20, %v4340_v41  ;;  %v4449_v4 = vld [vmem:[%s8337_s22 + $0x50] sm:$0xff] }
 0x52f   : > { %v4339_v29 = vsel %vm8688_vm12, %v4042_v44, %v5206_v54  ;;  %vm8694_vm12 = vmpackc.low %vm8007_vm14, %vm8001_vm13  ;;  %vm8703_vm13 = vnez %v8702_v57 }
 0x530   : > { %v4356_v30 = vpack.c.bf16 %v4339_v29, %v4338_v10  ;;  %vm8704_vm14 = vmpackc.low %vm8701_vm5, %vm8703_vm13 }
 0x532   : > { %4919 = vmatprep.subr.bf16.mxu1 %v4356_v30 }
 0x533   : > { %4920 = vmatpush3.bf16.msra.mxu1 %v4348_v33 }
 0x534   : > { %4921 = vmatprep.subr.bf16.mxu1 %v4357_v12 }
 0x537   : > { %4922 = vmatpush3.bf16.msra.mxu1 %v4349_v49 }
 0x53a   : > { %4867 = vmatmul.mubr.msk.bf16.vlgmr.msra.gmra.mrb[132].mxu1 %vm8692_vm3, %v8691_v40  ;;  %vm8705_vm3 = vnez %v8648_v28 }
 0x53b   : > { %4869 = vmatprep.mubr.msk.bf16.mxu1 %vm8693_vm7, %v8691_v40  ;;  %vm8707_vm7 = vmpackc.low %vm8705_vm3, %vm8706_vm15 }
 0x542   : > { %4871 = vmatmul.mubr.msk.bf16.gmra.mrb[136].mxu1 %vm8694_vm12, %v8691_v40  ;;  %vm8708_vm12 = vmpackc.low %vm8136_vm2, %vm8127_vm10  ;;  %vm4461_vm2 = vcmask 154624  }
 0x543   : > { %4873 = vmatprep.mubr.msk.bf16.mxu1 %vm8696_vm1, %v8691_v40  ;;  %vm8709_vm1 = vnez %v8662_v32 }
 0x544   : > { %vm8711_vm6 = vmpackc.low %vm8709_vm1, %vm8710_vm11 }
 0x54a   : > { %4875 = vmatmul.mubr.msk.bf16.gmra.mrb[140].mxu1 %vm8699_vm9, %v8691_v40  ;;  %vm4886_vm9 = vmpackc.low %vm8192_vm8, %vm8192_vm8 }
 0x54b   : > { %4877 = vmatprep.mubr.msk.bf16.mxu1 %vm8704_vm14, %v8691_v40 }
 0x552   : > { %4879 = vmatmul.mubr.msk.bf16.gmra.mrb[144].mxu1 %vm8707_vm7, %v8691_v40 }
 0x553   : > { %4881 = vmatprep.mubr.msk.bf16.mxu1 %vm8708_vm12, %v8691_v40 }
 0x55a   : > { %4883 = vmatmul.mubr.msk.bf16.gmra.mrb[148].mxu1 %vm8711_vm6, %v8691_v40 }
 0x55b   : > { %4885 = vmatprep.mubr.msk.bf16.mxu1 %vm4884_vm0, %v8691_v40 }
 0x562   : > { %4887 = vmatmul.mubr.msk.bf16.gmra.mrb[152].mxu1 %vm4886_vm9, %v8691_v40 }
 0x60d   : > { %v4923_v31 = vpop.f32.mrb[132].mxu1 }
 0x60e   : > { %v4924_v37 = vpop.f32.mrb[133].mxu1 }
 0x60f   : > { %v4925_v11 = vadd.f32 %v4924_v37, %v4923_v31  ;;  %v4926_v50 = vpop.f32.mrb[134].mxu1 }
 0x610   : > { %v4927_v55 = vpop.f32.mrb[135].mxu1 }
 0x611   : > { %v4450_v5 = vadd.f32 %v4925_v11, %v4439_v34  ;;  %v4928_v22 = vadd.f32 %v4927_v55, %v4926_v50 }
 0x613   : > { %4462 = vst.msk [vmem:[%s8337_s22] sm:$0xff] %vm4461_vm2, %v4450_v5  ;;  %v4451_v28 = vadd.f32 %v4928_v22, %v4440_v6 }
 0x615   : > { %4463 = vst.msk [vmem:[%s8337_s22 + $0x8] sm:$0xff] %vm4461_vm2, %v4451_v28  ;;  %v4929_v63 = vpop.f32.mrb[136].mxu1 }
 0x616   : > { %v4930_v42 = vpop.f32.mrb[137].mxu1 }
 0x617   : > { %v4931_v32 = vadd.f32 %v4930_v42, %v4929_v63  ;;  %v4932_v48 = vpop.f32.mrb[138].mxu1 }
 0x618   : > { %v4933_v47 = vpop.f32.mrb[139].mxu1 }
 0x619   : > { %v4452_v51 = vadd.f32 %v4931_v32, %v4441_v56  ;;  %v4934_v33 = vadd.f32 %v4933_v47, %v4932_v48 }
 0x61b   : > { %4464 = vst.msk [vmem:[%s8337_s22 + $0x10] sm:$0xff] %vm4461_vm2, %v4452_v51  ;;  %v4453_v43 = vadd.f32 %v4934_v33, %v4442_v52 }
 0x61d   : > { %4465 = vst.msk [vmem:[%s8337_s22 + $0x18] sm:$0xff] %vm4461_vm2, %v4453_v43  ;;  %v4935_v1 = vpop.f32.mrb[140].mxu1 }
 0x61e   : > { %v4936_v14 = vpop.f32.mrb[141].mxu1 }
 0x61f   : > { %v4937_v8 = vadd.f32 %v4936_v14, %v4935_v1  ;;  %v4938_v3 = vpop.f32.mrb[142].mxu1 }
 0x620   : > { %v4939_v25 = vpop.f32.mrb[143].mxu1 }
 0x621   : > { %v4454_v45 = vadd.f32 %v4937_v8, %v4443_v59  ;;  %v4940_v18 = vadd.f32 %v4939_v25, %v4938_v3 }
 0x623   : > { %4466 = vst.msk [vmem:[%s8337_s22 + $0x20] sm:$0xff] %vm4461_vm2, %v4454_v45  ;;  %v4455_v26 = vadd.f32 %v4940_v18, %v4444_v27 }
 0x625   : > { %4467 = vst.msk [vmem:[%s8337_s22 + $0x28] sm:$0xff] %vm4461_vm2, %v4455_v26  ;;  %v4941_v9 = vpop.f32.mrb[144].mxu1 }
 0x626   : > { %v4942_v35 = vpop.f32.mrb[145].mxu1 }
 0x627   : > { %v4943_v53 = vadd.f32 %v4942_v35, %v4941_v9  ;;  %v4944_v16 = vpop.f32.mrb[146].mxu1 }
 0x628   : > { %v4945_v61 = vpop.f32.mrb[147].mxu1 }
 0x629   : > { %v4456_v39 = vadd.f32 %v4943_v53, %v4445_v24  ;;  %v4946_v49 = vadd.f32 %v4945_v61, %v4944_v16 }
 0x62b   : > { %4468 = vst.msk [vmem:[%s8337_s22 + $0x30] sm:$0xff] %vm4461_vm2, %v4456_v39  ;;  %v4457_v13 = vadd.f32 %v4946_v49, %v4446_v38 }
 0x62d   : > { %4469 = vst.msk [vmem:[%s8337_s22 + $0x38] sm:$0xff] %vm4461_vm2, %v4457_v13  ;;  %v4947_v21 = vpop.f32.mrb[148].mxu1 }
 0x62e   : > { %v4948_v23 = vpop.f32.mrb[149].mxu1 }
 0x62f   : > { %v4949_v19 = vadd.f32 %v4948_v23, %v4947_v21  ;;  %v4950_v60 = vpop.f32.mrb[150].mxu1 }
 0x630   : > { %v4951_v17 = vpop.f32.mrb[151].mxu1 }
 0x631   : > { %v4458_v46 = vadd.f32 %v4949_v19, %v4447_v15  ;;  %v4952_v2 = vadd.f32 %v4951_v17, %v4950_v60 }
 0x633   : > { %4470 = vst.msk [vmem:[%s8337_s22 + $0x40] sm:$0xff] %vm4461_vm2, %v4458_v46  ;;  %v4459_v54 = vadd.f32 %v4952_v2, %v4448_v7 }
 0x635   : > { %4471 = vst.msk [vmem:[%s8337_s22 + $0x48] sm:$0xff] %vm4461_vm2, %v4459_v54  ;;  %v4953_v36 = vpop.f32.mrb[152].mxu1 }
 0x636   : > { %v4954_v62 = vpop.f32.mrb[153].mxu1 }
 0x637   : > { %v4955_v44 = vadd.f32 %v4954_v62, %v4953_v36  ;;  %v4956_v58 = vpop.f32.mrb[154].mxu1 }
 0x638   : > { %v4957_v10 = vpop.f32.mrb[155].mxu1 }
 0x639   : > { %v4460_v29 = vadd.f32 %v4955_v44, %v4449_v4 }
 0x63b   : > { %4472 = vst.msk [vmem:[%s8337_s22 + $0x50] sm:$0xff] %vm4461_vm2, %v4460_v29 }
 0x63c PF: > { %s8712_s24 = sld [smem:[#allocation7_spill]] }
 0x642   : > { %s38_s16 = sadd.s32 1, %s8712_s24  }
 0x643   : > { %p35_p11 = scmp.ge.s32.totalorder %s38_s16, 5  }
 0x645   :  { %37 = sbr.rel (!%p35_p11) target bundleno = 23 (0x17), region = 131 }

// kernel: egnn_sparse_network.5
= control target key start
LH: loop header
LB: loop body
LE: loop exit
PB: predicated region body
PF: predicated region fallthrough
CT: control target
= control target key end

     0   :  { %v975_v0 = vmov 1   ;;  %v976_v4 = vmov 0   ;;  %vm748_vm0 = vcmask 23552   ;;  %s977_s29 = smov 3   ;;  %s978_s25 = smov 125   ;;  %v979_v49 = vmov 0.0   ;;  %s1438_s2 = inlined_call_operand.vmem [shape: f32[80,2], index: 2, kind: input, shape index: {}]   ;;  %s1439_s1 = inlined_call_operand.vmem [shape: f32[80,19], index: 1, kind: input, shape index: {}]   ;;  %s1440_s0 = inlined_call_operand.vmem [shape: f32[80,35], index: 0, kind: input, shape index: {}]   ;;  %s1441_s10 = inlined_call_operand.vmem [shape: f32[80,35], index: 10, kind: output, shape index: {}]   ;;  %s1442_s4 = inlined_call_operand.vmem [shape: f32[1,32], index: 4, kind: input, shape index: {}]   ;;  %s1443_s3 = inlined_call_operand.vmem [shape: f32[1,32], index: 3, kind: input, shape index: {}]   ;;  %s1444_s6 = inlined_call_operand.vmem [shape: bf16[16,64], index: 6, kind: input, shape index: {}]   ;;  %s1445_s5 = inlined_call_operand.vmem [shape: bf16[32,64], index: 5, kind: input, shape index: {}]   ;;  %s1446_s8 = inlined_call_operand.vmem [shape: bf16[64,32], index: 8, kind: input, shape index: {}]   ;;  %s1447_s7 = inlined_call_operand.vmem [shape: f32[1,64], index: 7, kind: input, shape index: {}]   ;;  %s1448_s9 = inlined_call_operand.vmem [shape: f32[1,32], index: 9, kind: input, shape index: {}]  }
   0x1   :  { %916 = vset.pattern.permute.xlu0 %v975_v0  ;;  %914 = vset.pattern.permute.xlu1 %v975_v0  ;;  %v68_v1 = vld [vmem:[%s1438_s2 + $0x10] sm:$0xff]  ;;  %v66_v2 = vld [vmem:[%s1438_s2] sm:$0xff]  ;;  %v67_v3 = vld [vmem:[%s1438_s2 + $0x8] sm:$0xff]  ;;  %vm980_vm1 = vmmov 0   ;;  %vm261_vm2 = vcmask 130048   ;;  %vm377_vm3 = vcmask 261120  }
   0x2   :  { %145 = vperm.xlu0 %916, %v68_v1   ;;  %137 = vperm.xlu1 %914, %v66_v2   ;;  %v1051_v5 = vld [vmem:[%s1440_s0] sm:$0xff]  ;;  %v69_v8 = vld [vmem:[%s1438_s2 + $0x18] sm:$0xff]  ;;  %v1071_v9 = vld [vmem:[%s1440_s0 + $0x8] sm:$0xff]  ;;  %vm590_vm4 = vcmask 523264   ;;  %vm759_vm5 = vcmask 285720  }
   0x3   :  { %v1056_v6 = vld [vmem:[%s1439_s1] sm:$0xff]  ;;  %v1076_v10 = vld [vmem:[%s1439_s1 + $0x8] sm:$0xff]  ;;  %v1087_v12 = vld [vmem:[%s1440_s0 + $0x18] sm:$0xff]  ;;  %906 = vmatprep.subr.bf16.mxu1 %v979_v49  ;;  %842 = vmatprep.mubr.msk.bf16.mxu1 %vm980_vm1, %v979_v49 }
   0x4   :  { %v56_v7 = vadd.f32 %v1056_v6, %v1051_v5  ;;  %v57_v11 = vadd.f32 %v1076_v10, %v1071_v9  ;;  %v1092_v13 = vld [vmem:[%s1439_s1 + $0x18] sm:$0xff]  ;;  %v1099_v15 = vld [vmem:[%s1440_s0 + $0x10] sm:$0xff]  ;;  %v775_v18 = vld [vmem:[%s1442_s4] ss:$0 sm:$0xff]  ;;  %v233_v47 = vpack.c.bf16 %v1076_v10, %v1056_v6  ;;  %832 = vmatprep.subr.bf16.mxu0 %v979_v49  ;;  %834 = vmatprep.mubr.msk.bf16.mxu0 %vm980_vm1, %v979_v49 }
   0x5   :  { %v59_v14 = vadd.f32 %v1092_v13, %v1087_v12  ;;  %v1104_v16 = vld [vmem:[%s1439_s1 + $0x10] sm:$0xff]  ;;  %v774_v19 = vld [vmem:[%s1443_s3] ss:$0 sm:$0xff]  ;;  %v71_v20 = vld [vmem:[%s1438_s2 + $0x28] sm:$0xff] }
   0x6   :  { %917 = vset.pattern.permute.xlu0 %v976_v4  ;;  %141 = vperm.xlu1 %914, %v67_v3   ;;  %749 = vst.msk [vmem:[%s1441_s10] sm:$0xff] %vm748_vm0, %v56_v7  ;;  %750 = vst.msk [vmem:[%s1441_s10 + $0x8] sm:$0xff] %vm748_vm0, %v57_v11  ;;  %v58_v17 = vadd.f32 %v1104_v16, %v1099_v15  ;;  %v70_v21 = vld [vmem:[%s1438_s2 + $0x20] sm:$0xff]  ;;  %v51_v22 = vld [vmem:[%s1439_s1 + $0x28] sm:$0xff]  ;;  %v234_v48 = vpack.c.bf16 %v1092_v13, %v1104_v16 }
   0x7   :  { %78 = vperm.xlu0 %917, %v66_v2   ;;  %752 = vst.msk [vmem:[%s1441_s10 + $0x18] sm:$0xff] %vm748_vm0, %v59_v14  ;;  %v1138_v23 = vld [vmem:[%s1440_s0 + $0x28] sm:$0xff]  ;;  %v50_v24 = vld [vmem:[%s1439_s1 + $0x20] sm:$0xff]  ;;  %v72_v27 = vld [vmem:[%s1438_s2 + $0x30] sm:$0xff] }
   0x8   :  { %751 = vst.msk [vmem:[%s1441_s10 + $0x10] sm:$0xff] %vm748_vm0, %v58_v17  ;;  %v61_v25 = vadd.f32 %v51_v22, %v1138_v23  ;;  %v1147_v26 = vld [vmem:[%s1440_s0 + $0x20] sm:$0xff]  ;;  %v52_v29 = vld [vmem:[%s1439_s1 + $0x30] sm:$0xff]  ;;  %v75_v32 = vld [vmem:[%s1438_s2 + $0x48] sm:$0xff]  ;;  %v235_v34 = vpack.c.bf16 %v51_v22, %v50_v24 }
   0x9   :  { %v60_v28 = vadd.f32 %v50_v24, %v1147_v26  ;;  %v1167_v30 = vld [vmem:[%s1440_s0 + $0x30] sm:$0xff]  ;;  %v73_v33 = vld [vmem:[%s1438_s2 + $0x38] sm:$0xff]  ;;  %v54_v37 = vld [vmem:[%s1439_s1 + $0x40] sm:$0xff] }
   0xa   :  { %915 = vset.pattern.permute.xlu1 %v976_v4  ;;  %754 = vst.msk [vmem:[%s1441_s10 + $0x28] sm:$0xff] %vm748_vm0, %v61_v25  ;;  %v62_v31 = vadd.f32 %v52_v29, %v1167_v30  ;;  %v53_v35 = vld [vmem:[%s1439_s1 + $0x38] sm:$0xff]  ;;  %v55_v38 = vld [vmem:[%s1439_s1 + $0x48] sm:$0xff]  ;;  %v74_v41 = vld [vmem:[%s1438_s2 + $0x40] sm:$0xff] }
   0xb   :  { %83 = vperm.xlu0 %917, %v67_v3   ;;  %93 = vperm.xlu1 %915, %v69_v8   ;;  %753 = vst.msk [vmem:[%s1441_s10 + $0x20] sm:$0xff] %vm748_vm0, %v60_v28  ;;  %v1190_v36 = vld [vmem:[%s1440_s0 + $0x38] sm:$0xff]  ;;  %v237_v40 = vpack.c.bf16 %v55_v38, %v54_v37  ;;  %v1214_v42 = vld [vmem:[%s1440_s0 + $0x40] sm:$0xff]  ;;  %v1225_v44 = vld [vmem:[%s1440_s0 + $0x48] sm:$0xff]  ;;  %v236_v45 = vpack.c.bf16 %v53_v35, %v52_v29 }
   0xc   :  { %755 = vst.msk [vmem:[%s1441_s10 + $0x30] sm:$0xff] %vm748_vm0, %v62_v31  ;;  %v63_v39 = vadd.f32 %v53_v35, %v1190_v36  ;;  %v64_v43 = vadd.f32 %v54_v37, %v1214_v42  ;;  %v65_v46 = vadd.f32 %v55_v38, %v1225_v44  ;;  %v928_v50 = vld [vmem:[%s1444_s6] sm:$0xff]  }
   0xd   :  { %907 = vmatpush3.bf16.msra.mxu1 %v928_v50  ;;  %833 = vmatpush3.bf16.msra.mxu0 %v928_v50 }
   0xe   :  { %756 = vst.msk [vmem:[%s1441_s10 + $0x38] sm:$0xff] %vm748_vm0, %v63_v39  ;;  %757 = vst.msk [vmem:[%s1441_s10 + $0x40] sm:$0xff] %vm748_vm0, %v64_v43  ;;  %854 = vmatprep.subr.bf16.mxu1 %v979_v49  ;;  %878 = vmatprep.subr.bf16.mxu0 %v979_v49 }
   0xf   :  { %88 = vperm.xlu0 %917, %v68_v1   ;;  %918 = vset.pattern.permute.xlu1 %v975_v0  ;;  %758 = vst.msk [vmem:[%s1441_s10 + $0x48] sm:$0xff] %vm748_vm0, %v65_v46 }
  0x10   :  { %149 = vperm.xlu1 %918, %v69_v8  }
  0x13   :  { %211 = vrot.lane.b32.xlu0 %v775_v18, %s977_s29 }
  0x14   :  { %192 = vrot.lane.b32.xlu1 %v774_v19, %s977_s29 }
  0x15   :  { %919 = vset.pattern.permute.xlu1 %v976_v4 }
  0x17   :  { %103 = vperm.xlu0 %917, %v71_v20  }
  0x18   :  { %98 = vperm.xlu1 %919, %v70_v21  }
  0x1b   :  { %108 = vperm.xlu0 %917, %v72_v27  }
  0x1c   :  { %920 = vset.pattern.permute.xlu1 %v975_v0 }
  0x1d   :  { %153 = vperm.xlu1 %920, %v70_v21  }
  0x1f   :  { %922 = vset.pattern.permute.xlu0 %v975_v0 }
  0x20   :  { %161 = vperm.xlu0 %922, %v72_v27  }
  0x21   :  { %157 = vperm.xlu1 %920, %v71_v20  }
  0x24   :  { %925 = vset.pattern.permute.xlu0 %v976_v4 }
  0x25   :  { %921 = vset.pattern.permute.xlu1 %v976_v4  ;;  %123 = vperm.xlu0 %925, %v75_v32  }
  0x26   :  { %113 = vperm.xlu1 %921, %v73_v33  }
  0x29   :  { %249 = vrot.lane.b32.xlu0 %v235_v34, %s978_s25 }
  0x2a   :  { %923 = vset.pattern.permute.xlu1 %v975_v0  ;;  %927 = vset.pattern.permute.xlu0 %v975_v0 }
  0x2b   :  { %165 = vperm.xlu1 %923, %v73_v33  }
  0x2d   :  { %253 = vrot.lane.b32.xlu0 %v237_v40, %s978_s25  ;;  %v929_v40 = vld [vmem:[%s1445_s5] sm:$0xff]  }
  0x2f   :  { %924 = vset.pattern.permute.xlu1 %v976_v4 }
  0x30   :  { %118 = vperm.xlu1 %924, %v74_v41  }
  0x34   :  { %926 = vset.pattern.permute.xlu1 %v975_v0 }
  0x35   :  { %169 = vperm.xlu1 %926, %v74_v41  }
  0x39   :  { %173 = vperm.xlu1 %926, %v75_v32  }
  0x3d   :  { %251 = vrot.lane.b32.xlu1 %v236_v45, %s978_s25 }
  0x41   :  { %245 = vrot.lane.b32.xlu1 %v233_v47, %s978_s25 }
  0x45   :  { %247 = vrot.lane.b32.xlu1 %v234_v48, %s978_s25  ;;  %v930_v48 = vld [vmem:[%s1445_s5 + $0x8] sm:$0xff]  }
  0x81   :  { %v138_v51 = vpop.permute.xlu1 %137  ;;  %v146_v52 = vpop.permute.xlu0 %145 }
  0x85   :  { %v142_v53 = vpop.permute.xlu1 %141 }
  0x86   :  { %v79_v54 = vpop.permute.xlu0 %78 }
  0x87   :  { %v126_v57 = vsub.f32 %v1051_v5, %v79_v54 }
  0x89   :  { %v176_v0 = vmul.f32 %v138_v51, %v126_v57 }
  0x8a   :  { %v84_v55 = vpop.permute.xlu0 %83  ;;  %v94_v56 = vpop.permute.xlu1 %93 }
  0x8b   :  { %v127_v58 = vsub.f32 %v1071_v9, %v84_v55  ;;  %v129_v62 = vsub.f32 %v1087_v12, %v94_v56 }
  0x8d   :  { %v177_v1 = vmul.f32 %v142_v53, %v127_v58 }
  0x8e   :  { %v89_v59 = vpop.permute.xlu0 %88 }
  0x8f   :  { %v128_v60 = vsub.f32 %v1099_v15, %v89_v59  ;;  %v150_v61 = vpop.permute.xlu1 %149 }
  0x90   :  { %v179_v2 = vmul.f32 %v150_v61, %v129_v62 }
  0x91   :  { %v178_v63 = vmul.f32 %v146_v52, %v128_v60 }
  0x92   :  { %v1254_v3 = vpop.permute.xlu0 %211 }
  0x93   :  { %v193_v4 = vpop.permute.xlu1 %192 }
  0x94   :  { %v195_v6 = vmul.f32 %v193_v4, %v176_v0  ;;  %v196_v7 = vmul.f32 %v193_v4, %v177_v1  ;;  %v197_v8 = vmul.f32 %v193_v4, %v178_v63  ;;  %v198_v10 = vmul.f32 %v193_v4, %v179_v2 }
  0x96   :  { %v104_v11 = vpop.permute.xlu0 %103  ;;  %v214_v13 = vadd.f32 %v1254_v3, %v195_v6  ;;  %v215_v14 = vadd.f32 %v1254_v3, %v196_v7  ;;  %v216_v18 = vadd.f32 %v1254_v3, %v197_v8  ;;  %v217_v19 = vadd.f32 %v1254_v3, %v198_v10 }
  0x97   :  { %v99_v16 = vpop.permute.xlu1 %98  ;;  %v131_v27 = vsub.f32 %v1138_v23, %v104_v11 }
  0x98   :  { %v224_v17 = vpack.c.bf16 %v215_v14, %v214_v13  ;;  %v130_v21 = vsub.f32 %v1147_v26, %v99_v16  ;;  %v225_v24 = vpack.c.bf16 %v217_v19, %v216_v18  ;;  %v932_v18 = vld [vmem:[%s1446_s8 + $0x8] sm:$0xff]  }
  0x9a   :  { %v109_v20 = vpop.permute.xlu0 %108  ;;  %355 = vrot.lane.b32.xlu0 %v224_v17, %s978_s25  ;;  %v931_v17 = vld [vmem:[%s1446_s8] sm:$0xff]  }
  0x9b   :  { %v132_v35 = vsub.f32 %v1167_v30, %v109_v20  ;;  %v933_v20 = vld [vmem:[%s1446_s8 + $0x10] sm:$0xff]  }
  0x9c   :  { %v154_v22 = vpop.permute.xlu1 %153 }
  0x9d   :  { %v180_v25 = vmul.f32 %v154_v22, %v130_v21 }
  0x9e   :  { %357 = vrot.lane.b32.xlu0 %v225_v24, %s978_s25 }
  0x9f   :  { %v162_v28 = vpop.permute.xlu0 %161  ;;  %v199_v31 = vmul.f32 %v193_v4, %v180_v25  ;;  %v934_v25 = vld [vmem:[%s1446_s8 + $0x18] sm:$0xff]  }
  0xa0   :  { %v158_v29 = vpop.permute.xlu1 %157  ;;  %v182_v41 = vmul.f32 %v162_v28, %v132_v35 }
  0xa1   :  { %v181_v32 = vmul.f32 %v158_v29, %v131_v27  ;;  %v218_v37 = vadd.f32 %v1254_v3, %v199_v31 }
  0xa2   :  { %v201_v50 = vmul.f32 %v193_v4, %v182_v41 }
  0xa3   :  { %v200_v33 = vmul.f32 %v193_v4, %v181_v32 }
  0xa4   :  { %v124_v34 = vpop.permute.xlu0 %123  ;;  %v220_v53 = vadd.f32 %v1254_v3, %v201_v50 }
  0xa5   :  { %v219_v38 = vadd.f32 %v1254_v3, %v200_v33  ;;  %v114_v39 = vpop.permute.xlu1 %113  ;;  %v135_v60 = vsub.f32 %v1225_v44, %v124_v34 }
  0xa6   :  { %v133_v46 = vsub.f32 %v1190_v36, %v114_v39 }
  0xa7   :  { %v226_v43 = vpack.c.bf16 %v219_v38, %v218_v37 }
  0xa8   :  { %v250_v45 = vpop.permute.xlu0 %249 }
  0xa9   :  { %359 = vrot.lane.b32.xlu1 %v226_v43, %s978_s25  ;;  %843 = vmatmul.mubr.msk.bf16.vlgmr.msra.gmra.mrb[0].mxu1 %vm261_vm2, %v250_v45 }
  0xaa   :  { %v166_v47 = vpop.permute.xlu1 %165  ;;  %846 = vmatprep.mubr.msk.bf16.mxu1 %vm980_vm1, %v979_v49  ;;  %855 = vmatpush3.bf16.msra.mxu1 %v929_v40 }
  0xab   :  { %v183_v51 = vmul.f32 %v166_v47, %v133_v46  ;;  %856 = vmatprep.subr.bf16.mxu1 %v979_v49 }
  0xac   :  { %v254_v10 = vpop.permute.xlu0 %253 }
  0xad   :  { %v202_v52 = vmul.f32 %v193_v4, %v183_v51 }
  0xae   :  { %857 = vmatpush3.bf16.msra.mxu1 %v930_v48  ;;  %v1333_v48 = vld [vmem:[%s1447_s7] ss:$0 sm:$0xff] }
  0xaf   :  { %v221_v54 = vadd.f32 %v1254_v3, %v202_v52  ;;  %v119_v55 = vpop.permute.xlu1 %118 }
  0xb0   :  { %v134_v57 = vsub.f32 %v1214_v42, %v119_v55 }
  0xb1   :  { %v227_v56 = vpack.c.bf16 %v221_v54, %v220_v53 }
  0xb3   :  { %361 = vrot.lane.b32.xlu0 %v227_v56, %s978_s25 }
  0xb4   :  { %v170_v58 = vpop.permute.xlu1 %169 }
  0xb5   :  { %v184_v59 = vmul.f32 %v170_v58, %v134_v57 }
  0xb7   :  { %v203_v62 = vmul.f32 %v193_v4, %v184_v59 }
  0xb8   :  { %v174_v61 = vpop.permute.xlu1 %173 }
  0xb9   :  { %v185_v63 = vmul.f32 %v174_v61, %v135_v60  ;;  %v222_v2 = vadd.f32 %v1254_v3, %v203_v62 }
  0xbb   :  { %v204_v0 = vmul.f32 %v193_v4, %v185_v63 }
  0xbc   :  { %v252_v1 = vpop.permute.xlu1 %251 }
  0xbd   :  { %v223_v6 = vadd.f32 %v1254_v3, %v204_v0  ;;  %847 = vmatmul.mubr.msk.bf16.gmra.mrb[4].mxu1 %vm261_vm2, %v252_v1 }
  0xbe   :  { %850 = vmatprep.mubr.msk.bf16.mxu1 %vm980_vm1, %v979_v49 }
  0xbf   :  { %v228_v7 = vpack.c.bf16 %v223_v6, %v222_v2 }
  0xc0   :  { %v246_v8 = vpop.permute.xlu1 %245 }
  0xc1   :  { %363 = vrot.lane.b32.xlu1 %v228_v7, %s978_s25  ;;  %835 = vmatmul.mubr.msk.bf16.vlgmr.msra.gmra.mrb[0].mxu0 %vm261_vm2, %v246_v8 }
  0xc2   :  { %838 = vmatprep.mubr.msk.bf16.mxu0 %vm980_vm1, %v979_v49  ;;  %879 = vmatpush3.bf16.msra.mxu0 %v931_v17 }
  0xc3   :  { %880 = vmatprep.subr.bf16.mxu0 %v979_v49 }
  0xc4   :  { %v248_v3 = vpop.permute.xlu1 %247 }
  0xc5   :  { %851 = vmatmul.mubr.msk.bf16.gmra.mrb[8].mxu1 %vm261_vm2, %v254_v10 }
  0xc6   :  { %858 = vmatprep.mubr.msk.bf16.mxu1 %vm980_vm1, %v979_v49  ;;  %881 = vmatpush3.bf16.msra.mxu0 %v932_v18 }
  0xc7   :  { %882 = vmatprep.subr.bf16.mxu0 %v979_v49 }
  0xc9   :  { %839 = vmatmul.mubr.msk.bf16.gmra.mrb[4].mxu0 %vm261_vm2, %v248_v3 }
  0xca   :  { %886 = vmatprep.mubr.msk.bf16.mxu0 %vm980_vm1, %v979_v49  ;;  %883 = vmatpush3.bf16.msra.mxu0 %v933_v20 }
  0xcb   :  { %884 = vmatprep.subr.bf16.mxu0 %v979_v49 }
  0xce   :  { %885 = vmatpush3.bf16.msra.mxu0 %v934_v25 }
 0x10c   :  { %v356_v4 = vpop.permute.xlu0 %355 }
 0x10d   :  { %859 = vmatmul.mubr.msk.bf16.vlgmr.msra.gmra.mrb[12].mxu1 %vm377_vm3, %v356_v4 }
 0x10e   :  { %862 = vmatprep.mubr.msk.bf16.mxu1 %vm980_vm1, %v979_v49 }
 0x110   :  { %v358_v11 = vpop.permute.xlu0 %357 }
 0x115   :  { %863 = vmatmul.mubr.msk.bf16.gmra.mrb[16].mxu1 %vm377_vm3, %v358_v11 }
 0x116   :  { %866 = vmatprep.mubr.msk.bf16.mxu1 %vm980_vm1, %v979_v49 }
 0x11b   :  { %v360_v13 = vpop.permute.xlu1 %359 }
 0x11d   :  { %867 = vmatmul.mubr.msk.bf16.gmra.mrb[20].mxu1 %vm377_vm3, %v360_v13 }
 0x11e   :  { %870 = vmatprep.mubr.msk.bf16.mxu1 %vm980_vm1, %v979_v49 }
 0x125   :  { %v362_v14 = vpop.permute.xlu0 %361 }
 0x126   :  { %871 = vmatmul.mubr.msk.bf16.gmra.mrb[24].mxu1 %vm377_vm3, %v362_v14 }
 0x127   :  { %874 = vmatprep.mubr.msk.bf16.mxu1 %vm980_vm1, %v979_v49 }
 0x133   :  { %v364_v16 = vpop.permute.xlu1 %363 }
 0x134   :  { %875 = vmatmul.mubr.msk.bf16.gmra.mrb[28].mxu1 %vm377_vm3, %v364_v16 }
 0x17c   :  { %v327_v19 = vpop.f32.mrb[0].mxu1 }
 0x17d   :  { %v844_v21 = vpop.f32.mrb[1].mxu1 }
 0x17e   :  { %v330_v22 = vpop.f32.mrb[2].mxu1 }
 0x17f   :  { %v845_v24 = vpop.f32.mrb[3].mxu1 }
 0x190   :  { %v1322_v27 = vpop.f32.mrb[4].mxu1 }
 0x191   :  { %v848_v28 = vpop.f32.mrb[5].mxu1 }
 0x192   :  { %v1324_v29 = vpop.f32.mrb[6].mxu1 }
 0x193   :  { %v849_v31 = vpop.f32.mrb[7].mxu1 }
 0x194   :  { %v311_v32 = vpop.f32.mrb[0].mxu0 }
 0x195   :  { %v836_v33 = vpop.f32.mrb[1].mxu0 }
 0x196   :  { %v314_v34 = vpop.f32.mrb[2].mxu0 }
 0x197   :  { %v837_v35 = vpop.f32.mrb[3].mxu0 }
 0x198   :  { %v1326_v37 = vpop.f32.mrb[8].mxu1 }
 0x199   :  { %v852_v38 = vpop.f32.mrb[9].mxu1 }
 0x19a   :  { %v1328_v39 = vpop.f32.mrb[10].mxu1 }
 0x19b   :  { %v853_v40 = vpop.f32.mrb[11].mxu1 }
 0x19c   :  { %v319_v41 = vpop.f32.mrb[4].mxu0 }
 0x19d   :  { %v840_v43 = vpop.f32.mrb[5].mxu0 }
 0x19e   :  { %v322_v45 = vpop.f32.mrb[6].mxu0 }
 0x19f   :  { %v841_v46 = vpop.f32.mrb[7].mxu0 }
 0x1e0   :  { %v427_v47 = vpop.f32.mrb[12].mxu1 }
 0x1e1   :  { %v428_v50 = vadd.f32 %v427_v47, %v311_v32  ;;  %v860_v51 = vpop.f32.mrb[13].mxu1 }
 0x1e2   :  { %v430_v52 = vpop.f32.mrb[14].mxu1 }
 0x1e3   :  { %v473_v53 = vadd.f32 %v1333_v48, %v428_v50  ;;  %v431_v54 = vadd.f32 %v430_v52, %v314_v34  ;;  %v861_v55 = vpop.f32.mrb[15].mxu1 }
 0x1e5   :  { %v790_v56 = vmul.f32 -1.442695, %v473_v53  ;;  %v474_v57 = vadd.f32 %v1333_v48, %v431_v54 }
 0x1e7   :  { %935 = vpow2.f32 %v790_v56  ;;  %v791_v58 = vmul.f32 -1.442695, %v474_v57 }
 0x1e8   :  { %v435_v59 = vpop.f32.mrb[16].mxu1 }
 0x1e9   :  { %937 = vpow2.f32 %v791_v58  ;;  %v436_v60 = vadd.f32 %v435_v59, %v319_v41  ;;  %v864_v61 = vpop.f32.mrb[17].mxu1 }
 0x1ea   :  { %v438_v62 = vpop.f32.mrb[18].mxu1 }
 0x1eb   :  { %v1338_v63 = vadd.f32 %v1333_v48, %v436_v60  ;;  %v439_v0 = vadd.f32 %v438_v62, %v322_v45  ;;  %v865_v1 = vpop.f32.mrb[19].mxu1 }
 0x1ed   :  { %v792_v2 = vmul.f32 -1.442695, %v1338_v63  ;;  %v476_v6 = vadd.f32 %v1333_v48, %v439_v0 }
 0x1ef   :  { %939 = vpow2.f32 %v792_v2  ;;  %v793_v7 = vmul.f32 -1.442695, %v476_v6 }
 0x1f0   :  { %v443_v8 = vpop.f32.mrb[20].mxu1 }
 0x1f1   :  { %v936_v10 = vpop.eup %935  ;;  %941 = vpow2.f32 %v793_v7  ;;  %v444_v3 = vadd.f32 %v443_v8, %v327_v19  ;;  %v868_v4 = vpop.f32.mrb[21].mxu1 }
 0x1f2   :  { %v513_v11 = vadd.f32 1.0, %v936_v10  ;;  %v446_v13 = vpop.f32.mrb[22].mxu1 }
 0x1f3   :  { %v938_v14 = vpop.eup %937  ;;  %v1343_v16 = vadd.f32 %v1333_v48, %v444_v3  ;;  %v447_v17 = vadd.f32 %v446_v13, %v330_v22  ;;  %v869_v18 = vpop.f32.mrb[23].mxu1 }
 0x1f4   :  { %943 = vrcp.f32 %v513_v11  ;;  %v514_v20 = vadd.f32 1.0, %v938_v14 }
 0x1f5   :  { %v794_v21 = vmul.f32 -1.442695, %v1343_v16  ;;  %v1347_v24 = vadd.f32 %v1333_v48, %v447_v17 }
 0x1f6   :  { %945 = vrcp.f32 %v514_v20 }
 0x1f7   :  { %947 = vpow2.f32 %v794_v21  ;;  %v795_v19 = vmul.f32 -1.442695, %v1347_v24 }
 0x1f9   :  { %v940_v25 = vpop.eup %939  ;;  %949 = vpow2.f32 %v795_v19  ;;  %v451_v28 = vpop.f32.mrb[24].mxu1 }
 0x1fa   :  { %v515_v31 = vadd.f32 1.0, %v940_v25  ;;  %v452_v32 = vadd.f32 %v451_v28, %v1322_v27  ;;  %v872_v33 = vpop.f32.mrb[25].mxu1 }
 0x1fb   :  { %v942_v22 = vpop.eup %941  ;;  %v454_v34 = vpop.f32.mrb[26].mxu1 }
 0x1fc   :  { %951 = vrcp.f32 %v515_v31  ;;  %v516_v35 = vadd.f32 1.0, %v942_v22  ;;  %v479_v38 = vadd.f32 %v1333_v48, %v452_v32  ;;  %v455_v40 = vadd.f32 %v454_v34, %v1324_v29  ;;  %v873_v41 = vpop.f32.mrb[27].mxu1 }
 0x1fe   :  { %v944_v43 = vpop.eup %943  ;;  %953 = vrcp.f32 %v516_v35  ;;  %v796_v45 = vmul.f32 -1.442695, %v479_v38  ;;  %v480_v46 = vadd.f32 %v1333_v48, %v455_v40 }
 0x1ff   :  { %v543_v27 = vmul.f32 %v944_v43, %v473_v53 }
 0x200   :  { %v946_v47 = vpop.eup %945  ;;  %955 = vpow2.f32 %v796_v45  ;;  %v797_v50 = vmul.f32 -1.442695, %v480_v46 }
 0x201   :  { %v948_v51 = vpop.eup %947  ;;  %v544_v52 = vmul.f32 %v946_v47, %v474_v57 }
 0x202   :  { %v517_v54 = vadd.f32 1.0, %v948_v51  ;;  %957 = vpow2.f32 %v797_v50 }
 0x203   :  { %v950_v55 = vpop.eup %949  ;;  %v553_v56 = vpack.c.bf16 %v544_v52, %v543_v27 }
 0x204   :  { %959 = vrcp.f32 %v517_v54  ;;  %v518_v58 = vadd.f32 1.0, %v950_v55 }
 0x205   :  { %887 = vmatmul.mubr.msk.bf16.vlgmr.msra.gmra.mrb[8].mxu0 %vm590_vm4, %v553_v56 }
 0x206   :  { %v952_v29 = vpop.eup %951  ;;  %961 = vrcp.f32 %v518_v58  ;;  %890 = vmatprep.mubr.msk.bf16.mxu0 %vm980_vm1, %v979_v49 }
 0x207   :  { %v459_v59 = vpop.f32.mrb[28].mxu1  ;;  %v545_v57 = vmul.f32 %v952_v29, %v1338_v63 }
 0x208   :  { %v954_v60 = vpop.eup %953  ;;  %v460_v61 = vadd.f32 %v459_v59, %v1326_v37  ;;  %v876_v53 = vpop.f32.mrb[29].mxu1 }
 0x209   :  { %v546_v62 = vmul.f32 %v954_v60, %v476_v6  ;;  %v462_v0 = vpop.f32.mrb[30].mxu1 }
 0x20a   :  { %v956_v1 = vpop.eup %955  ;;  %v481_v2 = vadd.f32 %v1333_v48, %v460_v61  ;;  %v463_v7 = vadd.f32 %v462_v0, %v1328_v39  ;;  %v877_v8 = vpop.f32.mrb[31].mxu1  ;;  %v809_v61 = vld [vmem:[%s1448_s9] ss:$0 sm:$0xff] }
 0x20b   :  { %v554_v10 = vpack.c.bf16 %v546_v62, %v545_v57  ;;  %v519_v3 = vadd.f32 1.0, %v956_v1 }
 0x20c   :  { %v958_v4 = vpop.eup %957  ;;  %v798_v11 = vmul.f32 -1.442695, %v481_v2  ;;  %v482_v13 = vadd.f32 %v1333_v48, %v463_v7 }
 0x20d   :  { %963 = vrcp.f32 %v519_v3  ;;  %v520_v14 = vadd.f32 1.0, %v958_v4  ;;  %891 = vmatmul.mubr.msk.bf16.gmra.mrb[12].mxu0 %vm590_vm4, %v554_v10 }
 0x20e   :  { %v960_v37 = vpop.eup %959  ;;  %965 = vpow2.f32 %v798_v11  ;;  %v799_v63 = vmul.f32 -1.442695, %v482_v13  ;;  %894 = vmatprep.mubr.msk.bf16.mxu0 %vm980_vm1, %v979_v49 }
 0x20f   :  { %967 = vrcp.f32 %v520_v14  ;;  %v547_v39 = vmul.f32 %v960_v37, %v1343_v16 }
 0x210   :  { %v962_v6 = vpop.eup %961  ;;  %969 = vpow2.f32 %v799_v63 }
 0x211   :  { %v548_v17 = vmul.f32 %v962_v6, %v1347_v24 }
 0x213   :  { %v555_v18 = vpack.c.bf16 %v548_v17, %v547_v39 }
 0x215   :  { %895 = vmatmul.mubr.msk.bf16.gmra.mrb[16].mxu0 %vm590_vm4, %v555_v18 }
 0x216   :  { %898 = vmatprep.mubr.msk.bf16.mxu0 %vm980_vm1, %v979_v49 }
 0x217   :  { %v964_v48 = vpop.eup %963 }
 0x218   :  { %v966_v20 = vpop.eup %965  ;;  %v549_v28 = vmul.f32 %v964_v48, %v479_v38 }
 0x219   :  { %v968_v21 = vpop.eup %967  ;;  %v521_v19 = vadd.f32 1.0, %v966_v20 }
 0x21a   :  { %v970_v25 = vpop.eup %969  ;;  %v550_v31 = vmul.f32 %v968_v21, %v480_v46 }
 0x21b   :  { %971 = vrcp.f32 %v521_v19  ;;  %v522_v32 = vadd.f32 1.0, %v970_v25 }
 0x21c   :  { %v556_v33 = vpack.c.bf16 %v550_v31, %v549_v28 }
 0x21d   :  { %973 = vrcp.f32 %v522_v32 }
 0x21e   :  { %899 = vmatmul.mubr.msk.bf16.gmra.mrb[20].mxu0 %vm590_vm4, %v556_v33 }
 0x21f   :  { %902 = vmatprep.mubr.msk.bf16.mxu0 %vm980_vm1, %v979_v49 }
 0x225   :  { %v972_v16 = vpop.eup %971 }
 0x226   :  { %v551_v22 = vmul.f32 %v972_v16, %v481_v2 }
 0x227   :  { %v974_v24 = vpop.eup %973 }
 0x228   :  { %v552_v34 = vmul.f32 %v974_v24, %v482_v13 }
 0x22a   :  { %v557_v35 = vpack.c.bf16 %v552_v34, %v551_v22 }
 0x22c   :  { %903 = vmatmul.mubr.msk.bf16.gmra.mrb[24].mxu0 %vm590_vm4, %v557_v35 }
 0x2d8   :  { %v640_v40 = vpop.f32.mrb[8].mxu0 }
 0x2d9   :  { %689 = vrot.lane.b32.xlu0 %v640_v40, %s977_s29  ;;  %v888_v38 = vpop.f32.mrb[9].mxu0 }
 0x2da   :  { %v643_v41 = vpop.f32.mrb[10].mxu0 }
 0x2db   :  { %691 = vrot.lane.b32.xlu1 %v643_v41, %s977_s29  ;;  %v889_v43 = vpop.f32.mrb[11].mxu0 }
 0x2e0   :  { %v648_v45 = vpop.f32.mrb[12].mxu0 }
 0x2e1   :  { %693 = vrot.lane.b32.xlu0 %v648_v45, %s977_s29  ;;  %v892_v46 = vpop.f32.mrb[13].mxu0 }
 0x2e2   :  { %v651_v49 = vpop.f32.mrb[14].mxu0 }
 0x2e3   :  { %695 = vrot.lane.b32.xlu1 %v651_v49, %s977_s29  ;;  %v893_v47 = vpop.f32.mrb[15].mxu0 }
 0x2e8   :  { %v656_v50 = vpop.f32.mrb[16].mxu0 }
 0x2e9   :  { %697 = vrot.lane.b32.xlu0 %v656_v50, %s977_s29  ;;  %v896_v51 = vpop.f32.mrb[17].mxu0 }
 0x2ea   :  { %v659_v27 = vpop.f32.mrb[18].mxu0 }
 0x2eb   :  { %699 = vrot.lane.b32.xlu1 %v659_v27, %s977_s29  ;;  %v897_v52 = vpop.f32.mrb[19].mxu0 }
 0x2f1   :  { %v664_v54 = vpop.f32.mrb[20].mxu0 }
 0x2f2   :  { %701 = vrot.lane.b32.xlu0 %v664_v54, %s977_s29  ;;  %v900_v55 = vpop.f32.mrb[21].mxu0 }
 0x2f3   :  { %v667_v56 = vpop.f32.mrb[22].mxu0 }
 0x2f4   :  { %703 = vrot.lane.b32.xlu1 %v667_v56, %s977_s29  ;;  %v901_v58 = vpop.f32.mrb[23].mxu0 }
 0x2ff   :  { %v672_v29 = vpop.f32.mrb[24].mxu0 }
 0x300   :  { %705 = vrot.lane.b32.xlu0 %v672_v29, %s977_s29  ;;  %v904_v59 = vpop.f32.mrb[25].mxu0 }
 0x301   :  { %v675_v60 = vpop.f32.mrb[26].mxu0 }
 0x302   :  { %707 = vrot.lane.b32.xlu1 %v675_v60, %s977_s29  ;;  %v905_v53 = vpop.f32.mrb[27].mxu0 }
 0x304   :  { %735 = vrot.lane.b32.xlu0 %v809_v61, %s977_s29 }
 0x34b   :  { %v690_v57 = vpop.permute.xlu0 %689 }
 0x34c   :  { %v719_v4 = vadd.f32 %v690_v57, %v1051_v5 }
 0x34d   :  { %v692_v62 = vpop.permute.xlu1 %691 }
 0x34e   :  { %v720_v11 = vadd.f32 %v692_v62, %v1071_v9 }
 0x353   :  { %v694_v0 = vpop.permute.xlu0 %693 }
 0x354   :  { %v721_v14 = vadd.f32 %v694_v0, %v1099_v15 }
 0x355   :  { %v696_v1 = vpop.permute.xlu1 %695 }
 0x356   :  { %v722_v37 = vadd.f32 %v696_v1, %v1087_v12 }
 0x35b   :  { %v698_v2 = vpop.permute.xlu0 %697 }
 0x35c   :  { %v723_v63 = vadd.f32 %v698_v2, %v1147_v26 }
 0x35d   :  { %v700_v7 = vpop.permute.xlu1 %699 }
 0x35e   :  { %v724_v39 = vadd.f32 %v700_v7, %v1138_v23 }
 0x364   :  { %v702_v8 = vpop.permute.xlu0 %701 }
 0x365   :  { %v725_v17 = vadd.f32 %v702_v8, %v1167_v30 }
 0x366   :  { %v704_v10 = vpop.permute.xlu1 %703 }
 0x367   :  { %v726_v18 = vadd.f32 %v704_v10, %v1190_v36 }
 0x372   :  { %v706_v3 = vpop.permute.xlu0 %705 }
 0x373   :  { %v727_v5 = vadd.f32 %v706_v3, %v1214_v42 }
 0x374   :  { %v708_v13 = vpop.permute.xlu1 %707 }
 0x375   :  { %v728_v6 = vadd.f32 %v708_v13, %v1225_v44 }
 0x376   :  { %v736_v48 = vpop.permute.xlu0 %735 }
 0x377   :  { %v738_v9 = vadd.f32 %v736_v48, %v719_v4  ;;  %v739_v20 = vadd.f32 %v736_v48, %v720_v11  ;;  %v740_v21 = vadd.f32 %v736_v48, %v721_v14  ;;  %v741_v19 = vadd.f32 %v736_v48, %v722_v37 }
 0x378   :  { %v742_v15 = vadd.f32 %v736_v48, %v723_v63  ;;  %v743_v25 = vadd.f32 %v736_v48, %v724_v39  ;;  %v744_v12 = vadd.f32 %v736_v48, %v725_v17  ;;  %v745_v28 = vadd.f32 %v736_v48, %v726_v18 }
 0x379   :  { %v746_v26 = vadd.f32 %v736_v48, %v727_v5  ;;  %v747_v31 = vadd.f32 %v736_v48, %v728_v6  ;;  %760 = vst.msk [vmem:[%s1441_s10] sm:$0xff] %vm759_vm5, %v738_v9  ;;  %761 = vst.msk [vmem:[%s1441_s10 + $0x8] sm:$0xff] %vm759_vm5, %v739_v20 }
 0x37a   :  { %762 = vst.msk [vmem:[%s1441_s10 + $0x10] sm:$0xff] %vm759_vm5, %v740_v21  ;;  %763 = vst.msk [vmem:[%s1441_s10 + $0x18] sm:$0xff] %vm759_vm5, %v741_v19 }
 0x37b   :  { %764 = vst.msk [vmem:[%s1441_s10 + $0x20] sm:$0xff] %vm759_vm5, %v742_v15  ;;  %765 = vst.msk [vmem:[%s1441_s10 + $0x28] sm:$0xff] %vm759_vm5, %v743_v25 }
 0x37c   :  { %766 = vst.msk [vmem:[%s1441_s10 + $0x30] sm:$0xff] %vm759_vm5, %v744_v12  ;;  %767 = vst.msk [vmem:[%s1441_s10 + $0x38] sm:$0xff] %vm759_vm5, %v745_v28 }
 0x37d   :  { %768 = vst.msk [vmem:[%s1441_s10 + $0x40] sm:$0xff] %vm759_vm5, %v746_v26  ;;  %769 = vst.msk [vmem:[%s1441_s10 + $0x48] sm:$0xff] %vm759_vm5, %v747_v31 }

</bundles_post_ra>
